<compile_context>
chip_gen: v7x
topology: tpu7x:2x2x1
jax: 0.10.0
libtpu: 0.0.40
codegen_flags: <defaults>
</compile_context>

<pallas_src>
import functools

import jax
import jax.numpy as jnp
import numpy as np
from jax.experimental import pallas as pl
from jax.experimental.pallas import tpu as pltpu

EPS = 1e-5


# ----------------------------- in-kernel helpers -----------------------------

def _pad_hw(t):
    """Zero 'same' halo: (H, W, C) -> (H+2, W+2, C), built with on-chip concats
    (leading + sublane axes) — no padded copy is ever materialized in HBM."""
    H, W, C = t.shape
    zr = jnp.zeros((1, W, C), t.dtype)
    t = jnp.concatenate([zr, t, zr], axis=0)
    zc = jnp.zeros((H + 2, 1, C), t.dtype)
    return jnp.concatenate([zc, t, zc], axis=1)


def _im2col_3x3(tp, H, W):
    """Padded (H+2, W+2, C) -> (H*W, 9*C) bf16 patch matrix.
    Column order is tap-major (dh*3+dw), channel-minor — matches
    weight.reshape(9*C, Cout) of a (kh, kw, Cin, Cout) weight."""
    C = tp.shape[-1]
    taps = [tp[dh:dh + H, dw:dw + W, :].reshape(H * W, C)
            for dh in range(3) for dw in range(3)]
    return jnp.concatenate(taps, axis=1).astype(jnp.bfloat16)


# --------------------------------- kernel ------------------------------------

def fused_conv_block_kernel(x_ref, w1_ref, s1_ref, b1_ref,
                            w2_ref, s2_ref, b2_ref, o_ref,
                            *, H, W, Cin, Cout):
    HW = H * W

    # conv1 (3x3, stride 1, 'same') + folded BN + ReLU — single K=9*Cin MXU matmul.
    p1 = _im2col_3x3(_pad_hw(x_ref[0]), H, W)                        # (HW, 9*Cin) bf16
    y1 = jnp.dot(p1, w1_ref[...], preferred_element_type=jnp.float32)
    y1 = jnp.maximum(y1 * s1_ref[...] + b1_ref[...], 0.0)           # (HW, Cout) f32

    # conv2 on y1, kept entirely on-chip (no HBM round trip for the intermediate).
    p2 = _im2col_3x3(_pad_hw(y1.reshape(H, W, Cout)), H, W)         # (HW, 9*Cout) bf16
    y2 = jnp.dot(p2, w2_ref[...], preferred_element_type=jnp.float32)
    y2 = jnp.maximum(y2 * s2_ref[...] + b2_ref[...], 0.0)

    # Residual add, then lane-dense store: (Cout, HW) puts HW=256 on the lane axis
    # (unmasked vst) and is already channels-major for the NCHW result.
    o_ref[...] = (y2 + y1).T.reshape(1, Cout, HW).astype(o_ref.dtype)


# --------------------------------- wrapper -----------------------------------

def init_conv_block_params(key, ch_in, ch_out):
    """Deterministic parameter init mirroring the module's shapes."""
    k1, k2, k3, k4 = jax.random.split(key, 4)
    params = {}
    params["w1"] = jax.random.normal(k1, (3, 3, ch_in, ch_out), jnp.float32) * 0.1
    params["b1"] = jax.random.normal(k2, (ch_out,), jnp.float32) * 0.1
    params["w2"] = jax.random.normal(k3, (3, 3, ch_out, ch_out), jnp.float32) * 0.1
    params["b2"] = jax.random.normal(k4, (ch_out,), jnp.float32) * 0.1
    # BatchNorm2d defaults (eval mode): gamma=1, beta=0, mean=0, var=1
    for i in (1, 2):
        params[f"gamma{i}"] = jnp.ones((ch_out,), jnp.float32)
        params[f"beta{i}"] = jnp.zeros((ch_out,), jnp.float32)
        params[f"mean{i}"] = jnp.zeros((ch_out,), jnp.float32)
        params[f"var{i}"] = jnp.ones((ch_out,), jnp.float32)
    return params


def _fold_bn(bias, gamma, beta, mean, var):
    scale = gamma / jnp.sqrt(var + EPS)
    shift = (bias - mean) * scale + beta
    return scale.reshape(1, -1), shift.reshape(1, -1)


def conv_block_forward(params, x_nchw):
    """Equivalent of conv_block.forward: x -> conv1 -> (save) -> conv2 -> add."""
    N, Cin, H, W = x_nchw.shape
    Cout = params["w1"].shape[-1]

    # One small input transpose NCHW->NHWC (channels -> lane axis for the im2col matmul).
    # TODO(synk): keep activations NHWC end-to-end in a full model to drop this too.
    x = jnp.transpose(x_nchw, (0, 2, 3, 1))

    s1, b1 = _fold_bn(params["b1"], params["gamma1"], params["beta1"],
                      params["mean1"], params["var1"])
    s2, b2 = _fold_bn(params["b2"], params["gamma2"], params["beta2"],
                      params["mean2"], params["var2"])

    # Weights pre-reshaped to (9*C, Cout) im2col form and cast to bf16 (halves HBM bytes,
    # native MXU dtype on v5e/v6e/v7x). Accumulation stays f32 inside the kernel.
    w1m = params["w1"].reshape(9 * Cin, Cout).astype(jnp.bfloat16)
    w2m = params["w2"].reshape(9 * Cout, Cout).astype(jnp.bfloat16)

    out = pl.pallas_call(
        functools.partial(fused_conv_block_kernel, H=H, W=W, Cin=Cin, Cout=Cout),
        out_shape=jax.ShapeDtypeStruct((N, Cout, H * W), x_nchw.dtype),
        grid=(N,),
        in_specs=[
            pl.BlockSpec((1, H, W, Cin), lambda n: (n, 0, 0, 0)),
            pl.BlockSpec((9 * Cin, Cout), lambda n: (0, 0)),
            pl.BlockSpec((1, Cout), lambda n: (0, 0)),
            pl.BlockSpec((1, Cout), lambda n: (0, 0)),
            pl.BlockSpec((9 * Cout, Cout), lambda n: (0, 0)),
            pl.BlockSpec((1, Cout), lambda n: (0, 0)),
            pl.BlockSpec((1, Cout), lambda n: (0, 0)),
        ],
        out_specs=pl.BlockSpec((1, Cout, H * W), lambda n: (n, 0, 0)),
        compiler_params=pltpu.CompilerParams(
            dimension_semantics=("parallel",),
            vmem_limit_bytes=32 * 1024 * 1024,   # explicit limit; safe on v7x's 64 MiB VMEM
        ),
    )(x, w1m, s1, b1, w2m, s2, b2)

    # Output is already channels-major: this reshape is layout-free (no transpose).
    return out.reshape(N, Cout, H, W)


# ------------------------------- reference -----------------------------------

def _reference_forward(params, x_nchw):
    """Pure-JAX reference (lax.conv) with the same bf16-operand / f32-accumulate precision."""
    def conv_bn_relu(x, w, b, g, bt, m, v):
        w_oihw = jnp.transpose(w, (3, 2, 0, 1)).astype(jnp.bfloat16)
        y = jax.lax.conv_general_dilated(
            x.astype(jnp.bfloat16), w_oihw, window_strides=(1, 1),
            padding=((1, 1), (1, 1)),
            dimension_numbers=("NCHW", "OIHW", "NCHW"),
            preferred_element_type=jnp.float32)
        y = y + b[None, :, None, None]
        y = (y - m[None, :, None, None]) / jnp.sqrt(v[None, :, None, None] + EPS)
        y = y * g[None, :, None, None] + bt[None, :, None, None]
        return jnp.maximum(y, 0.0)

    y1 = conv_bn_relu(x_nchw, params["w1"], params["b1"], params["gamma1"],
                      params["beta1"], params["mean1"], params["var1"])
    y2 = conv_bn_relu(y1, params["w2"], params["b2"], params["gamma2"],
                      params["beta2"], params["mean2"], params["var2"])
    return y2 + y1


if __name__ == "__main__":
    key = jax.random.PRNGKey(0)
    k_x, k_p = jax.random.split(key)

    N, ch_in, H, W = 2, 4, 16, 16
    ch_out = 8

    x = jax.random.normal(k_x, (N, ch_in, H, W), jnp.float32)
    params = init_conv_block_params(k_p, ch_in, ch_out)

    out = conv_block_forward(params, x)
    out = jax.block_until_ready(out)

    ref = jax.block_until_ready(_reference_forward(params, x))
    assert out.shape == (N, ch_out, H, W)
    # bf16 MXU operands in both paths; differences are only f32 accumulation order + one
    # possible bf16-ulp flip on the intermediate, hence the slightly loose tolerance.
    np.testing.assert_allclose(np.asarray(out), np.asarray(ref), atol=5e-3, rtol=5e-3)

    print("KERNEL_OK")
</pallas_src>

<mosaic_0001>
module attributes {stable_mosaic.version = 11 : i64} {
  func.func @fused_conv_block_kernel(%arg0: i32, %arg1: memref<1x16x16x4xf32, #tpu.memory_space<vmem>>, %arg2: memref<36x8xbf16, #tpu.memory_space<vmem>>, %arg3: memref<1x8xf32, #tpu.memory_space<vmem>>, %arg4: memref<1x8xf32, #tpu.memory_space<vmem>>, %arg5: memref<72x8xbf16, #tpu.memory_space<vmem>>, %arg6: memref<1x8xf32, #tpu.memory_space<vmem>>, %arg7: memref<1x8xf32, #tpu.memory_space<vmem>>, %arg8: memref<1x8x256xf32, #tpu.memory_space<vmem>>) attributes {dimension_semantics = [#tpu.dimension_semantics<parallel>], iteration_bounds = array<i64: 2>, scalar_prefetch = 0 : i64, scratch_operands = 0 : i64, tpu.core_type = #tpu.core_type<tc>, window_params = [{transform_indices = @transform_0, window_bounds = array<i64: 1, 16, 16, 4>}, {pipeline_mode = #tpu.pipeline_mode<synchronous>, transform_indices = @transform_1, window_bounds = array<i64: 36, 8>}, {pipeline_mode = #tpu.pipeline_mode<synchronous>, transform_indices = @transform_2, window_bounds = array<i64: 1, 8>}, {pipeline_mode = #tpu.pipeline_mode<synchronous>, transform_indices = @transform_3, window_bounds = array<i64: 1, 8>}, {pipeline_mode = #tpu.pipeline_mode<synchronous>, transform_indices = @transform_4, window_bounds = array<i64: 72, 8>}, {pipeline_mode = #tpu.pipeline_mode<synchronous>, transform_indices = @transform_5, window_bounds = array<i64: 1, 8>}, {pipeline_mode = #tpu.pipeline_mode<synchronous>, transform_indices = @transform_6, window_bounds = array<i64: 1, 8>}, {transform_indices = @transform_7, window_bounds = array<i64: 1, 8, 256>}]} {
    %c0 = arith.constant 0 : index
    %c0_0 = arith.constant 0 : index
    %c0_1 = arith.constant 0 : index
    %c0_2 = arith.constant 0 : index
    %0 = vector.load %arg1[%c0, %c0_0, %c0_1, %c0_2] : memref<1x16x16x4xf32, #tpu.memory_space<vmem>>, vector<1x16x16x4xf32>
    %1 = vector.shape_cast %0 : vector<1x16x16x4xf32> to vector<16x16x4xf32>
    %cst = arith.constant 0.000000e+00 : f32
    %2 = vector.broadcast %cst : f32 to vector<1x16x4xf32>
    %3 = tpu.concatenate %2, %1, %2 in 0 : vector<1x16x4xf32>, vector<16x16x4xf32>, vector<1x16x4xf32> -> vector<18x16x4xf32>
    %cst_3 = arith.constant 0.000000e+00 : f32
    %4 = vector.broadcast %cst_3 : f32 to vector<18x1x4xf32>
    %5 = tpu.concatenate %4, %3, %4 in 1 : vector<18x1x4xf32>, vector<18x16x4xf32>, vector<18x1x4xf32> -> vector<18x18x4xf32>
    %6 = vector.extract_strided_slice %5 {offsets = [0, 0, 0], sizes = [16, 16, 4], strides = [1, 1, 1]} : vector<18x18x4xf32> to vector<16x16x4xf32>
    %7 = vector.shape_cast %6 : vector<16x16x4xf32> to vector<256x4xf32>
    %8 = vector.extract_strided_slice %5 {offsets = [0, 1, 0], sizes = [16, 16, 4], strides = [1, 1, 1]} : vector<18x18x4xf32> to vector<16x16x4xf32>
    %9 = vector.shape_cast %8 : vector<16x16x4xf32> to vector<256x4xf32>
    %10 = vector.extract_strided_slice %5 {offsets = [0, 2, 0], sizes = [16, 16, 4], strides = [1, 1, 1]} : vector<18x18x4xf32> to vector<16x16x4xf32>
    %11 = vector.shape_cast %10 : vector<16x16x4xf32> to vector<256x4xf32>
    %12 = vector.extract_strided_slice %5 {offsets = [1, 0, 0], sizes = [16, 16, 4], strides = [1, 1, 1]} : vector<18x18x4xf32> to vector<16x16x4xf32>
    %13 = vector.shape_cast %12 : vector<16x16x4xf32> to vector<256x4xf32>
    %14 = vector.extract_strided_slice %5 {offsets = [1, 1, 0], sizes = [16, 16, 4], strides = [1, 1, 1]} : vector<18x18x4xf32> to vector<16x16x4xf32>
    %15 = vector.shape_cast %14 : vector<16x16x4xf32> to vector<256x4xf32>
    %16 = vector.extract_strided_slice %5 {offsets = [1, 2, 0], sizes = [16, 16, 4], strides = [1, 1, 1]} : vector<18x18x4xf32> to vector<16x16x4xf32>
    %17 = vector.shape_cast %16 : vector<16x16x4xf32> to vector<256x4xf32>
    %18 = vector.extract_strided_slice %5 {offsets = [2, 0, 0], sizes = [16, 16, 4], strides = [1, 1, 1]} : vector<18x18x4xf32> to vector<16x16x4xf32>
    %19 = vector.shape_cast %18 : vector<16x16x4xf32> to vector<256x4xf32>
    %20 = vector.extract_strided_slice %5 {offsets = [2, 1, 0], sizes = [16, 16, 4], strides = [1, 1, 1]} : vector<18x18x4xf32> to vector<16x16x4xf32>
    %21 = vector.shape_cast %20 : vector<16x16x4xf32> to vector<256x4xf32>
    %22 = vector.extract_strided_slice %5 {offsets = [2, 2, 0], sizes = [16, 16, 4], strides = [1, 1, 1]} : vector<18x18x4xf32> to vector<16x16x4xf32>
    %23 = vector.shape_cast %22 : vector<16x16x4xf32> to vector<256x4xf32>
    %24 = tpu.concatenate %7, %9, %11, %13, %15, %17, %19, %21, %23 in 1 : vector<256x4xf32>, vector<256x4xf32>, vector<256x4xf32>, vector<256x4xf32>, vector<256x4xf32>, vector<256x4xf32>, vector<256x4xf32>, vector<256x4xf32>, vector<256x4xf32> -> vector<256x36xf32>
    %25 = arith.truncf %24 : vector<256x36xf32> to vector<256x36xbf16>
    %c0_4 = arith.constant 0 : index
    %c0_5 = arith.constant 0 : index
    %26 = vector.load %arg2[%c0_4, %c0_5] : memref<36x8xbf16, #tpu.memory_space<vmem>>, vector<36x8xbf16>
    %cst_6 = arith.constant dense<0.000000e+00> : vector<256x8xf32>
    %27 = tpu.matmul %25, %26, %cst_6 {dimension_numbers = #tpu.dot_dimension_numbers<[1], [0], [0], [1], [0, 0, 1, 1], [], []>} : vector<256x36xbf16>, vector<36x8xbf16>, vector<256x8xf32> -> vector<256x8xf32>
    %c0_7 = arith.constant 0 : index
    %c0_8 = arith.constant 0 : index
    %28 = vector.load %arg3[%c0_7, %c0_8] : memref<1x8xf32, #tpu.memory_space<vmem>>, vector<1x8xf32>
    %29 = vector.broadcast %28 : vector<1x8xf32> to vector<256x8xf32>
    %30 = arith.mulf %27, %29 : vector<256x8xf32>
    %c0_9 = arith.constant 0 : index
    %c0_10 = arith.constant 0 : index
    %31 = vector.load %arg4[%c0_9, %c0_10] : memref<1x8xf32, #tpu.memory_space<vmem>>, vector<1x8xf32>
    %32 = vector.broadcast %31 : vector<1x8xf32> to vector<256x8xf32>
    %33 = arith.addf %30, %32 : vector<256x8xf32>
    %cst_11 = arith.constant 0.000000e+00 : f32
    %34 = vector.broadcast %cst_11 : f32 to vector<256x8xf32>
    %35 = arith.maximumf %33, %34 : vector<256x8xf32>
    %36 = vector.shape_cast %35 : vector<256x8xf32> to vector<16x16x8xf32>
    %cst_12 = arith.constant 0.000000e+00 : f32
    %37 = vector.broadcast %cst_12 : f32 to vector<1x16x8xf32>
    %38 = tpu.concatenate %37, %36, %37 in 0 : vector<1x16x8xf32>, vector<16x16x8xf32>, vector<1x16x8xf32> -> vector<18x16x8xf32>
    %cst_13 = arith.constant 0.000000e+00 : f32
    %39 = vector.broadcast %cst_13 : f32 to vector<18x1x8xf32>
    %40 = tpu.concatenate %39, %38, %39 in 1 : vector<18x1x8xf32>, vector<18x16x8xf32>, vector<18x1x8xf32> -> vector<18x18x8xf32>
    %41 = vector.extract_strided_slice %40 {offsets = [0, 0, 0], sizes = [16, 16, 8], strides = [1, 1, 1]} : vector<18x18x8xf32> to vector<16x16x8xf32>
    %42 = vector.shape_cast %41 : vector<16x16x8xf32> to vector<256x8xf32>
    %43 = vector.extract_strided_slice %40 {offsets = [0, 1, 0], sizes = [16, 16, 8], strides = [1, 1, 1]} : vector<18x18x8xf32> to vector<16x16x8xf32>
    %44 = vector.shape_cast %43 : vector<16x16x8xf32> to vector<256x8xf32>
    %45 = vector.extract_strided_slice %40 {offsets = [0, 2, 0], sizes = [16, 16, 8], strides = [1, 1, 1]} : vector<18x18x8xf32> to vector<16x16x8xf32>
    %46 = vector.shape_cast %45 : vector<16x16x8xf32> to vector<256x8xf32>
    %47 = vector.extract_strided_slice %40 {offsets = [1, 0, 0], sizes = [16, 16, 8], strides = [1, 1, 1]} : vector<18x18x8xf32> to vector<16x16x8xf32>
    %48 = vector.shape_cast %47 : vector<16x16x8xf32> to vector<256x8xf32>
    %49 = vector.extract_strided_slice %40 {offsets = [1, 1, 0], sizes = [16, 16, 8], strides = [1, 1, 1]} : vector<18x18x8xf32> to vector<16x16x8xf32>
    %50 = vector.shape_cast %49 : vector<16x16x8xf32> to vector<256x8xf32>
    %51 = vector.extract_strided_slice %40 {offsets = [1, 2, 0], sizes = [16, 16, 8], strides = [1, 1, 1]} : vector<18x18x8xf32> to vector<16x16x8xf32>
    %52 = vector.shape_cast %51 : vector<16x16x8xf32> to vector<256x8xf32>
    %53 = vector.extract_strided_slice %40 {offsets = [2, 0, 0], sizes = [16, 16, 8], strides = [1, 1, 1]} : vector<18x18x8xf32> to vector<16x16x8xf32>
    %54 = vector.shape_cast %53 : vector<16x16x8xf32> to vector<256x8xf32>
    %55 = vector.extract_strided_slice %40 {offsets = [2, 1, 0], sizes = [16, 16, 8], strides = [1, 1, 1]} : vector<18x18x8xf32> to vector<16x16x8xf32>
    %56 = vector.shape_cast %55 : vector<16x16x8xf32> to vector<256x8xf32>
    %57 = vector.extract_strided_slice %40 {offsets = [2, 2, 0], sizes = [16, 16, 8], strides = [1, 1, 1]} : vector<18x18x8xf32> to vector<16x16x8xf32>
    %58 = vector.shape_cast %57 : vector<16x16x8xf32> to vector<256x8xf32>
    %59 = tpu.concatenate %42, %44, %46, %48, %50, %52, %54, %56, %58 in 1 : vector<256x8xf32>, vector<256x8xf32>, vector<256x8xf32>, vector<256x8xf32>, vector<256x8xf32>, vector<256x8xf32>, vector<256x8xf32>, vector<256x8xf32>, vector<256x8xf32> -> vector<256x72xf32>
    %60 = arith.truncf %59 : vector<256x72xf32> to vector<256x72xbf16>
    %c0_14 = arith.constant 0 : index
    %c0_15 = arith.constant 0 : index
    %61 = vector.load %arg5[%c0_14, %c0_15] : memref<72x8xbf16, #tpu.memory_space<vmem>>, vector<72x8xbf16>
    %cst_16 = arith.constant dense<0.000000e+00> : vector<256x8xf32>
    %62 = tpu.matmul %60, %61, %cst_16 {dimension_numbers = #tpu.dot_dimension_numbers<[1], [0], [0], [1], [0, 0, 1, 1], [], []>} : vector<256x72xbf16>, vector<72x8xbf16>, vector<256x8xf32> -> vector<256x8xf32>
    %c0_17 = arith.constant 0 : index
    %c0_18 = arith.constant 0 : index
    %63 = vector.load %arg6[%c0_17, %c0_18] : memref<1x8xf32, #tpu.memory_space<vmem>>, vector<1x8xf32>
    %64 = vector.broadcast %63 : vector<1x8xf32> to vector<256x8xf32>
    %65 = arith.mulf %62, %64 : vector<256x8xf32>
    %c0_19 = arith.constant 0 : index
    %c0_20 = arith.constant 0 : index
    %66 = vector.load %arg7[%c0_19, %c0_20] : memref<1x8xf32, #tpu.memory_space<vmem>>, vector<1x8xf32>
    %67 = vector.broadcast %66 : vector<1x8xf32> to vector<256x8xf32>
    %68 = arith.addf %65, %67 : vector<256x8xf32>
    %cst_21 = arith.constant 0.000000e+00 : f32
    %69 = vector.broadcast %cst_21 : f32 to vector<256x8xf32>
    %70 = arith.maximumf %68, %69 : vector<256x8xf32>
    %71 = arith.addf %70, %35 : vector<256x8xf32>
    %72 = tpu.transpose %71, [1, 0] : vector<256x8xf32> -> vector<8x256xf32>
    %73 = vector.shape_cast %72 : vector<8x256xf32> to vector<1x8x256xf32>
    %c0_22 = arith.constant 0 : index
    %c0_23 = arith.constant 0 : index
    %c0_24 = arith.constant 0 : index
    %74 = vector.load %arg8[%c0_22, %c0_23, %c0_24] : memref<1x8x256xf32, #tpu.memory_space<vmem>>, vector<1x8x256xf32>
    tpu.vector_store %arg8[%c0_22, %c0_23, %c0_24], %73 {strides = array<i32>} : memref<1x8x256xf32, #tpu.memory_space<vmem>>, vector<1x8x256xf32>,
    return
  }
  func.func @transform_0(%arg0: i32) -> (i32, i32, i32, i32) {
    %c0_i32 = arith.constant 0 : i32
    %c0_i32_0 = arith.constant 0 : i32
    %c0_i32_1 = arith.constant 0 : i32
    %c0_i32_2 = arith.constant 0 : i32
    return %arg0, %c0_i32, %c0_i32_0, %c0_i32_1 : i32, i32, i32, i32
  }
  func.func @transform_1(%arg0: i32) -> (i32, i32) {
    %c0_i32 = arith.constant 0 : i32
    %c0_i32_0 = arith.constant 0 : i32
    %c0_i32_1 = arith.constant 0 : i32
    return %c0_i32, %c0_i32_0 : i32, i32
  }
  func.func @transform_2(%arg0: i32) -> (i32, i32) {
    %c0_i32 = arith.constant 0 : i32
    %c0_i32_0 = arith.constant 0 : i32
    %c0_i32_1 = arith.constant 0 : i32
    return %c0_i32, %c0_i32_0 : i32, i32
  }
  func.func @transform_3(%arg0: i32) -> (i32, i32) {
    %c0_i32 = arith.constant 0 : i32
    %c0_i32_0 = arith.constant 0 : i32
    %c0_i32_1 = arith.constant 0 : i32
    return %c0_i32, %c0_i32_0 : i32, i32
  }
  func.func @transform_4(%arg0: i32) -> (i32, i32) {
    %c0_i32 = arith.constant 0 : i32
    %c0_i32_0 = arith.constant 0 : i32
    %c0_i32_1 = arith.constant 0 : i32
    return %c0_i32, %c0_i32_0 : i32, i32
  }
  func.func @transform_5(%arg0: i32) -> (i32, i32) {
    %c0_i32 = arith.constant 0 : i32
    %c0_i32_0 = arith.constant 0 : i32
    %c0_i32_1 = arith.constant 0 : i32
    return %c0_i32, %c0_i32_0 : i32, i32
  }
  func.func @transform_6(%arg0: i32) -> (i32, i32) {
    %c0_i32 = arith.constant 0 : i32
    %c0_i32_0 = arith.constant 0 : i32
    %c0_i32_1 = arith.constant 0 : i32
    return %c0_i32, %c0_i32_0 : i32, i32
  }
  func.func @transform_7(%arg0: i32) -> (i32, i32, i32) {
    %c0_i32 = arith.constant 0 : i32
    %c0_i32_0 = arith.constant 0 : i32
    %c0_i32_1 = arith.constant 0 : i32
    return %arg0, %c0_i32, %c0_i32_0 : i32, i32, i32
  }
}

</mosaic_0001>

<bundles_post_ra>
// kernel: tpu_custom_call.1
= control target key start
LH: loop header
LB: loop body
LE: loop exit
PB: predicated region body
PF: predicated region fallthrough
CT: control target
= control target key end

     0   :  { %12 = vsyncpa [#allocation3], 0  ;;  %s9264_s0 = inlined_call_operand.vmem [shape: f32[2,16,16,4], index: 0, kind: input, shape index: {}]   ;;  %s9265_s1 = inlined_call_operand.vmem [shape: bf16[36,8], index: 1, kind: input, shape index: {}]   ;;  %s9266_s2 = inlined_call_operand.vmem [shape: f32[1,8], index: 2, kind: input, shape index: {}]   ;;  %s9267_s3 = inlined_call_operand.vmem [shape: f32[1,8], index: 3, kind: input, shape index: {}]   ;;  %s9268_s4 = inlined_call_operand.vmem [shape: bf16[72,8], index: 4, kind: input, shape index: {}]   ;;  %s9269_s5 = inlined_call_operand.vmem [shape: f32[1,8], index: 5, kind: input, shape index: {}]   ;;  %s9270_s6 = inlined_call_operand.vmem [shape: f32[1,8], index: 6, kind: input, shape index: {}]   ;;  %s9271_s7 = inlined_call_operand.hbm [shape: f32[2,8,256], index: 7, kind: output, shape index: {}]  }
   0x1   :  { %14 = vsyncpa [#allocation3 + $0x1], 0  ;;  %s5640_s24 = smov 0   ;;  %s5642_s25 = smov 0  }
   0x2   :  { %s5644_s26 = smov 0   ;;  %s5646_s27 = smov 0  }
   0x3 LB: > { %s5661_s28 = sadd.s32 4294967295, %s5584_s27   ;;  %s4002_s29 = sadd.s32 4294967294, %s5584_s27   ;;  %s5584_s27 = sphi %s5646_s27, %s9894_s27   ;;  %s5580_s26 = sphi %s5644_s26, %s9893_s26   ;;  %s5576_s25 = sphi %s5642_s25, %s9892_s25   ;;  %s5572_s24 = sphi %s5640_s24, %s9891_s24  }
   0x4   : > { %s5665_s30 = sadd.s32 1, %s5584_s27   ;;  %s179_s8 = sadd.s32 1, %s5580_s26 }
   0x5   : > { %s176_s9 = ssub.s32 %s5584_s27, %s5665_s30  ;;  %p189_p0 = scmp.ne.s32.totalorder %s5580_s26, %s5576_s25 }
   0x6   : > { %p177_p1 = scmp.eq.s32.totalorder %s176_s9, 0  ;;  %p190_p2 = scmp.eq.s32.totalorder %s5661_s28, 1 }
   0x7   : > { %p195_p3 = scmp.ne.s32.totalorder %s5576_s25, %s5572_s24  ;;  %p196_p4 = scmp.eq.s32.totalorder %s4002_s29, 1 }
   0x8   : > { %s5676_s10 = scalar_select %p177_p1, %s5580_s26, %s179_s8  }
   0x9   : > { %p5678_p5 = por %p190_p2, %p189_p0  ;;  %p5682_p6 = por %p196_p4, %p195_p3 }
   0xa   : > { %p4005_p7 = scmp.ge.s32.totalorder %s5584_s27, 1  ;;  %p240_p8 = scmp.lt.s32.totalorder %s5584_s27, 3 }
   0xc   : > { %p241_p9 = pnand %p4005_p7, %p240_p8 }
   0xe   : > { %244 = sbr.rel (%p241_p9) target bundleno = 1292 (0x50c), region = 48 }
  0x15   : > { %vm343_vm0 = vcmask 1040384   ;;  %p272_p10 = scmp.lt.s32.totalorder %s5661_s28, 1  ;;  %v5586_v0 = vmov 0.0   ;;  %vm509_vm1 = vcmask 1046528   ;;  %vm590_vm2 = vcmask 1045504   ;;  %s5587_s18 = smov 4  }
  0x16   : > { %v5689_v1 = vrot.slane %v5586_v0, 7  ;;  %s5588_s19 = smov 8   ;;  %s5589_s20 = smov 12   ;;  %vm1800_vm3 = vcmask 1041408   ;;  %vm1451_vm4 = vcmask 31744   ;;  %vm1484_vm5 = vcmask 64512  }
  0x17   : > { %s273_s13 = scalar_select %p272_p10, %s5661_s28, 1  ;;  %vm1517_vm6 = vcmask 97280   ;;  %vm1550_vm7 = vcmask 130048   ;;  %vm1583_vm8 = vcmask 162816   ;;  %vm1616_vm9 = vcmask 195584  }
  0x18   : > { %9478 = vst [vmem:[#allocation5_spill] sm:$0xff] %v5689_v1  ;;  %v5694_v2 = vsel %vm343_vm0, 0.0, %v5689_v1  ;;  %v460_v3 = vsel %vm343_vm0, %v5689_v1, 0.0  ;;  %v511_v4 = vrot.slane %v5689_v1, 1  ;;  %v592_v5 = vrot.slane %v5689_v1, 2  ;;  %s5590_s21 = smov 16  }
  0x19   : > { %9479 = vst [vmem:[#allocation6_spill] sm:$0xff] %v5694_v2  ;;  %v510_v6 = vrot.slane %v5694_v2, 1  ;;  %v513_v7 = vrot.slane %v460_v3, 1  ;;  %v594_v8 = vrot.slane %v460_v3, 2  ;;  %s4058_s14 = sshll.u32 %s273_s13, 8  ;;  %v591_v9 = vrot.slane %v5694_v2, 2 }
  0x1a   : > { %s5705_s17 = scalar_lea.vmem %s9264_s0, %s4058_s14  ;;  %s5591_s22 = smov 20   ;;  %vm1649_vm10 = vcmask 228352   ;;  %vm1682_vm11 = vcmask 261120   ;;  %vm1751_vm12 = vcmask 293888   ;;  %vm3555_vm13 = vcmask 1043456  }
  0x1b   : > { %v512_v10 = vsel %vm509_vm1, %v510_v6, %v511_v4  ;;  %v514_v11 = vsel %vm509_vm1, %v511_v4, %v513_v7  ;;  %v280_v12 = vld [vmem:[%s5705_s17 + $0x10] sm:$0xff]  ;;  %v281_v13 = vld [vmem:[%s5705_s17 + $0x18] sm:$0xff]  ;;  %v278_v14 = vld [vmem:[%s5705_s17] sm:$0xff]  ;;  %v5713_v15 = vsel %vm590_vm2, %v591_v9, %v592_v5  ;;  %v5721_v26 = vsel %vm590_vm2, %v592_v5, %v594_v8  ;;  %s5592_s23 = smov 24   ;;  %s5593_s29 = smov 28  }
  0x1c   : > { %v5715_v16 = vpack.i.bf16 %v514_v11, %v512_v10  ;;  %v349_v17 = vrot.slane %v280_v12, 7  ;;  %v350_v18 = vrot.slane %v281_v13, 7  ;;  %v279_v19 = vld [vmem:[%s5705_s17 + $0x8] sm:$0xff]  ;;  %v346_v20 = vrot.slane %v278_v14, 7  ;;  %v282_v21 = vld [vmem:[%s5705_s17 + $0x20] sm:$0xff]  ;;  %v284_v43 = vld [vmem:[%s5705_s17 + $0x30] sm:$0xff] }
  0x1d   : > { %v283_v22 = vld [vmem:[%s5705_s17 + $0x28] sm:$0xff]  ;;  %v347_v23 = vrot.slane %v279_v19, 7  ;;  %v352_v24 = vrot.slane %v282_v21, 7  ;;  %v285_v44 = vld [vmem:[%s5705_s17 + $0x38] sm:$0xff]  ;;  %v286_v45 = vld [vmem:[%s5705_s17 + $0x40] sm:$0xff]  ;;  %v355_v57 = vrot.slane %v284_v43, 7 }
  0x1e   : > { %9480 = vst [vmem:[#allocation7_spill] sm:$0xff] %v5715_v16  ;;  %v353_v25 = vrot.slane %v283_v22, 7  ;;  %4235 = vrot.lane.b32.xlu0 %v5715_v16, %s5587_s18  ;;  %v5726_v27 = vsel %vm343_vm0, %v349_v17, %v350_v18  ;;  %v5729_v28 = vsel %vm343_vm0, 0.0, %v349_v17  ;;  %v5732_v29 = vsel %vm343_vm0, %v350_v18, 0.0  ;;  %v287_v50 = vld [vmem:[%s5705_s17 + $0x48] sm:$0xff]  ;;  %v288_v51 = vld [vmem:[%s5705_s17 + $0x50] sm:$0xff] }
  0x1f   : > { %v5735_v30 = vsel %vm343_vm0, 0.0, %v346_v20  ;;  %v520_v31 = vrot.slane %v5729_v28, 1  ;;  %v521_v32 = vrot.slane %v5726_v27, 1  ;;  %v523_v33 = vrot.slane %v5732_v29, 1  ;;  %v289_v63 = vld [vmem:[%s5705_s17 + $0x58] sm:$0xff]  ;;  %v290_v11 = vld [vmem:[%s5705_s17 + $0x60] sm:$0xff] }
  0x20   : > { %v5742_v35 = vsel %vm343_vm0, %v346_v20, %v347_v23  ;;  %v5745_v36 = vsel %vm343_vm0, %v347_v23, 0.0  ;;  %v515_v37 = vrot.slane %v5735_v30, 1  ;;  %v5749_v38 = vsel %vm343_vm0, %v352_v24, %v353_v25  ;;  %v291_v12 = vld [vmem:[%s5705_s17 + $0x68] sm:$0xff]  ;;  %v292_v19 = vld [vmem:[%s5705_s17 + $0x70] sm:$0xff]  ;;  %s5595_s8 = smov 48   ;;  %s5596_s9 = smov 40  }
  0x21   : > { %v522_v39 = vsel %vm509_vm1, %v520_v31, %v521_v32  ;;  %v524_v40 = vsel %vm509_vm1, %v521_v32, %v523_v33  ;;  %v516_v41 = vrot.slane %v5742_v35, 1  ;;  %v518_v42 = vrot.slane %v5745_v36, 1  ;;  %v293_v33 = vld [vmem:[%s5705_s17 + $0x78] sm:$0xff]  ;;  %s5597_s13 = smov 56   ;;  %s5598_s14 = smov 64  }
  0x22   : > { %v5758_v46 = vpack.i.bf16 %v524_v40, %v522_v39  ;;  %v5761_v47 = vsel %vm343_vm0, 0.0, %v352_v24  ;;  %v5764_v48 = vsel %vm343_vm0, %v353_v25, 0.0  ;;  %v526_v49 = vrot.slane %v5749_v38, 1 }
  0x23   : > { %v517_v52 = vsel %vm509_vm1, %v515_v37, %v516_v41  ;;  %v519_v53 = vsel %vm509_vm1, %v516_v41, %v518_v42  ;;  %v525_v54 = vrot.slane %v5761_v47, 1  ;;  %v528_v55 = vrot.slane %v5764_v48, 1  ;;  %v294_v37 = vld [vmem:[%s5705_s17 + $0x80] sm:$0xff] }
  0x24   : > { %9481 = vst [vmem:[#allocation8_spill] sm:$0xff] %v5758_v46  ;;  %4245 = vrot.lane.b32.xlu1 %v5758_v46, %s5587_s18  ;;  %v5775_v56 = vpack.i.bf16 %v519_v53, %v517_v52  ;;  %v356_v58 = vrot.slane %v285_v44, 7  ;;  %v358_v59 = vrot.slane %v286_v45, 7  ;;  %v359_v62 = vrot.slane %v287_v50, 7  ;;  %v295_v53 = vld [vmem:[%s5705_s17 + $0x88] sm:$0xff] }
  0x25   : > { %v527_v60 = vsel %vm509_vm1, %v525_v54, %v526_v49  ;;  %v529_v61 = vsel %vm509_vm1, %v526_v49, %v528_v55  ;;  %v361_v0 = vrot.slane %v288_v51, 7  ;;  %v5788_v5 = vsel %vm343_vm0, 0.0, %v355_v57 }
  0x26   : > { %4240 = vrot.lane.b32.xlu0 %v5775_v56, %s5587_s18  ;;  %v5782_v3 = vpack.i.bf16 %v529_v61, %v527_v60  ;;  %v5785_v4 = vsel %vm343_vm0, %v355_v57, %v356_v58  ;;  %9484 = vst [vmem:[#allocation11_spill] sm:$0xff] %v5788_v5  ;;  %v5791_v6 = vsel %vm343_vm0, %v356_v58, 0.0  ;;  %v530_v7 = vrot.slane %v5788_v5, 1 }
  0x27   : > { %9483 = vst [vmem:[#allocation10_spill] sm:$0xff] %v5785_v4  ;;  %v531_v8 = vrot.slane %v5785_v4, 1  ;;  %v533_v9 = vrot.slane %v5791_v6, 1  ;;  %v5797_v10 = vsel %vm343_vm0, %v358_v59, %v359_v62  ;;  %v5804_v13 = vsel %vm343_vm0, 0.0, %v358_v59 }
  0x28   : > { %9482 = vst [vmem:[#allocation9_spill] sm:$0xff] %v5782_v3  ;;  %9485 = vst [vmem:[#allocation12_spill] sm:$0xff] %v5797_v10  ;;  %4250 = vrot.lane.b32.xlu1 %v5782_v3, %s5587_s18  ;;  %v5807_v14 = vsel %vm343_vm0, %v359_v62, 0.0  ;;  %v536_v17 = vrot.slane %v5797_v10, 1  ;;  %v362_v18 = vrot.slane %v289_v63, 7  ;;  %v535_v22 = vrot.slane %v5804_v13, 1 }
  0x29   : > { %9486 = vst [vmem:[#allocation13_spill] sm:$0xff] %v5804_v13  ;;  %v532_v20 = vsel %vm509_vm1, %v530_v7, %v531_v8  ;;  %v534_v21 = vsel %vm509_vm1, %v531_v8, %v533_v9  ;;  %v538_v23 = vrot.slane %v5807_v14, 1  ;;  %v5821_v31 = vsel %vm343_vm0, 0.0, %v361_v0 }
  0x2a   : > { %v5815_v24 = vpack.i.bf16 %v534_v21, %v532_v20  ;;  %v5818_v25 = vsel %vm343_vm0, %v361_v0, %v362_v18  ;;  %9489 = vst [vmem:[#allocation16_spill] sm:$0xff] %v5821_v31  ;;  %v5824_v32 = vsel %vm343_vm0, %v362_v18, 0.0  ;;  %v537_v39 = vsel %vm509_vm1, %v535_v22, %v536_v17  ;;  %v297_v20 = vld [vmem:[%s5705_s17 + $0x98] sm:$0xff] }
  0x2b   : > { %9488 = vst [vmem:[#allocation15_spill] sm:$0xff] %v5818_v25  ;;  %v539_v40 = vsel %vm509_vm1, %v536_v17, %v538_v23  ;;  %v540_v41 = vrot.slane %v5821_v31, 1  ;;  %v541_v42 = vrot.slane %v5818_v25, 1  ;;  %v543_v44 = vrot.slane %v5824_v32, 1 }
  0x2c   : > { %9487 = vst [vmem:[#allocation14_spill] sm:$0xff] %v5815_v24  ;;  %4255 = vrot.lane.b32.xlu0 %v5815_v24, %s5587_s18  ;;  %v5834_v43 = vpack.i.bf16 %v539_v40, %v537_v39  ;;  %v364_v45 = vrot.slane %v290_v11, 7  ;;  %v365_v49 = vrot.slane %v291_v12, 7  ;;  %v367_v51 = vrot.slane %v292_v19, 7  ;;  %v296_v19 = vld [vmem:[%s5705_s17 + $0x90] sm:$0xff]  ;;  %v299_v39 = vld [vmem:[%s5705_s17 + $0xa8] sm:$0xff] }
  0x2d   : > { %v542_v50 = vsel %vm509_vm1, %v540_v41, %v541_v42  ;;  %v368_v52 = vrot.slane %v293_v33, 7  ;;  %v370_v54 = vrot.slane %v294_v37, 7  ;;  %v544_v55 = vsel %vm509_vm1, %v541_v42, %v543_v44  ;;  %v298_v37 = vld [vmem:[%s5705_s17 + $0xa0] sm:$0xff] }
  0x2e   : > { %9490 = vst [vmem:[#allocation17_spill] sm:$0xff] %v5834_v43  ;;  %4260 = vrot.lane.b32.xlu1 %v5834_v43, %s5587_s18  ;;  %v5843_v57 = vsel %vm343_vm0, %v364_v45, %v365_v49  ;;  %v5846_v58 = vsel %vm343_vm0, 0.0, %v364_v45  ;;  %v5849_v59 = vsel %vm343_vm0, %v365_v49, 0.0  ;;  %v5851_v60 = vpack.i.bf16 %v544_v55, %v542_v50 }
  0x2f   : > { %9491 = vst [vmem:[#allocation18_spill] sm:$0xff] %v5843_v57  ;;  %9492 = vst [vmem:[#allocation19_spill] sm:$0xff] %v5846_v58  ;;  %v545_v61 = vrot.slane %v5846_v58, 1  ;;  %v546_v62 = vrot.slane %v5843_v57, 1  ;;  %v548_v63 = vrot.slane %v5849_v59, 1  ;;  %v5857_v0 = vsel %vm343_vm0, %v367_v51, %v368_v52 }
  0x30   : > { %9493 = vst [vmem:[#allocation20_spill] sm:$0xff] %v5851_v60  ;;  %9494 = vst [vmem:[#allocation21_spill] sm:$0xff] %v5857_v0  ;;  %v5860_v7 = vsel %vm343_vm0, 0.0, %v367_v51  ;;  %v5863_v8 = vsel %vm343_vm0, %v368_v52, 0.0  ;;  %v371_v9 = vrot.slane %v295_v53, 7  ;;  %4265 = vrot.lane.b32.xlu0 %v5851_v60, %s5587_s18  ;;  %v551_v18 = vrot.slane %v5857_v0, 1 }
  0x31   : > { %9495 = vst [vmem:[#allocation22_spill] sm:$0xff] %v5860_v7  ;;  %v547_v11 = vsel %vm509_vm1, %v545_v61, %v546_v62  ;;  %v549_v12 = vsel %vm509_vm1, %v546_v62, %v548_v63  ;;  %v550_v17 = vrot.slane %v5860_v7, 1  ;;  %v553_v22 = vrot.slane %v5863_v8, 1  ;;  %v300_v61 = vld [vmem:[%s5705_s17 + $0xb0] sm:$0xff] }
  0x32   : > { %v5873_v21 = vpack.i.bf16 %v549_v12, %v547_v11  ;;  %v5877_v23 = vsel %vm343_vm0, %v370_v54, %v371_v9  ;;  %v5880_v33 = vsel %vm343_vm0, 0.0, %v370_v54  ;;  %v5886_v41 = vsel %vm343_vm0, %v371_v9, 0.0 }
  0x33   : > { %9497 = vst [vmem:[#allocation24_spill] sm:$0xff] %v5877_v23  ;;  %9498 = vst [vmem:[#allocation25_spill] sm:$0xff] %v5880_v33  ;;  %v552_v40 = vsel %vm509_vm1, %v550_v17, %v551_v18  ;;  %v555_v42 = vrot.slane %v5880_v33, 1  ;;  %v556_v44 = vrot.slane %v5877_v23, 1  ;;  %v554_v45 = vsel %vm509_vm1, %v551_v18, %v553_v22 }
  0x34   : > { %9496 = vst [vmem:[#allocation23_spill] sm:$0xff] %v5873_v21  ;;  %4270 = vrot.lane.b32.xlu1 %v5873_v21, %s5587_s18  ;;  %v558_v49 = vrot.slane %v5886_v41, 1  ;;  %v373_v50 = vrot.slane %v296_v19, 7  ;;  %v374_v51 = vrot.slane %v297_v20, 7  ;;  %v5894_v52 = vpack.i.bf16 %v554_v45, %v552_v40  ;;  %v301_v20 = vld [vmem:[%s5705_s17 + $0xb8] sm:$0xff] }
  0x35   : > { %v557_v53 = vsel %vm509_vm1, %v555_v42, %v556_v44  ;;  %v376_v54 = vrot.slane %v298_v37, 7  ;;  %v377_v55 = vrot.slane %v299_v39, 7  ;;  %v379_v40 = vrot.slane %v300_v61, 7  ;;  %v302_v42 = vld [vmem:[%s5705_s17 + $0xc0] sm:$0xff] }
  0x36   : > { %9499 = vst [vmem:[#allocation26_spill] sm:$0xff] %v5894_v52  ;;  %v559_v62 = vsel %vm509_vm1, %v556_v44, %v558_v49  ;;  %v5900_v63 = vsel %vm343_vm0, %v373_v50, %v374_v51  ;;  %v5903_v9 = vsel %vm343_vm0, 0.0, %v373_v50  ;;  %v5906_v11 = vsel %vm343_vm0, %v374_v51, 0.0  ;;  %4275 = vrot.lane.b32.xlu0 %v5894_v52, %s5587_s18  ;;  %v303_v44 = vld [vmem:[%s5705_s17 + $0xc8] sm:$0xff] }
  0x37   : > { %9500 = vst [vmem:[#allocation27_spill] sm:$0xff] %v5900_v63  ;;  %9501 = vst [vmem:[#allocation28_spill] sm:$0xff] %v5903_v9  ;;  %v5910_v12 = vpack.i.bf16 %v559_v62, %v557_v53  ;;  %v560_v17 = vrot.slane %v5903_v9, 1  ;;  %v561_v18 = vrot.slane %v5900_v63, 1  ;;  %v563_v19 = vrot.slane %v5906_v11, 1  ;;  %v304_v53 = vld [vmem:[%s5705_s17 + $0xd0] sm:$0xff] }
  0x38   : > { %v5917_v22 = vsel %vm343_vm0, %v376_v54, %v377_v55  ;;  %v5920_v37 = vsel %vm343_vm0, 0.0, %v376_v54  ;;  %v5923_v39 = vsel %vm343_vm0, %v377_v55, 0.0  ;;  %v380_v61 = vrot.slane %v301_v20, 7 }
  0x39   : > { %9502 = vst [vmem:[#allocation29_spill] sm:$0xff] %v5910_v12  ;;  %9503 = vst [vmem:[#allocation30_spill] sm:$0xff] %v5917_v22  ;;  %4280 = vrot.lane.b32.xlu1 %v5910_v12, %s5587_s18  ;;  %v562_v45 = vsel %vm509_vm1, %v560_v17, %v561_v18  ;;  %v564_v49 = vsel %vm509_vm1, %v561_v18, %v563_v19  ;;  %v565_v50 = vrot.slane %v5920_v37, 1  ;;  %v566_v51 = vrot.slane %v5917_v22, 1  ;;  %v305_v18 = vld [vmem:[%s5705_s17 + $0xd8] sm:$0xff]  ;;  %v306_v12 = vld [vmem:[%s5705_s17 + $0xe0] sm:$0xff] }
  0x3a   : > { %9504 = vst [vmem:[#allocation31_spill] sm:$0xff] %v5920_v37  ;;  %v5934_v54 = vpack.i.bf16 %v564_v49, %v562_v45  ;;  %v568_v55 = vrot.slane %v5923_v39, 1  ;;  %v5938_v62 = vsel %vm343_vm0, 0.0, %v379_v40  ;;  %v382_v17 = vrot.slane %v302_v42, 7 }
  0x3b   : > { %9506 = vst [vmem:[#allocation33_spill] sm:$0xff] %v5938_v62  ;;  %v567_v34 = vsel %vm509_vm1, %v565_v50, %v566_v51  ;;  %v570_v16 = vrot.slane %v5938_v62, 1  ;;  %v383_v1 = vrot.slane %v303_v44, 7  ;;  %v5947_v45 = vsel %vm343_vm0, %v379_v40, %v380_v61 }
  0x3c   : > { %9505 = vst [vmem:[#allocation32_spill] sm:$0xff] %v5934_v54  ;;  %4285 = vrot.lane.b32.xlu0 %v5934_v54, %s5587_s18  ;;  %v569_v19 = vsel %vm509_vm1, %v566_v51, %v568_v55  ;;  %9507 = vst [vmem:[#allocation34_spill] sm:$0xff] %v5947_v45  ;;  %v5950_v20 = vsel %vm343_vm0, %v380_v61, 0.0  ;;  %v385_v49 = vrot.slane %v304_v53, 7  ;;  %v571_v42 = vrot.slane %v5947_v45, 1 }
  0x3d   : > { %v5952_v50 = vpack.i.bf16 %v569_v19, %v567_v34  ;;  %v573_v44 = vrot.slane %v5950_v20, 1  ;;  %v5957_v2 = vsel %vm343_vm0, %v382_v17, %v383_v1  ;;  %v5960_v51 = vsel %vm343_vm0, 0.0, %v382_v17  ;;  %v307_v17 = vld [vmem:[%s5705_s17 + $0xe8] sm:$0xff] }
  0x3e   : > { %9509 = vst [vmem:[#allocation36_spill] sm:$0xff] %v5957_v2  ;;  %9510 = vst [vmem:[#allocation37_spill] sm:$0xff] %v5960_v51  ;;  %v5963_v40 = vsel %vm343_vm0, %v383_v1, 0.0  ;;  %v576_v55 = vrot.slane %v5957_v2, 1  ;;  %v386_v61 = vrot.slane %v305_v18, 7  ;;  %v572_v34 = vsel %vm509_vm1, %v570_v16, %v571_v42 }
  0x3f   : > { %9508 = vst [vmem:[#allocation35_spill] sm:$0xff] %v5952_v50  ;;  %4290 = vrot.lane.b32.xlu1 %v5952_v50, %s5587_s18  ;;  %v574_v53 = vsel %vm509_vm1, %v571_v42, %v573_v44  ;;  %v575_v19 = vrot.slane %v5960_v51, 1  ;;  %v578_v54 = vrot.slane %v5963_v40, 1  ;;  %v5980_v18 = vsel %vm343_vm0, 0.0, %v385_v49 }
  0x40   : > { %v5974_v52 = vpack.i.bf16 %v574_v53, %v572_v34  ;;  %v5977_v1 = vsel %vm343_vm0, %v385_v49, %v386_v61  ;;  %9513 = vst [vmem:[#allocation40_spill] sm:$0xff] %v5980_v18  ;;  %v5983_v50 = vsel %vm343_vm0, %v386_v61, 0.0  ;;  %v580_v44 = vrot.slane %v5980_v18, 1 }
  0x41   : > { %9512 = vst [vmem:[#allocation39_spill] sm:$0xff] %v5977_v1  ;;  %v577_v16 = vsel %vm509_vm1, %v575_v19, %v576_v55  ;;  %v579_v42 = vsel %vm509_vm1, %v576_v55, %v578_v54  ;;  %v581_v21 = vrot.slane %v5977_v1, 1  ;;  %v583_v53 = vrot.slane %v5983_v50, 1 }
  0x42   : > { %9511 = vst [vmem:[#allocation38_spill] sm:$0xff] %v5974_v52  ;;  %4295 = vrot.lane.b32.xlu0 %v5974_v52, %s5587_s18  ;;  %v5991_v34 = vpack.i.bf16 %v579_v42, %v577_v16  ;;  %v388_v49 = vrot.slane %v306_v12, 7  ;;  %v389_v60 = vrot.slane %v307_v17, 7  ;;  %v596_v43 = vrot.slane %v5735_v30, 2 }
  0x43   : > { %v582_v61 = vsel %vm509_vm1, %v580_v44, %v581_v21  ;;  %v597_v19 = vrot.slane %v5742_v35, 2  ;;  %v599_v54 = vrot.slane %v5745_v36, 2  ;;  %v584_v55 = vsel %vm509_vm1, %v581_v21, %v583_v53 }
  0x44   : > { %9514 = vst [vmem:[#allocation41_spill] sm:$0xff] %v5991_v34  ;;  %4300 = vrot.lane.b32.xlu1 %v5991_v34, %s5587_s18  ;;  %v6002_v16 = vsel %vm343_vm0, %v388_v49, %v389_v60  ;;  %v6005_v42 = vsel %vm343_vm0, 0.0, %v388_v49  ;;  %v6008_v12 = vsel %vm343_vm0, %v389_v60, 0.0  ;;  %v6010_v17 = vpack.i.bf16 %v584_v55, %v582_v61 }
  0x45   : > { %9515 = vst [vmem:[#allocation42_spill] sm:$0xff] %v6002_v16  ;;  %9516 = vst [vmem:[#allocation43_spill] sm:$0xff] %v6005_v42  ;;  %v585_v44 = vrot.slane %v6005_v42, 1  ;;  %v586_v36 = vrot.slane %v6002_v16, 1  ;;  %v588_v52 = vrot.slane %v6008_v12, 1  ;;  %v598_v34 = vsel %vm590_vm2, %v596_v43, %v597_v19 }
  0x46   : > { %9517 = vst [vmem:[#allocation44_spill] sm:$0xff] %v6010_v17  ;;  %v600_v21 = vsel %vm590_vm2, %v597_v19, %v599_v54  ;;  %v601_v53 = vrot.slane %v5729_v28, 2  ;;  %v602_v49 = vrot.slane %v5726_v27, 2  ;;  %4305 = vrot.lane.b32.xlu0 %v6010_v17, %s5587_s18  ;;  %v6025_v55 = vpack.i.bf16 %v5721_v26, %v5713_v15 }
  0x47   : > { %v587_v60 = vsel %vm509_vm1, %v585_v44, %v586_v36  ;;  %v589_v61 = vsel %vm509_vm1, %v586_v36, %v588_v52  ;;  %v606_v24 = vrot.slane %v5761_v47, 2  ;;  %v9519_v54 = vrot.slane %v5732_v29, 2 }
  0x48   : > { %9518 = vst [vmem:[#allocation45_spill] sm:$0xff] %v6025_v55  ;;  %v6028_v43 = vpack.i.bf16 %v589_v61, %v587_v60  ;;  %v603_v19 = vsel %vm590_vm2, %v601_v53, %v602_v49  ;;  %v607_v17 = vrot.slane %v5749_v38, 2  ;;  %v6035_v46 = vpack.i.bf16 %v600_v21, %v598_v34 }
  0x49   : > { %v605_v3 = vsel %vm590_vm2, %v602_v49, %v9519_v54  ;;  %v609_v52 = vrot.slane %v5764_v48, 2  ;;  %v611_v44 = vrot.slane %v5788_v5, 2  ;;  %v612_v15 = vrot.slane %v5785_v4, 2 }
  0x4a   : > { %4310 = vrot.lane.b32.xlu1 %v6028_v43, %s5587_s18  ;;  %v6042_v26 = vpack.i.bf16 %v605_v3, %v603_v19  ;;  %v608_v36 = vsel %vm590_vm2, %v606_v24, %v607_v17  ;;  %v614_v29 = vrot.slane %v5791_v6, 2  ;;  %v616_v53 = vrot.slane %v5804_v13, 2  ;;  %4315 = vrot.lane.b32.xlu0 %v6025_v55, %s5588_s19 }
  0x4b   : > { %v610_v48 = vsel %vm590_vm2, %v607_v17, %v609_v52  ;;  %v617_v34 = vrot.slane %v5797_v10, 2  ;;  %v619_v21 = vrot.slane %v5807_v14, 2  ;;  %v621_v49 = vrot.slane %v5821_v31, 2 }
  0x4c   : > { %v613_v3 = vsel %vm590_vm2, %v611_v44, %v612_v15  ;;  %v615_v24 = vsel %vm590_vm2, %v612_v15, %v614_v29  ;;  %v622_v6 = vrot.slane %v5818_v25, 2  ;;  %v624_v60 = vrot.slane %v5824_v32, 2 }
  0x4d   : > { %v6059_v61 = vpack.i.bf16 %v610_v48, %v608_v36  ;;  %v626_v17 = vrot.slane %v5846_v58, 2  ;;  %v627_v19 = vrot.slane %v5843_v57, 2  ;;  %v629_v14 = vrot.slane %v5849_v59, 2 }
  0x4e   : > { %4320 = vrot.lane.b32.xlu1 %v6035_v46, %s5588_s19  ;;  %4325 = vrot.lane.b32.xlu0 %v6042_v26, %s5588_s19  ;;  %v6066_v54 = vpack.i.bf16 %v615_v24, %v613_v3  ;;  %v618_v52 = vsel %vm590_vm2, %v616_v53, %v617_v34  ;;  %v620_v32 = vsel %vm590_vm2, %v617_v34, %v619_v21  ;;  %v631_v36 = vrot.slane %v5860_v7, 2 }
  0x4f   : > { %v623_v44 = vsel %vm590_vm2, %v621_v49, %v622_v6  ;;  %v625_v15 = vsel %vm590_vm2, %v622_v6, %v624_v60  ;;  %v632_v29 = vrot.slane %v5857_v0, 2  ;;  %v634_v48 = vrot.slane %v5863_v8, 2 }
  0x50   : > { %v636_v59 = vrot.slane %v5880_v33, 2  ;;  %v637_v55 = vrot.slane %v5877_v23, 2  ;;  %v6079_v53 = vpack.i.bf16 %v620_v32, %v618_v52  ;;  %v628_v34 = vsel %vm590_vm2, %v626_v17, %v627_v19 }
  0x51   : > { %v630_v21 = vsel %vm590_vm2, %v627_v19, %v629_v14  ;;  %v639_v49 = vrot.slane %v5886_v41, 2  ;;  %v6086_v3 = vpack.i.bf16 %v625_v15, %v623_v44  ;;  %v641_v8 = vrot.slane %v5903_v9, 2 }
  0x52   : > { %4330 = vrot.lane.b32.xlu1 %v6059_v61, %s5588_s19  ;;  %4335 = vrot.lane.b32.xlu0 %v6066_v54, %s5588_s19  ;;  %v642_v24 = vrot.slane %v5900_v63, 2  ;;  %v644_v6 = vrot.slane %v5906_v11, 2  ;;  %v633_v60 = vsel %vm590_vm2, %v631_v36, %v632_v29  ;;  %v635_v52 = vsel %vm590_vm2, %v632_v29, %v634_v48 }
  0x53   : > { %v6093_v17 = vpack.i.bf16 %v630_v21, %v628_v34  ;;  %v638_v19 = vsel %vm590_vm2, %v636_v59, %v637_v55  ;;  %v640_v41 = vsel %vm590_vm2, %v637_v55, %v639_v49  ;;  %v646_v14 = vrot.slane %v5920_v37, 2 }
  0x54   : > { %v647_v32 = vrot.slane %v5917_v22, 2  ;;  %v649_v44 = vrot.slane %v5923_v39, 2  ;;  %v6104_v11 = vpack.i.bf16 %v635_v52, %v633_v60  ;;  %v643_v15 = vsel %vm590_vm2, %v641_v8, %v642_v24 }
  0x55   : > { %v645_v36 = vsel %vm590_vm2, %v642_v24, %v644_v6  ;;  %v651_v29 = vrot.slane %v5938_v62, 2  ;;  %v652_v48 = vrot.slane %v5947_v45, 2  ;;  %v654_v55 = vrot.slane %v5950_v20, 2 }
  0x56   : > { %4340 = vrot.lane.b32.xlu1 %v6079_v53, %s5588_s19  ;;  %4345 = vrot.lane.b32.xlu0 %v6086_v3, %s5588_s19  ;;  %v6111_v59 = vpack.i.bf16 %v640_v41, %v638_v19  ;;  %v6115_v39 = vpack.i.bf16 %v645_v36, %v643_v15  ;;  %v648_v34 = vsel %vm590_vm2, %v646_v14, %v647_v32  ;;  %v656_v49 = vrot.slane %v5960_v51, 2  ;;  %v308_v41 = vld [vmem:[%s5705_s17 + $0xf0] sm:$0xff]  ;;  %v309_v14 = vld [vmem:[%s5705_s17 + $0xf8] sm:$0xff]  ;;  %s5594_s17 = smov 32  }
  0x57   : > { %v650_v21 = vsel %vm590_vm2, %v647_v32, %v649_v44  ;;  %v657_v8 = vrot.slane %v5957_v2, 2  ;;  %v659_v20 = vrot.slane %v5963_v40, 2  ;;  %v661_v24 = vrot.slane %v5980_v18, 2 }
  0x58   : > { %9520 = vst [vmem:[#allocation46_spill] sm:$0xff] %v6111_v59  ;;  %v662_v6 = vrot.slane %v5977_v1, 2  ;;  %v653_v60 = vsel %vm590_vm2, %v651_v29, %v652_v48  ;;  %v655_v52 = vsel %vm590_vm2, %v652_v48, %v654_v55  ;;  %v664_v19 = vrot.slane %v5983_v50, 2 }
  0x59   : > { %v6133_v32 = vpack.i.bf16 %v650_v21, %v648_v34  ;;  %v666_v44 = vrot.slane %v6005_v42, 2  ;;  %v667_v40 = vrot.slane %v6002_v16, 2  ;;  %v669_v15 = vrot.slane %v6008_v12, 2 }
  0x5a   : > { %4350 = vrot.lane.b32.xlu1 %v6093_v17, %s5588_s19  ;;  %4355 = vrot.lane.b32.xlu0 %v6104_v11, %s5588_s19  ;;  %v6140_v36 = vpack.i.bf16 %v655_v52, %v653_v60  ;;  %v658_v50 = vsel %vm590_vm2, %v656_v49, %v657_v8  ;;  %v660_v29 = vsel %vm590_vm2, %v657_v8, %v659_v20  ;;  %v391_v34 = vrot.slane %v308_v41, 7 }
  0x5b   : > { %v663_v48 = vsel %vm590_vm2, %v661_v24, %v662_v6  ;;  %v665_v55 = vsel %vm590_vm2, %v662_v6, %v664_v19  ;;  %v392_v21 = vrot.slane %v309_v14, 7  ;;  %v668_v12 = vsel %vm590_vm2, %v666_v44, %v667_v40 }
  0x5c   : > { %v670_v60 = vsel %vm590_vm2, %v667_v40, %v669_v15  ;;  %v6154_v49 = vpack.i.bf16 %v665_v55, %v663_v48  ;;  %v4394_v8 = vpack.i.bf16 %v5742_v35, %v5735_v30  ;;  %v459_v24 = vsel %vm343_vm0, 0.0, %v391_v34 }
  0x5d   : > { %v393_v20 = vsel %vm343_vm0, %v391_v34, %v392_v21  ;;  %v6160_v6 = vpack.i.bf16 %v670_v60, %v668_v12  ;;  %v476_v52 = vsel %vm343_vm0, %v392_v21, 0.0  ;;  %v673_v19 = vrot.slane %v459_v24, 1 }
  0x5e   : > { %4360 = vrot.lane.b32.xlu1 %v6111_v59, %s5588_s19  ;;  %4365 = vrot.lane.b32.xlu0 %v6115_v39, %s5588_s19  ;;  %v6148_v59 = vpack.i.bf16 %v660_v29, %v658_v50  ;;  %v674_v41 = vrot.slane %v393_v20, 1  ;;  %v676_v14 = vrot.slane %v476_v52, 1  ;;  %v6175_v50 = vpack.i.bf16 %v5726_v27, %v5729_v28 }
  0x5f   : > { %v6180_v29 = vpack.i.bf16 %v5749_v38, %v5761_v47  ;;  %v678_v48 = vrot.slane %v459_v24, 2  ;;  %v679_v55 = vrot.slane %v393_v20, 2  ;;  %v681_v34 = vrot.slane %v476_v52, 2 }
  0x60   : > { %v675_v44 = vsel %vm509_vm1, %v673_v19, %v674_v41  ;;  %v677_v40 = vsel %vm509_vm1, %v674_v41, %v676_v14  ;;  %v6188_v60 = vpack.i.bf16 %v5785_v4, %v5788_v5  ;;  %v6198_v52 = vpack.i.bf16 %v393_v20, %v459_v24 }
  0x61   : > { %v6169_v15 = vpack.i.bf16 %v677_v40, %v675_v44  ;;  %v680_v21 = vsel %vm590_vm2, %v678_v48, %v679_v55  ;;  %v682_v12 = vsel %vm590_vm2, %v679_v55, %v681_v34  ;;  %v6204_v41 = vpack.i.bf16 %v5818_v25, %v5821_v31 }
  0x62   : > { %4370 = vrot.lane.b32.xlu1 %v6133_v32, %s5588_s19  ;;  %4375 = vrot.lane.b32.xlu0 %v6140_v36, %s5588_s19  ;;  %v6190_v19 = vpack.i.bf16 %v682_v12, %v680_v21  ;;  %v6210_v14 = vpack.i.bf16 %v5843_v57, %v5846_v58  ;;  %v6216_v20 = vpack.i.bf16 %v5857_v0, %v5860_v7  ;;  %v9521_v12 = vld [vmem:[#allocation8_spill] sm:$0xff]  ;;  %v9531_v7 = vld [vmem:[#allocation38_spill] sm:$0xff]  ;;  %v9532_v0 = vld [vmem:[#allocation41_spill] sm:$0xff]  ;;  %vm3322_vm14 = vcmask 326656  }
  0x63   : > { %v6222_v24 = vpack.i.bf16 %v5877_v23, %v5880_v33  ;;  %v6228_v44 = vpack.i.bf16 %v5900_v63, %v5903_v9  ;;  %v6234_v40 = vpack.i.bf16 %v5917_v22, %v5920_v37  ;;  %v6240_v48 = vpack.i.bf16 %v5947_v45, %v5938_v62  ;;  %v9527_v45 = vld [vmem:[#allocation26_spill] sm:$0xff]  ;;  %v9528_v22 = vld [vmem:[#allocation29_spill] sm:$0xff]  ;;  %v9529_v9 = vld [vmem:[#allocation32_spill] sm:$0xff] }
  0x64   : > { %v6246_v55 = vpack.i.bf16 %v5957_v2, %v5960_v51  ;;  %v6252_v34 = vpack.i.bf16 %v5977_v1, %v5980_v18  ;;  %v6258_v21 = vpack.i.bf16 %v6002_v16, %v6005_v42  ;;  %v9522_v18 = vld [vmem:[#allocation9_spill] sm:$0xff]  ;;  %v9523_v42 = vld [vmem:[#allocation14_spill] sm:$0xff]  ;;  %v9525_v51 = vld [vmem:[#allocation20_spill] sm:$0xff]  ;;  %vm3355_vm15 = vcmask 392192  }
  0x65   : > { %v9524_v1 = vld [vmem:[#allocation17_spill] sm:$0xff]  ;;  %v9530_v33 = vld [vmem:[#allocation35_spill] sm:$0xff]  ;;  %v9533_v57 = vld [vmem:[#allocation44_spill] sm:$0xff] }
  0x66   : > { %4380 = vrot.lane.b32.xlu1 %v6148_v59, %s5588_s19  ;;  %4385 = vrot.lane.b32.xlu0 %v6154_v49, %s5588_s19 }
  0x6a   : > { %4390 = vrot.lane.b32.xlu1 %v6160_v6, %s5588_s19  ;;  %4395 = vrot.lane.b32.xlu0 %v4394_v8, %s5589_s20  ;;  %v6196_v8 = vpack.i.bf16 %v5797_v10, %v5804_v13 }
  0x6e   : > { %4400 = vrot.lane.b32.xlu1 %v6175_v50, %s5589_s20  ;;  %4405 = vrot.lane.b32.xlu0 %v6180_v29, %s5589_s20 }
  0x72   : > { %4410 = vrot.lane.b32.xlu1 %v6188_v60, %s5589_s20  ;;  %4415 = vrot.lane.b32.xlu0 %v6196_v8, %s5589_s20 }
  0x76   : > { %4420 = vrot.lane.b32.xlu1 %v6204_v41, %s5589_s20  ;;  %4425 = vrot.lane.b32.xlu0 %v6210_v14, %s5589_s20 }
  0x7a   : > { %4430 = vrot.lane.b32.xlu1 %v6216_v20, %s5589_s20  ;;  %4435 = vrot.lane.b32.xlu0 %v6222_v24, %s5589_s20 }
  0x7e   : > { %4440 = vrot.lane.b32.xlu1 %v6228_v44, %s5589_s20  ;;  %4445 = vrot.lane.b32.xlu0 %v6234_v40, %s5589_s20 }
  0x82   : > { %4450 = vrot.lane.b32.xlu1 %v6240_v48, %s5589_s20  ;;  %4455 = vrot.lane.b32.xlu0 %v6246_v55, %s5589_s20 }
  0x86   : > { %4460 = vrot.lane.b32.xlu1 %v6252_v34, %s5589_s20  ;;  %4465 = vrot.lane.b32.xlu0 %v6258_v21, %s5589_s20 }
  0x8a   : > { %4470 = vrot.lane.b32.xlu1 %v6198_v52, %s5589_s20  ;;  %4475 = vrot.lane.b32.xlu0 %v5775_v56, %s5590_s21  ;;  %v9526_v56 = vld [vmem:[#allocation23_spill] sm:$0xff] }
  0x8e   : > { %4480 = vrot.lane.b32.xlu1 %v9521_v12, %s5590_s21  ;;  %4485 = vrot.lane.b32.xlu0 %v9522_v18, %s5590_s21 }
  0x90   : > { %v6274_v16 = vpop.permute.xlu0 %4235 }
  0x92   : > { %4490 = vrot.lane.b32.xlu1 %v9523_v42, %s5590_s21  ;;  %4495 = vrot.lane.b32.xlu0 %v9524_v1, %s5590_s21 }
  0x96   : > { %4500 = vrot.lane.b32.xlu1 %v9525_v51, %s5590_s21  ;;  %v6280_v2 = vpop.permute.xlu1 %4245  ;;  %4505 = vrot.lane.b32.xlu0 %v9526_v56, %s5590_s21 }
  0x98   : > { %v6284_v62 = vpop.permute.xlu0 %4240 }
  0x9a   : > { %4510 = vrot.lane.b32.xlu1 %v9527_v45, %s5590_s21  ;;  %v6288_v37 = vpop.permute.xlu1 %4250  ;;  %4515 = vrot.lane.b32.xlu0 %v9528_v22, %s5590_s21 }
  0x9e   : > { %4520 = vrot.lane.b32.xlu1 %v9529_v9, %s5590_s21  ;;  %v6294_v63 = vpop.permute.xlu0 %4255  ;;  %4525 = vrot.lane.b32.xlu0 %v9530_v33, %s5590_s21 }
  0xa0   : > { %v6298_v23 = vpop.permute.xlu1 %4260 }
  0xa2   : > { %4530 = vrot.lane.b32.xlu1 %v9531_v7, %s5590_s21  ;;  %4535 = vrot.lane.b32.xlu0 %v9532_v0, %s5590_s21  ;;  %v6304_v58 = vpop.permute.xlu0 %4265 }
  0xa6   : > { %4540 = vrot.lane.b32.xlu1 %v9533_v57, %s5590_s21  ;;  %v6308_v31 = vpop.permute.xlu1 %4270  ;;  %4545 = vrot.lane.b32.xlu0 %v6028_v43, %s5590_s21 }
  0xa7   : > { %9534 = vst [vmem:[#allocation8_spill] sm:$0xff] %v6308_v31 }
  0xa8   : > { %v6312_v25 = vpop.permute.xlu0 %4275 }
  0xa9   : > { %9535 = vst [vmem:[#allocation9_spill] sm:$0xff] %v6312_v25 }
  0xaa   : > { %4550 = vrot.lane.b32.xlu1 %v6169_v15, %s5590_s21  ;;  %4555 = vrot.lane.b32.xlu0 %v6035_v46, %s5591_s22 }
  0xab   : > { %v6317_v13 = vpop.permute.xlu1 %4280 }
  0xac   : > { %9536 = vst [vmem:[#allocation14_spill] sm:$0xff] %v6317_v13 }
  0xae   : > { %4560 = vrot.lane.b32.xlu1 %v6042_v26, %s5591_s22  ;;  %v6320_v10 = vpop.permute.xlu0 %4285  ;;  %4565 = vrot.lane.b32.xlu0 %v6059_v61, %s5591_s22 }
  0xaf   : > { %9537 = vst [vmem:[#allocation17_spill] sm:$0xff] %v6320_v10  ;;  %v9542_v10 = vld [vmem:[#allocation46_spill] sm:$0xff] }
  0xb1   : > { %v6323_v31 = vpop.permute.xlu1 %4290 }
  0xb2   : > { %9538 = vst [vmem:[#allocation20_spill] sm:$0xff] %v6323_v31  ;;  %4570 = vrot.lane.b32.xlu1 %v6066_v54, %s5591_s22  ;;  %4575 = vrot.lane.b32.xlu0 %v6079_v53, %s5591_s22 }
  0xb4   : > { %v6327_v25 = vpop.permute.xlu0 %4295 }
  0xb5   : > { %9539 = vst [vmem:[#allocation23_spill] sm:$0xff] %v6327_v25 }
  0xb6   : > { %4580 = vrot.lane.b32.xlu1 %v6086_v3, %s5591_s22  ;;  %v6330_v5 = vpop.permute.xlu1 %4300  ;;  %4585 = vrot.lane.b32.xlu0 %v6093_v17, %s5591_s22 }
  0xb7   : > { %9540 = vst [vmem:[#allocation26_spill] sm:$0xff] %v6330_v5 }
  0xb8   : > { %v6333_v46 = vpop.permute.xlu0 %4305 }
  0xb9   : > { %9541 = vst [vmem:[#allocation29_spill] sm:$0xff] %v6333_v46 }
  0xba   : > { %4590 = vrot.lane.b32.xlu1 %v6104_v11, %s5591_s22  ;;  %4595 = vrot.lane.b32.xlu0 %v9542_v10, %s5591_s22 }
  0xbc   : > { %v6337_v13 = vpop.permute.xlu1 %4310  ;;  %v6339_v31 = vpop.permute.xlu0 %4315 }
  0xbd   : > { %9543 = vst [vmem:[#allocation32_spill] sm:$0xff] %v6337_v13  ;;  %9544 = vst [vmem:[#allocation35_spill] sm:$0xff] %v6339_v31 }
  0xbe   : > { %4600 = vrot.lane.b32.xlu1 %v6115_v39, %s5591_s22  ;;  %4605 = vrot.lane.b32.xlu0 %v6133_v32, %s5591_s22 }
  0xc0   : > { %v6343_v25 = vpop.permute.xlu1 %4320  ;;  %v6345_v4 = vpop.permute.xlu0 %4325 }
  0xc1   : > { %9545 = vst [vmem:[#allocation38_spill] sm:$0xff] %v6343_v25  ;;  %9546 = vst [vmem:[#allocation41_spill] sm:$0xff] %v6345_v4 }
  0xc2   : > { %4610 = vrot.lane.b32.xlu1 %v6140_v36, %s5591_s22  ;;  %4615 = vrot.lane.b32.xlu0 %v6148_v59, %s5591_s22 }
  0xc4   : > { %v6349_v46 = vpop.permute.xlu1 %4330  ;;  %v6351_v5 = vpop.permute.xlu0 %4335 }
  0xc5   : > { %9547 = vst [vmem:[#allocation44_spill] sm:$0xff] %v6351_v5 }
  0xc6   : > { %4620 = vrot.lane.b32.xlu1 %v6154_v49, %s5591_s22  ;;  %4625 = vrot.lane.b32.xlu0 %v6160_v6, %s5591_s22 }
  0xc8   : > { %v6355_v31 = vpop.permute.xlu1 %4340  ;;  %v6357_v13 = vpop.permute.xlu0 %4345 }
  0xc9   : > { %9548 = vst [vmem:[#allocation46_spill] sm:$0xff] %v6355_v31 }
  0xca   : > { %4630 = vrot.lane.b32.xlu1 %v6190_v19, %s5591_s22  ;;  %4635 = vrot.lane.b32.xlu0 %v6175_v50, %s5592_s23  ;;  %s4059_s22 = sshll.u32 %s5661_s28, 8  ;;  %s5599_s28 = smov [#allocation2]  }
  0xcb   : > { %s9222_s16 = scalar_lea.hbm %s9271_s7, %s4059_s22 }
  0xcc   : > { %v6362_v4 = vpop.permute.xlu1 %4350  ;;  %v6364_v25 = vpop.permute.xlu0 %4355 }
  0xcd   : > { %9549 = vst [vmem:[#allocation47_spill] sm:$0xff] %v6362_v4 }
  0xce   : > { %4640 = vrot.lane.b32.xlu1 %v6180_v29, %s5592_s23  ;;  %4645 = vrot.lane.b32.xlu0 %v6188_v60, %s5592_s23 }
  0xd0   : > { %v6370_v5 = vpop.permute.xlu1 %4360  ;;  %v6372_v31 = vpop.permute.xlu0 %4365 }
  0xd2   : > { %4650 = vrot.lane.b32.xlu1 %v6196_v8, %s5592_s23  ;;  %4655 = vrot.lane.b32.xlu0 %v6204_v41, %s5592_s23 }
  0xd4   : > { %v6378_v50 = vpop.permute.xlu1 %4370  ;;  %v6380_v4 = vpop.permute.xlu0 %4375 }
  0xd6   : > { %4660 = vrot.lane.b32.xlu1 %v6210_v14, %s5592_s23  ;;  %4665 = vrot.lane.b32.xlu0 %v6216_v20, %s5592_s23 }
  0xd8   : > { %v6386_v29 = vpop.permute.xlu1 %4380  ;;  %v6388_v60 = vpop.permute.xlu0 %4385 }
  0xda   : > { %4670 = vrot.lane.b32.xlu1 %v6222_v24, %s5592_s23  ;;  %4675 = vrot.lane.b32.xlu0 %v6228_v44, %s5592_s23 }
  0xdc   : > { %v6394_v8 = vpop.permute.xlu1 %4390  ;;  %v6396_v41 = vpop.permute.xlu0 %4395 }
  0xdd   : > { %9550 = vst [vmem:[#allocation48_spill] sm:$0xff] %v6396_v41  ;;  %v9554_v41 = vld [vmem:[#allocation5_spill] sm:$0xff] }
  0xde   : > { %4680 = vrot.lane.b32.xlu1 %v6234_v40, %s5592_s23  ;;  %4685 = vrot.lane.b32.xlu0 %v6240_v48, %s5592_s23  ;;  %v9553_v40 = vld [vmem:[#allocation6_spill] sm:$0xff] }
  0xdf   : > { %v6418_v48 = vpack.i.bf16 %v9554_v41, %v9553_v40 }
  0xe0   : > { %v6402_v14 = vpop.permute.xlu1 %4400  ;;  %v6404_v20 = vpop.permute.xlu0 %4405 }
  0xe1   : > { %9551 = vst [vmem:[#allocation49_spill] sm:$0xff] %v6404_v20  ;;  %9555 = vst [vmem:[#allocation51_spill] sm:$0xff] %v6418_v48 }
  0xe2   : > { %4690 = vrot.lane.b32.xlu1 %v6246_v55, %s5592_s23  ;;  %4695 = vrot.lane.b32.xlu0 %v6252_v34, %s5592_s23 }
  0xe4   : > { %v6410_v24 = vpop.permute.xlu1 %4410  ;;  %v6412_v44 = vpop.permute.xlu0 %4415 }
  0xe5   : > { %9552 = vst [vmem:[#allocation50_spill] sm:$0xff] %v6412_v44  ;;  %v5514_v44 = vld [vmem:[%s9265_s1] sm:$0xff]  }
  0xe6   : > { %4700 = vrot.lane.b32.xlu1 %v6258_v21, %s5592_s23  ;;  %4705 = vrot.lane.b32.xlu0 %v6198_v52, %s5592_s23 }
  0xe7   : > { %4100 = vmatprep.subr.bf16.mxu0 %v5514_v44 }
  0xe8   : > { %v6422_v20 = vpop.permute.xlu1 %4420  ;;  %v6424_v55 = vpop.permute.xlu0 %4425  ;;  %4101 = vmatpush3.bf16.msra.mxu0 %v5514_v44  ;;  %v5516_v44 = vld [vmem:[%s9265_s1 + $0x10] ss:$0 sps:$4 sm:$0x33]  }
  0xe9   : > { %9556 = vst [vmem:[#allocation52_spill] sm:$0xff] %v6424_v55 }
  0xea   : > { %4710 = vrot.lane.b32.xlu1 %v6418_v48, %s5592_s23  ;;  %4715 = vrot.lane.b32.xlu0 %v9521_v12, %s5593_s29  ;;  %v5515_v12 = vld [vmem:[%s9265_s1 + $0x8] sm:$0xff]  }
  0xeb   : > { %4102 = vmatprep.subr.bf16.mxu0 %v5515_v12 }
  0xec   : > { %v6430_v34 = vpop.permute.xlu1 %4430  ;;  %v6432_v21 = vpop.permute.xlu0 %4435  ;;  %4103 = vmatpush3.bf16.msra.mxu0 %v5515_v12 }
  0xed   : > { %9557 = vst [vmem:[#allocation53_spill] sm:$0xff] %v6430_v34  ;;  %9558 = vst [vmem:[#allocation54_spill] sm:$0xff] %v6432_v21  ;;  %4180 = vmatprep.subr.msk.bf16.mxu0 %vm1800_vm3, %v5516_v44  ;;  %v9635_v21 = vld [vmem:[#allocation43_spill] sm:$0xff]  ;;  %v9636_v34 = vld [vmem:[#allocation46_spill] sm:$0xff] }
  0xee   : > { %4720 = vrot.lane.b32.xlu1 %v9522_v18, %s5593_s29  ;;  %4725 = vrot.lane.b32.xlu0 %v9523_v42, %s5593_s29 }
  0xf0   : > { %v6441_v52 = vpop.permute.xlu1 %4440  ;;  %v6443_v48 = vpop.permute.xlu0 %4445 }
  0xf1   : > { %9559 = vst [vmem:[#allocation55_spill] sm:$0xff] %v6441_v52  ;;  %9560 = vst [vmem:[#allocation56_spill] sm:$0xff] %v6443_v48  ;;  %v9632_v48 = vld [vmem:[#allocation44_spill] sm:$0xff] }
  0xf2   : > { %4730 = vrot.lane.b32.xlu1 %v9524_v1, %s5593_s29  ;;  %4735 = vrot.lane.b32.xlu0 %v9525_v51, %s5593_s29  ;;  %v1802_v1 = vsel %vm1800_vm3, %v5516_v44, 0 }
  0xf3   : > { %4105 = vmatpush3.bf16.msra.mxu0 %v1802_v1  ;;  %v9587_v1 = vld [vmem:[#allocation7_spill] sm:$0xff] }
  0xf4   : > { %v6452_v18 = vpop.permute.xlu1 %4450  ;;  %v6454_v42 = vpop.permute.xlu0 %4455 }
  0xf5   : > { %9561 = vst [vmem:[#allocation57_spill] sm:$0xff] %v6452_v18  ;;  %9562 = vst [vmem:[#allocation58_spill] sm:$0xff] %v6454_v42 }
  0xf6   : > { %4740 = vrot.lane.b32.xlu1 %v9526_v56, %s5593_s29  ;;  %4745 = vrot.lane.b32.xlu0 %v9527_v45, %s5593_s29 }
  0xf8   : > { %v6463_v51 = vpop.permute.xlu1 %4460  ;;  %v6465_v18 = vpop.permute.xlu0 %4465 }
  0xf9   : > { %9563 = vst [vmem:[#allocation59_spill] sm:$0xff] %v6463_v51  ;;  %9564 = vst [vmem:[#allocation60_spill] sm:$0xff] %v6465_v18  ;;  %v9630_v51 = vld [vmem:[#allocation41_spill] sm:$0xff] }
  0xfa   : > { %4750 = vrot.lane.b32.xlu1 %v9528_v22, %s5593_s29  ;;  %4755 = vrot.lane.b32.xlu0 %v9529_v9, %s5593_s29  ;;  %v4328_v42 = vunpack.i.h.bf16 %v9630_v51 }
  0xfc   : > { %v6471_v12 = vpop.permute.xlu1 %4470  ;;  %v6473_v56 = vpop.permute.xlu0 %4475 }
  0xfd   : > { %9565 = vst [vmem:[#allocation61_spill] sm:$0xff] %v6471_v12  ;;  %9566 = vst [vmem:[#allocation62_spill] sm:$0xff] %v6473_v56  ;;  %v9613_v12 = vld [vmem:[#allocation24_spill] sm:$0xff] }
  0xfe   : > { %4760 = vrot.lane.b32.xlu1 %v9530_v33, %s5593_s29  ;;  %4765 = vrot.lane.b32.xlu0 %v6042_v26, %s5594_s17 }
 0x100   : > { %v6479_v45 = vpop.permute.xlu1 %4480  ;;  %v6481_v44 = vpop.permute.xlu0 %4485 }
 0x101   : > { %9567 = vst [vmem:[#allocation63_spill] sm:$0xff] %v6479_v45  ;;  %9568 = vst [vmem:[#allocation64_spill] sm:$0xff] %v6481_v44  ;;  %v9618_v44 = vld [vmem:[#allocation30_spill] sm:$0xff] }
 0x102   : > { %4770 = vrot.lane.b32.xlu1 %v6059_v61, %s5594_s17  ;;  %4775 = vrot.lane.b32.xlu0 %v6066_v54, %s5594_s17 }
 0x104   : > { %v6487_v9 = vpop.permute.xlu1 %4490  ;;  %v6489_v22 = vpop.permute.xlu0 %4495 }
 0x105   : > { %9569 = vst [vmem:[#allocation65_spill] sm:$0xff] %v6487_v9  ;;  %9570 = vst [vmem:[#allocation66_spill] sm:$0xff] %v6489_v22  ;;  %v9615_v9 = vld [vmem:[#allocation27_spill] sm:$0xff] }
 0x106   : > { %4780 = vrot.lane.b32.xlu1 %v6079_v53, %s5594_s17  ;;  %4785 = vrot.lane.b32.xlu0 %v6086_v3, %s5594_s17 }
 0x108   : > { %v6495_v33 = vpop.permute.xlu1 %4500  ;;  %v6497_v26 = vpop.permute.xlu0 %4505 }
 0x109   : > { %9571 = vst [vmem:[#allocation67_spill] sm:$0xff] %v6495_v33  ;;  %9572 = vst [vmem:[#allocation68_spill] sm:$0xff] %v6497_v26  ;;  %v9610_v26 = vld [vmem:[#allocation21_spill] sm:$0xff] }
 0x10a   : > { %4790 = vrot.lane.b32.xlu1 %v6093_v17, %s5594_s17  ;;  %4795 = vrot.lane.b32.xlu0 %v6104_v11, %s5594_s17 }
 0x10c   : > { %v6503_v61 = vpop.permute.xlu1 %4510  ;;  %v6505_v54 = vpop.permute.xlu0 %4515 }
 0x10d   : > { %9573 = vst [vmem:[#allocation69_spill] sm:$0xff] %v6503_v61  ;;  %9574 = vst [vmem:[#allocation70_spill] sm:$0xff] %v6505_v54  ;;  %v9609_v61 = vld [vmem:[#allocation26_spill] sm:$0xff] }
 0x10e   : > { %4800 = vrot.lane.b32.xlu1 %v9542_v10, %s5594_s17  ;;  %4805 = vrot.lane.b32.xlu0 %v6115_v39, %s5594_s17 }
 0x110   : > { %v6511_v53 = vpop.permute.xlu1 %4520  ;;  %v6513_v3 = vpop.permute.xlu0 %4525 }
 0x111   : > { %9575 = vst [vmem:[#allocation71_spill] sm:$0xff] %v6511_v53  ;;  %9576 = vst [vmem:[#allocation72_spill] sm:$0xff] %v6513_v3 }
 0x112   : > { %4810 = vrot.lane.b32.xlu1 %v6133_v32, %s5594_s17  ;;  %4815 = vrot.lane.b32.xlu0 %v9531_v7, %s5593_s29 }
 0x114   : > { %v6519_v17 = vpop.permute.xlu1 %4530  ;;  %v6521_v11 = vpop.permute.xlu0 %4535 }
 0x115   : > { %9577 = vst [vmem:[#allocation73_spill] sm:$0xff] %v6519_v17  ;;  %9578 = vst [vmem:[#allocation74_spill] sm:$0xff] %v6521_v11 }
 0x116   : > { %4820 = vrot.lane.b32.xlu1 %v9532_v0, %s5593_s29  ;;  %4825 = vrot.lane.b32.xlu0 %v6140_v36, %s5594_s17 }
 0x118   : > { %v6527_v10 = vpop.permute.xlu1 %4540  ;;  %v6529_v39 = vpop.permute.xlu0 %4545 }
 0x119   : > { %9579 = vst [vmem:[#allocation75_spill] sm:$0xff] %v6527_v10  ;;  %9580 = vst [vmem:[#allocation76_spill] sm:$0xff] %v6529_v39  ;;  %v4268_v39 = vunpack.i.h.bf16 %v6304_v58  ;;  %v9602_v10 = vld [vmem:[#allocation17_spill] sm:$0xff] }
 0x11a   : > { %4830 = vrot.lane.b32.xlu1 %v6148_v59, %s5594_s17  ;;  %4835 = vrot.lane.b32.xlu0 %v9533_v57, %s5593_s29  ;;  %v4288_v11 = vunpack.i.h.bf16 %v9602_v10 }
 0x11c   : > { %v6535_v7 = vpop.permute.xlu1 %4550  ;;  %v6537_v32 = vpop.permute.xlu0 %4555 }
 0x11d   : > { %9581 = vst [vmem:[#allocation77_spill] sm:$0xff] %v6535_v7  ;;  %9582 = vst [vmem:[#allocation78_spill] sm:$0xff] %v6537_v32  ;;  %v4247_v7 = vunpack.i.l.bf16 %v6280_v2  ;;  %v4263_v32 = vunpack.i.h.bf16 %v6298_v23 }
 0x11e   : > { %4840 = vrot.lane.b32.xlu1 %v6028_v43, %s5593_s29  ;;  %4845 = vrot.lane.b32.xlu0 %v6154_v49, %s5594_s17  ;;  %v4238_v43 = vunpack.i.h.bf16 %v6274_v16  ;;  %v4237_v49 = vunpack.i.l.bf16 %v6274_v16  ;;  %v4258_v16 = vunpack.i.h.bf16 %v6294_v63 }
 0x120   : > { %v6543_v0 = vpop.permute.xlu1 %4560  ;;  %v6545_v36 = vpop.permute.xlu0 %4565 }
 0x121   : > { %9583 = vst [vmem:[#allocation79_spill] sm:$0xff] %v6543_v0  ;;  %9584 = vst [vmem:[#allocation80_spill] sm:$0xff] %v6545_v36  ;;  %v4252_v36 = vunpack.i.l.bf16 %v6288_v37 }
 0x122   : > { %4850 = vrot.lane.b32.xlu1 %v6160_v6, %s5594_s17  ;;  %4855 = vrot.lane.b32.xlu0 %v6169_v15, %s5593_s29  ;;  %v4248_v6 = vunpack.i.h.bf16 %v6280_v2  ;;  %v4243_v15 = vunpack.i.h.bf16 %v6284_v62  ;;  %v9590_v2 = vld [vmem:[#allocation45_spill] sm:$0xff] }
 0x124   : > { %v6551_v57 = vpop.permute.xlu1 %4570  ;;  %v6553_v59 = vpop.permute.xlu0 %4575 }
 0x125   : > { %9585 = vst [vmem:[#allocation81_spill] sm:$0xff] %v6551_v57  ;;  %9586 = vst [vmem:[#allocation82_spill] sm:$0xff] %v6553_v59  ;;  %v4242_v59 = vunpack.i.l.bf16 %v6284_v62  ;;  %v6582_v62 = vsel %vm1451_vm4, %v9553_v40, %v4237_v49 }
 0x126   : > { %4860 = vrot.lane.b32.xlu1 %v9587_v1, %s5593_s29  ;;  %4865 = vrot.lane.b32.xlu0 %v6190_v19, %s5594_s17  ;;  %v4253_v1 = vunpack.i.h.bf16 %v6288_v37  ;;  %v4257_v19 = vunpack.i.l.bf16 %v6294_v63  ;;  %v4262_v37 = vunpack.i.l.bf16 %v6298_v23  ;;  %v6588_v63 = vsel %vm1451_vm4, %v5726_v27, %v4248_v6 }
 0x127   : > { %v6603_v23 = vsel %vm1451_vm4, %v5735_v30, %v4242_v59  ;;  %v9595_v30 = vld [vmem:[#allocation12_spill] sm:$0xff] }
 0x128   : > { %v6564_v57 = vpop.permute.xlu1 %4580  ;;  %v6570_v0 = vpop.permute.xlu0 %4585  ;;  %v6607_v27 = vsel %vm1451_vm4, %v5749_v38, %v4253_v1  ;;  %v6625_v59 = vsel %vm1451_vm4, %v9595_v30, %v4263_v32  ;;  %v9596_v38 = vld [vmem:[#allocation8_spill] sm:$0xff]  ;;  %v9601_v30 = vld [vmem:[#allocation14_spill] sm:$0xff] }
 0x129   : > { %9588 = vst [vmem:[#allocation83_spill] sm:$0xff] %v6564_v57  ;;  %9589 = vst [vmem:[#allocation84_spill] sm:$0xff] %v6570_v0  ;;  %v6578_v57 = vsel %vm1451_vm4, %v9554_v41, %v4238_v43  ;;  %v6592_v0 = vsel %vm1451_vm4, %v5729_v28, %v4247_v7  ;;  %v6596_v43 = vsel %vm1451_vm4, %v5742_v35, %v4243_v15  ;;  %v4267_v41 = vunpack.i.l.bf16 %v6304_v58  ;;  %v9592_v7 = vld [vmem:[#allocation10_spill] sm:$0xff]  ;;  %v9594_v58 = vld [vmem:[#allocation11_spill] sm:$0xff] }
 0x12a   : > { %4870 = vrot.lane.b32.xlu1 %v9590_v2, %s5594_s17  ;;  %v6611_v28 = vsel %vm1451_vm4, %v5761_v47, %v4252_v36  ;;  %v6615_v35 = vsel %vm1451_vm4, %v9592_v7, %v4258_v16  ;;  %v6621_v15 = vsel %vm1451_vm4, %v9594_v58, %v4257_v19  ;;  %v4273_v1 = vunpack.i.h.bf16 %v9596_v38  ;;  %v9597_v47 = vld [vmem:[#allocation13_spill] sm:$0xff]  ;;  %v9598_v16 = vld [vmem:[#allocation15_spill] sm:$0xff]  ;;  %v9600_v58 = vld [vmem:[#allocation16_spill] sm:$0xff] }
 0x12b   : > { %v4272_v40 = vunpack.i.l.bf16 %v9596_v38  ;;  %v6631_v36 = vsel %vm1451_vm4, %v9597_v47, %v4262_v37  ;;  %v6635_v7 = vsel %vm1451_vm4, %v9598_v16, %v4268_v39  ;;  %v9599_v2 = vld [vmem:[#allocation9_spill] sm:$0xff]  ;;  %v6641_v32 = vsel %vm1451_vm4, %v9600_v58, %v4267_v41  ;;  %v9604_v47 = vld [vmem:[#allocation20_spill] sm:$0xff]  ;;  %v9607_v41 = vld [vmem:[#allocation18_spill] sm:$0xff] }
 0x12c   : > { %v6599_v49 = vpop.permute.xlu1 %4590  ;;  %v6617_v6 = vpop.permute.xlu0 %4595  ;;  %v4277_v19 = vunpack.i.l.bf16 %v9599_v2  ;;  %v4282_v38 = vunpack.i.l.bf16 %v9601_v30  ;;  %v4287_v39 = vunpack.i.l.bf16 %v9602_v10  ;;  %v4293_v16 = vunpack.i.h.bf16 %v9604_v47 }
 0x12d   : > { %9591 = vst [vmem:[#allocation85_spill] sm:$0xff] %v6599_v49  ;;  %9593 = vst [vmem:[#allocation10_spill] sm:$0xff] %v6617_v6  ;;  %v4278_v6 = vunpack.i.h.bf16 %v9599_v2  ;;  %v4283_v49 = vunpack.i.h.bf16 %v9601_v30  ;;  %v4292_v17 = vunpack.i.l.bf16 %v9604_v47  ;;  %v9605_v2 = vld [vmem:[#allocation23_spill] sm:$0xff]  ;;  %v6656_v58 = vsel %vm1451_vm4, %v9607_v41, %v4273_v1  ;;  %v9611_v47 = vld [vmem:[#allocation22_spill] sm:$0xff] }
 0x12e   : > { %v4298_v3 = vunpack.i.h.bf16 %v9605_v2  ;;  %v9608_v30 = vld [vmem:[#allocation19_spill] sm:$0xff]  ;;  %v4303_v10 = vunpack.i.h.bf16 %v9609_v61  ;;  %v6670_v22 = vsel %vm1451_vm4, %v9611_v47, %v4277_v19  ;;  %v9612_v1 = vld [vmem:[#allocation29_spill] sm:$0xff]  ;;  %v9617_v47 = vld [vmem:[#allocation28_spill] sm:$0xff] }
 0x12f   : > { %v6660_v54 = vsel %vm1451_vm4, %v9608_v30, %v4272_v40  ;;  %v6666_v33 = vsel %vm1451_vm4, %v9610_v26, %v4278_v6  ;;  %v4308_v41 = vunpack.i.h.bf16 %v9612_v1  ;;  %v6676_v40 = vsel %vm1451_vm4, %v9613_v12, %v4283_v49  ;;  %v9614_v30 = vld [vmem:[#allocation25_spill] sm:$0xff]  ;;  %v9619_v49 = vld [vmem:[#allocation31_spill] sm:$0xff] }
 0x130   : > { %v6646_v37 = vpop.permute.xlu1 %4600  ;;  %v6652_v53 = vpop.permute.xlu0 %4605  ;;  %v6684_v26 = vsel %vm1451_vm4, %v9615_v9, %v4288_v11  ;;  %v4307_v6 = vunpack.i.l.bf16 %v9612_v1  ;;  %v6695_v12 = vsel %vm1451_vm4, %v9618_v44, %v4293_v16  ;;  %v9622_v1 = vld [vmem:[#allocation33_spill] sm:$0xff]  ;;  %v9624_v44 = vld [vmem:[#allocation32_spill] sm:$0xff] }
 0x131   : > { %9603 = vst [vmem:[#allocation11_spill] sm:$0xff] %v6646_v37  ;;  %9606 = vst [vmem:[#allocation12_spill] sm:$0xff] %v6652_v53  ;;  %v4297_v37 = vunpack.i.l.bf16 %v9605_v2  ;;  %v4302_v53 = vunpack.i.l.bf16 %v9609_v61  ;;  %v6680_v2 = vsel %vm1451_vm4, %v9614_v30, %v4282_v38  ;;  %v6691_v61 = vsel %vm1451_vm4, %v9617_v47, %v4287_v39  ;;  %v9620_v30 = vld [vmem:[#allocation34_spill] sm:$0xff]  ;;  %v9623_v39 = vld [vmem:[#allocation36_spill] sm:$0xff] }
 0x132   : > { %v6699_v38 = vsel %vm1451_vm4, %v9619_v49, %v4292_v17  ;;  %v6703_v9 = vsel %vm1451_vm4, %v9620_v30, %v4298_v3  ;;  %v6713_v47 = vsel %vm1451_vm4, %v9623_v39, %v4303_v10  ;;  %v4313_v16 = vunpack.i.h.bf16 %v9624_v44  ;;  %v9625_v17 = vld [vmem:[#allocation37_spill] sm:$0xff]  ;;  %v9626_v3 = vld [vmem:[#allocation39_spill] sm:$0xff]  ;;  %v9629_v39 = vld [vmem:[#allocation38_spill] sm:$0xff] }
 0x133   : > { %v4312_v45 = vunpack.i.l.bf16 %v9624_v44  ;;  %v6719_v49 = vsel %vm1451_vm4, %v9625_v17, %v4302_v53  ;;  %v6723_v30 = vsel %vm1451_vm4, %v9626_v3, %v4308_v41  ;;  %v4323_v18 = vunpack.i.h.bf16 %v9629_v39 }
 0x134   : > { %v6687_v19 = vpop.permute.xlu1 %4610  ;;  %v6705_v11 = vpop.permute.xlu0 %4615  ;;  %v4322_v44 = vunpack.i.l.bf16 %v9629_v39  ;;  %v4327_v17 = vunpack.i.l.bf16 %v9630_v51  ;;  %v4333_v41 = vunpack.i.h.bf16 %v6349_v46  ;;  %v4332_v3 = vunpack.i.l.bf16 %v6349_v46 }
 0x135   : > { %9616 = vst [vmem:[#allocation8_spill] sm:$0xff] %v6687_v19  ;;  %9621 = vst [vmem:[#allocation13_spill] sm:$0xff] %v6705_v11  ;;  %v6709_v19 = vsel %vm1451_vm4, %v9622_v1, %v4297_v37  ;;  %v9627_v11 = vld [vmem:[#allocation35_spill] sm:$0xff]  ;;  %v9628_v1 = vld [vmem:[#allocation40_spill] sm:$0xff]  ;;  %v6748_v39 = vsel %vm1451_vm4, %v9635_v21, %v4312_v45  ;;  %v4343_v51 = vunpack.i.h.bf16 %v9636_v34  ;;  %v4348_v45 = vunpack.i.h.bf16 %v6357_v13 }
 0x136   : > { %v4318_v56 = vunpack.i.h.bf16 %v9627_v11  ;;  %v4317_v37 = vunpack.i.l.bf16 %v9627_v11  ;;  %v6729_v10 = vsel %vm1451_vm4, %v9628_v1, %v4307_v6  ;;  %v4337_v11 = vunpack.i.l.bf16 %v9632_v48  ;;  %v9634_v6 = vld [vmem:[#allocation42_spill] sm:$0xff] }
 0x137   : > { %v6744_v1 = vsel %vm1451_vm4, %v9634_v6, %v4313_v16  ;;  %v4347_v16 = vunpack.i.l.bf16 %v6357_v13  ;;  %v6764_v21 = vsel %vm1484_vm5, %v6603_v23, %v4322_v44  ;;  %v4363_v44 = vunpack.i.h.bf16 %v6370_v5 }
 0x138   : > { %v6734_v53 = vpop.permute.xlu1 %4620  ;;  %v6740_v52 = vpop.permute.xlu0 %4625  ;;  %v6754_v55 = vsel %vm1484_vm5, %v6578_v57, %v4318_v56  ;;  %v6758_v46 = vsel %vm1484_vm5, %v6582_v62, %v4317_v37  ;;  %v6772_v56 = vsel %vm1484_vm5, %v6588_v63, %v4328_v42  ;;  %v6783_v62 = vsel %vm1484_vm5, %v6607_v27, %v4333_v41 }
 0x139   : > { %9631 = vst [vmem:[#allocation15_spill] sm:$0xff] %v6734_v53  ;;  %9633 = vst [vmem:[#allocation9_spill] sm:$0xff] %v6740_v52  ;;  %v4338_v53 = vunpack.i.h.bf16 %v9632_v48  ;;  %v4342_v52 = vunpack.i.l.bf16 %v9636_v34  ;;  %v6768_v48 = vsel %vm1484_vm5, %v6596_v43, %v4323_v18  ;;  %v6779_v34 = vsel %vm1484_vm5, %v6592_v0, %v4327_v17  ;;  %v9638_v43 = vld [vmem:[#allocation47_spill] sm:$0xff] }
 0x13a   : > { %v6787_v18 = vsel %vm1484_vm5, %v6611_v28, %v4332_v3  ;;  %v6791_v42 = vsel %vm1484_vm5, %v6621_v15, %v4337_v11  ;;  %v6801_v0 = vsel %vm1484_vm5, %v6625_v59, %v4343_v51  ;;  %v4353_v23 = vunpack.i.h.bf16 %v9638_v43 }
 0x13b   : > { %v6797_v13 = vsel %vm1484_vm5, %v6615_v35, %v4338_v53  ;;  %v4352_v27 = vunpack.i.l.bf16 %v9638_v43  ;;  %v6807_v28 = vsel %vm1484_vm5, %v6631_v36, %v4342_v52  ;;  %v6811_v15 = vsel %vm1484_vm5, %v6641_v32, %v4347_v16 }
 0x13c   : > { %v6775_v57 = vpop.permute.xlu1 %4630  ;;  %v6793_v63 = vpop.permute.xlu0 %4635  ;;  %v4358_v37 = vunpack.i.h.bf16 %v6364_v25  ;;  %v4357_v35 = vunpack.i.l.bf16 %v6364_v25  ;;  %v6817_v59 = vsel %vm1484_vm5, %v6635_v7, %v4348_v45  ;;  %v4362_v53 = vunpack.i.l.bf16 %v6370_v5 }
 0x13d   : > { %9637 = vst [vmem:[#allocation16_spill] sm:$0xff] %v6775_v57  ;;  %v4367_v17 = vunpack.i.l.bf16 %v6372_v31  ;;  %v4368_v36 = vunpack.i.h.bf16 %v6372_v31  ;;  %v4373_v32 = vunpack.i.h.bf16 %v6378_v50  ;;  %v4372_v41 = vunpack.i.l.bf16 %v6378_v50 }
 0x13e   : > { %v4377_v25 = vunpack.i.l.bf16 %v6380_v4  ;;  %v6832_v7 = vsel %vm1484_vm5, %v6656_v58, %v4353_v23  ;;  %v6836_v5 = vsel %vm1484_vm5, %v6660_v54, %v4352_v27  ;;  %v4378_v11 = vunpack.i.h.bf16 %v6380_v4  ;;  %v9639_v23 = vld [vmem:[#allocation48_spill] sm:$0xff] }
 0x13f   : > { %v4383_v31 = vunpack.i.h.bf16 %v6386_v29  ;;  %v6842_v6 = vsel %vm1484_vm5, %v6670_v22, %v4357_v35  ;;  %v6846_v50 = vsel %vm1484_vm5, %v6666_v33, %v4358_v37  ;;  %v4382_v51 = vunpack.i.l.bf16 %v6386_v29  ;;  %v9640_v35 = vld [vmem:[#allocation49_spill] sm:$0xff] }
 0x140   : > { %v6822_v52 = vpop.permute.xlu1 %4640  ;;  %v6828_v3 = vpop.permute.xlu0 %4645  ;;  %v4387_v58 = vunpack.i.l.bf16 %v6388_v60  ;;  %v6852_v54 = vsel %vm1484_vm5, %v6676_v40, %v4363_v44  ;;  %v6856_v4 = vsel %vm1484_vm5, %v6680_v2, %v4362_v53  ;;  %v6860_v22 = vsel %vm1484_vm5, %v6691_v61, %v4367_v17 }
 0x141   : > { %v4388_v16 = vunpack.i.h.bf16 %v6388_v60  ;;  %v6867_v29 = vsel %vm1484_vm5, %v6684_v26, %v4368_v36  ;;  %v6871_v40 = vsel %vm1484_vm5, %v6695_v12, %v4373_v32  ;;  %v6875_v2 = vsel %vm1484_vm5, %v6699_v38, %v4372_v41  ;;  %v9641_v36 = vld [vmem:[#allocation50_spill] sm:$0xff] }
 0x142   : > { %v6879_v61 = vsel %vm1484_vm5, %v6709_v19, %v4377_v25  ;;  %v6885_v60 = vsel %vm1484_vm5, %v6703_v9, %v4378_v11  ;;  %v6889_v26 = vsel %vm1484_vm5, %v6713_v47, %v4383_v31  ;;  %v4393_v12 = vunpack.i.h.bf16 %v6394_v8 }
 0x143   : > { %v4392_v43 = vunpack.i.l.bf16 %v6394_v8  ;;  %v6895_v38 = vsel %vm1484_vm5, %v6719_v49, %v4382_v51  ;;  %v6899_v19 = vsel %vm1484_vm5, %v6729_v10, %v4387_v58  ;;  %v4398_v27 = vunpack.i.h.bf16 %v9639_v23 }
 0x144   : > { %v6863_v33 = vpop.permute.xlu1 %4650  ;;  %v6881_v45 = vpop.permute.xlu0 %4655  ;;  %v4397_v9 = vunpack.i.l.bf16 %v9639_v23  ;;  %v6905_v47 = vsel %vm1484_vm5, %v6723_v30, %v4388_v16  ;;  %v4403_v37 = vunpack.i.h.bf16 %v6402_v14  ;;  %v4402_v8 = vunpack.i.l.bf16 %v6402_v14 }
 0x145   : > { %v4407_v44 = vunpack.i.l.bf16 %v9640_v35  ;;  %v4408_v53 = vunpack.i.h.bf16 %v9640_v35  ;;  %v4413_v10 = vunpack.i.h.bf16 %v6410_v24  ;;  %v4412_v17 = vunpack.i.l.bf16 %v6410_v24  ;;  %v9647_v35 = vld [vmem:[#allocation55_spill] sm:$0xff] }
 0x146   : > { %v4417_v32 = vunpack.i.l.bf16 %v9641_v36  ;;  %v6920_v30 = vsel %vm1484_vm5, %v6744_v1, %v4393_v12  ;;  %v6924_v14 = vsel %vm1484_vm5, %v6748_v39, %v4392_v43  ;;  %v4418_v25 = vunpack.i.h.bf16 %v9641_v36  ;;  %v9644_v1 = vld [vmem:[#allocation52_spill] sm:$0xff]  ;;  %v9649_v36 = vld [vmem:[#allocation57_spill] sm:$0xff] }
 0x147   : > { %9642 = vst [vmem:[#allocation14_spill] sm:$0xff] %v6920_v30  ;;  %9643 = vst [vmem:[#allocation17_spill] sm:$0xff] %v6924_v14  ;;  %v4422_v11 = vunpack.i.l.bf16 %v6422_v20  ;;  %v6930_v31 = vsel %vm1517_vm6, %v6758_v46, %v4397_v9  ;;  %v6934_v24 = vsel %vm1517_vm6, %v6754_v55, %v4398_v27  ;;  %v4423_v51 = vunpack.i.h.bf16 %v6422_v20  ;;  %v9663_v14 = vld [vmem:[#allocation67_spill] sm:$0xff] }
 0x148   : > { %v6910_v49 = vpop.permute.xlu1 %4660  ;;  %v6916_v41 = vpop.permute.xlu0 %4665  ;;  %v4427_v58 = vunpack.i.l.bf16 %v9644_v1  ;;  %v6940_v39 = vsel %vm1517_vm6, %v6764_v21, %v4402_v8  ;;  %v6944_v16 = vsel %vm1517_vm6, %v6768_v48, %v4403_v37  ;;  %v6948_v46 = vsel %vm1517_vm6, %v6779_v34, %v4407_v44  ;;  %v9646_v37 = vld [vmem:[#allocation54_spill] sm:$0xff] }
 0x149   : > { %v4428_v12 = vunpack.i.h.bf16 %v9644_v1  ;;  %v6955_v20 = vsel %vm1517_vm6, %v6772_v56, %v4408_v53  ;;  %v6959_v21 = vsel %vm1517_vm6, %v6787_v18, %v4412_v17  ;;  %v6963_v48 = vsel %vm1517_vm6, %v6783_v62, %v4413_v10  ;;  %v9645_v18 = vld [vmem:[#allocation53_spill] sm:$0xff]  ;;  %v9648_v10 = vld [vmem:[#allocation56_spill] sm:$0xff] }
 0x14a   : > { %v6967_v34 = vsel %vm1517_vm6, %v6791_v42, %v4417_v32  ;;  %v6973_v23 = vsel %vm1517_vm6, %v6797_v13, %v4418_v25  ;;  %v6977_v56 = vsel %vm1517_vm6, %v6807_v28, %v4422_v11  ;;  %v4433_v27 = vunpack.i.h.bf16 %v9645_v18  ;;  %v9650_v11 = vld [vmem:[#allocation58_spill] sm:$0xff] }
 0x14b   : > { %v4432_v9 = vunpack.i.l.bf16 %v9645_v18  ;;  %v6983_v62 = vsel %vm1517_vm6, %v6801_v0, %v4423_v51  ;;  %v6987_v42 = vsel %vm1517_vm6, %v6811_v15, %v4427_v58  ;;  %v4438_v8 = vunpack.i.h.bf16 %v9646_v37  ;;  %v9651_v18 = vld [vmem:[#allocation59_spill] sm:$0xff] }
 0x14c   : > { %v6951_v55 = vpop.permute.xlu1 %4670  ;;  %v6969_v43 = vpop.permute.xlu0 %4675  ;;  %v4437_v13 = vunpack.i.l.bf16 %v9646_v37  ;;  %v6993_v28 = vsel %vm1517_vm6, %v6817_v59, %v4428_v12  ;;  %v4443_v44 = vunpack.i.h.bf16 %v9647_v35  ;;  %v4442_v53 = vunpack.i.l.bf16 %v9647_v35 }
 0x14d   : > { %v4447_v0 = vunpack.i.l.bf16 %v9648_v10  ;;  %v4448_v15 = vunpack.i.h.bf16 %v9648_v10  ;;  %v4453_v32 = vunpack.i.h.bf16 %v9649_v36  ;;  %v4452_v25 = vunpack.i.l.bf16 %v9649_v36 }
 0x14e   : > { %v4457_v51 = vunpack.i.l.bf16 %v9650_v11  ;;  %v7008_v59 = vsel %vm1517_vm6, %v6836_v5, %v4432_v9  ;;  %v7012_v58 = vsel %vm1517_vm6, %v6832_v7, %v4433_v27  ;;  %v4458_v12 = vunpack.i.h.bf16 %v9650_v11  ;;  %v9652_v5 = vld [vmem:[#allocation60_spill] sm:$0xff] }
 0x14f   : > { %v4462_v37 = vunpack.i.l.bf16 %v9651_v18  ;;  %v7018_v35 = vsel %vm1517_vm6, %v6842_v6, %v4437_v13  ;;  %v7022_v10 = vsel %vm1517_vm6, %v6846_v50, %v4438_v8  ;;  %v4463_v36 = vunpack.i.h.bf16 %v9651_v18  ;;  %v9657_v11 = vld [vmem:[#allocation64_spill] sm:$0xff]  ;;  %v9658_v18 = vld [vmem:[#allocation65_spill] sm:$0xff] }
 0x150   : > { %v6998_v17 = vpop.permute.xlu1 %4680  ;;  %v7004_v1 = vpop.permute.xlu0 %4685  ;;  %v4467_v9 = vunpack.i.l.bf16 %v9652_v5  ;;  %v7028_v7 = vsel %vm1517_vm6, %v6856_v4, %v4442_v53  ;;  %v7032_v27 = vsel %vm1517_vm6, %v6852_v54, %v4443_v44  ;;  %v7036_v6 = vsel %vm1517_vm6, %v6860_v22, %v4447_v0 }
 0x151   : > { %v4468_v13 = vunpack.i.h.bf16 %v9652_v5  ;;  %v7043_v8 = vsel %vm1517_vm6, %v6867_v29, %v4448_v15  ;;  %v7047_v4 = vsel %vm1517_vm6, %v6875_v2, %v4452_v25  ;;  %v7051_v54 = vsel %vm1517_vm6, %v6871_v40, %v4453_v32  ;;  %v9655_v2 = vld [vmem:[#allocation62_spill] sm:$0xff]  ;;  %v9656_v32 = vld [vmem:[#allocation63_spill] sm:$0xff] }
 0x152   : > { %v7055_v22 = vsel %vm1517_vm6, %v6879_v61, %v4457_v51  ;;  %v7061_v53 = vsel %vm1517_vm6, %v6885_v60, %v4458_v12  ;;  %v7065_v29 = vsel %vm1517_vm6, %v6895_v38, %v4462_v37  ;;  %v4478_v0 = vunpack.i.h.bf16 %v9655_v2 }
 0x153   : > { %v4477_v15 = vunpack.i.l.bf16 %v9655_v2  ;;  %v7071_v40 = vsel %vm1517_vm6, %v6889_v26, %v4463_v36  ;;  %v7075_v61 = vsel %vm1517_vm6, %v6899_v19, %v4467_v9  ;;  %v4483_v25 = vunpack.i.h.bf16 %v9656_v32  ;;  %v9661_v2 = vld [vmem:[#allocation66_spill] sm:$0xff] }
 0x154   : > { %v7039_v50 = vpop.permute.xlu1 %4690  ;;  %v7057_v44 = vpop.permute.xlu0 %4695  ;;  %v4482_v60 = vunpack.i.l.bf16 %v9656_v32  ;;  %v7081_v38 = vsel %vm1517_vm6, %v6905_v47, %v4468_v13  ;;  %v4488_v51 = vunpack.i.h.bf16 %v9657_v11  ;;  %v4487_v12 = vunpack.i.l.bf16 %v9657_v11 }
 0x155   : > { %9653 = vst [vmem:[#allocation20_spill] sm:$0xff] %v7039_v50  ;;  %9654 = vst [vmem:[#allocation23_spill] sm:$0xff] %v7057_v44  ;;  %v4492_v37 = vunpack.i.l.bf16 %v9658_v18  ;;  %v4493_v9 = vunpack.i.h.bf16 %v9658_v18  ;;  %v4497_v32 = vunpack.i.l.bf16 %v9661_v2  ;;  %v7096_v47 = vsel %vm1550_vm7, %v6930_v31, %v4477_v15  ;;  %v9664_v31 = vld [vmem:[#allocation68_spill] sm:$0xff] }
 0x156   : > { %v7100_v13 = vsel %vm1550_vm7, %v6934_v24, %v4478_v0  ;;  %v4498_v11 = vunpack.i.h.bf16 %v9661_v2  ;;  %v4502_v5 = vunpack.i.l.bf16 %v9663_v14  ;;  %v7106_v19 = vsel %vm1550_vm7, %v6940_v39, %v4482_v60 }
 0x157   : > { %v7110_v18 = vsel %vm1550_vm7, %v6944_v16, %v4483_v25  ;;  %v4503_v36 = vunpack.i.h.bf16 %v9663_v14  ;;  %v4507_v15 = vunpack.i.l.bf16 %v9664_v31  ;;  %v7116_v24 = vsel %vm1550_vm7, %v6948_v46, %v4487_v12  ;;  %v9666_v25 = vld [vmem:[#allocation69_spill] sm:$0xff] }
 0x158   : > { %v7086_v26 = vpop.permute.xlu1 %4700  ;;  %v7092_v30 = vpop.permute.xlu0 %4705  ;;  %v7120_v0 = vsel %vm1550_vm7, %v6955_v20, %v4488_v51  ;;  %v7124_v39 = vsel %vm1550_vm7, %v6959_v21, %v4492_v37  ;;  %v4508_v60 = vunpack.i.h.bf16 %v9664_v31  ;;  %v7131_v14 = vsel %vm1550_vm7, %v6963_v48, %v4493_v9  ;;  %v9667_v48 = vld [vmem:[#allocation70_spill] sm:$0xff]  ;;  %v9668_v31 = vld [vmem:[#allocation71_spill] sm:$0xff] }
 0x159   : > { %9659 = vst [vmem:[#allocation18_spill] sm:$0xff] %v7086_v26  ;;  %9662 = vst [vmem:[#allocation19_spill] sm:$0xff] %v7092_v30  ;;  %v7135_v46 = vsel %vm1550_vm7, %v6967_v34, %v4497_v32  ;;  %v4513_v12 = vunpack.i.h.bf16 %v9666_v25  ;;  %v4512_v20 = vunpack.i.l.bf16 %v9666_v25  ;;  %v7143_v21 = vsel %vm1550_vm7, %v6973_v23, %v4498_v11 }
 0x15a   : > { %v7147_v37 = vsel %vm1550_vm7, %v6977_v56, %v4502_v5  ;;  %v4518_v9 = vunpack.i.h.bf16 %v9667_v48  ;;  %v4517_v2 = vunpack.i.l.bf16 %v9667_v48  ;;  %v7153_v34 = vsel %vm1550_vm7, %v6983_v62, %v4503_v36  ;;  %v9669_v5 = vld [vmem:[#allocation72_spill] sm:$0xff] }
 0x15b   : > { %v7157_v32 = vsel %vm1550_vm7, %v6987_v42, %v4507_v15  ;;  %v4523_v23 = vunpack.i.h.bf16 %v9668_v31  ;;  %v4522_v11 = vunpack.i.l.bf16 %v9668_v31  ;;  %v7163_v56 = vsel %vm1550_vm7, %v6993_v28, %v4508_v60  ;;  %v9671_v28 = vld [vmem:[#allocation74_spill] sm:$0xff] }
 0x15c   : > { %v7127_v16 = vpop.permute.xlu1 %4710  ;;  %v7139_v51 = vpop.permute.xlu0 %4715  ;;  %v4528_v25 = vunpack.i.h.bf16 %v9669_v5  ;;  %v4527_v48 = vunpack.i.l.bf16 %v9669_v5  ;;  %v7172_v42 = vsel %vm1550_vm7, %v7008_v59, %v4512_v20  ;;  %v7176_v36 = vsel %vm1550_vm7, %v7012_v58, %v4513_v12  ;;  %v9672_v20 = vld [vmem:[#allocation75_spill] sm:$0xff] }
 0x15d   : > { %9665 = vst [vmem:[#allocation26_spill] sm:$0xff] %v7127_v16  ;;  %v9670_v16 = vld [vmem:[#allocation73_spill] sm:$0xff]  ;;  %v4537_v60 = vunpack.i.l.bf16 %v9671_v28  ;;  %v7184_v5 = vsel %vm1550_vm7, %v7018_v35, %v4517_v2  ;;  %v7188_v30 = vsel %vm1550_vm7, %v7022_v10, %v4518_v9  ;;  %v4538_v59 = vunpack.i.h.bf16 %v9671_v28  ;;  %v9673_v35 = vld [vmem:[#allocation76_spill] sm:$0xff] }
 0x15e   : > { %v4532_v57 = vunpack.i.l.bf16 %v9670_v16  ;;  %v4533_v15 = vunpack.i.h.bf16 %v9670_v16  ;;  %v4542_v26 = vunpack.i.l.bf16 %v9672_v20  ;;  %v7194_v58 = vsel %vm1550_vm7, %v7028_v7, %v4522_v11 }
 0x15f   : > { %v7198_v16 = vsel %vm1550_vm7, %v7032_v27, %v4523_v23  ;;  %v4543_v12 = vunpack.i.h.bf16 %v9672_v20  ;;  %v4547_v2 = vunpack.i.l.bf16 %v9673_v35  ;;  %v7204_v10 = vsel %vm1550_vm7, %v7036_v6, %v4527_v48  ;;  %v9675_v48 = vld [vmem:[#allocation78_spill] sm:$0xff] }
 0x160   : > { %v7168_v62 = vpop.permute.xlu1 %4720  ;;  %v7180_v31 = vpop.permute.xlu0 %4725  ;;  %v7208_v9 = vsel %vm1550_vm7, %v7043_v8, %v4528_v25  ;;  %v7212_v7 = vsel %vm1550_vm7, %v7047_v4, %v4532_v57  ;;  %v4548_v11 = vunpack.i.h.bf16 %v9673_v35  ;;  %v7219_v23 = vsel %vm1550_vm7, %v7051_v54, %v4533_v15  ;;  %v9678_v54 = vld [vmem:[#allocation79_spill] sm:$0xff]  ;;  %v9681_v35 = vld [vmem:[#allocation80_spill] sm:$0xff] }
 0x161   : > { %v7223_v6 = vsel %vm1550_vm7, %v7055_v22, %v4537_v60  ;;  %v4558_v8 = vunpack.i.h.bf16 %v9675_v48  ;;  %v4557_v25 = vunpack.i.l.bf16 %v9675_v48  ;;  %v7231_v57 = vsel %vm1550_vm7, %v7061_v53, %v4538_v59 }
 0x162   : > { %9674 = vst [vmem:[#allocation21_spill] sm:$0xff] %v7223_v6  ;;  %9676 = vst [vmem:[#allocation22_spill] sm:$0xff] %v7231_v57  ;;  %v7235_v4 = vsel %vm1550_vm7, %v7065_v29, %v4542_v26  ;;  %v4563_v15 = vunpack.i.h.bf16 %v9678_v54  ;;  %v4562_v20 = vunpack.i.l.bf16 %v9678_v54  ;;  %v7241_v22 = vsel %vm1550_vm7, %v7071_v40, %v4543_v12 }
 0x163   : > { %9677 = vst [vmem:[#allocation29_spill] sm:$0xff] %v7235_v4  ;;  %9679 = vst [vmem:[#allocation24_spill] sm:$0xff] %v7241_v22  ;;  %v7245_v60 = vsel %vm1550_vm7, %v7075_v61, %v4547_v2  ;;  %v4568_v48 = vunpack.i.h.bf16 %v9681_v35  ;;  %v4567_v53 = vunpack.i.l.bf16 %v9681_v35  ;;  %v7251_v29 = vsel %vm1550_vm7, %v7081_v38, %v4548_v11  ;;  %v9684_v4 = vld [vmem:[#allocation81_spill] sm:$0xff]  ;;  %v9685_v35 = vld [vmem:[#allocation82_spill] sm:$0xff] }
 0x164   : > { %v7215_v27 = vpop.permute.xlu1 %4730  ;;  %v7227_v28 = vpop.permute.xlu0 %4735  ;;  %9680 = vst [vmem:[#allocation25_spill] sm:$0xff] %v7245_v60  ;;  %9682 = vst [vmem:[#allocation27_spill] sm:$0xff] %v7251_v29  ;;  %v4572_v57 = vunpack.i.l.bf16 %v9684_v4  ;;  %v1584_v61 = vsel %vm1583_vm8, %v7096_v47, %v4557_v25  ;;  %v1585_v12 = vsel %vm1583_vm8, %v7100_v13, %v4558_v8  ;;  %v4573_v2 = vunpack.i.h.bf16 %v9684_v4  ;;  %v9686_v29 = vld [vmem:[#allocation83_spill] sm:$0xff] }
 0x165   : > { %v4577_v38 = vunpack.i.l.bf16 %v9685_v35  ;;  %v1586_v59 = vsel %vm1583_vm8, %v7106_v19, %v4562_v20  ;;  %v1587_v54 = vsel %vm1583_vm8, %v7110_v18, %v4563_v15  ;;  %v4578_v26 = vunpack.i.h.bf16 %v9685_v35 }
 0x166   : > { %v4582_v47 = vunpack.i.l.bf16 %v9686_v29  ;;  %v1588_v13 = vsel %vm1583_vm8, %v7116_v24, %v4567_v53  ;;  %v1589_v8 = vsel %vm1583_vm8, %v7120_v0, %v4568_v48  ;;  %v4583_v25 = vunpack.i.h.bf16 %v9686_v29 }
 0x167   : > { %v4637_v4 = vunpack.i.l.bf16 %v6793_v63  ;;  %v7280_v19 = vsel %vm1583_vm8, %v7124_v39, %v4572_v57  ;;  %v4638_v18 = vunpack.i.h.bf16 %v6793_v63  ;;  %v4643_v15 = vunpack.i.h.bf16 %v6822_v52 }
 0x168   : > { %v7256_v40 = vpop.permute.xlu1 %4740  ;;  %v7264_v11 = vpop.permute.xlu0 %4745  ;;  %v4642_v20 = vunpack.i.l.bf16 %v6822_v52  ;;  %v7289_v24 = vsel %vm1583_vm8, %v7131_v14, %v4573_v2  ;;  %v7293_v0 = vsel %vm1583_vm8, %v7135_v46, %v4577_v38  ;;  %v4648_v39 = vunpack.i.h.bf16 %v6828_v3  ;;  %v9687_v14 = vld [vmem:[#allocation84_spill] sm:$0xff] }
 0x169   : > { %v4647_v57 = vunpack.i.l.bf16 %v6828_v3  ;;  %v7301_v52 = vsel %vm1583_vm8, %v7143_v21, %v4578_v26  ;;  %v7305_v48 = vsel %vm1583_vm8, %v7147_v37, %v4582_v47  ;;  %v4588_v53 = vunpack.i.h.bf16 %v9687_v14 }
 0x16a   : > { %v4587_v29 = vunpack.i.l.bf16 %v9687_v14  ;;  %v7311_v46 = vsel %vm1583_vm8, %v7153_v34, %v4583_v25  ;;  %v4718_v3 = vunpack.i.h.bf16 %v7139_v51  ;;  %v4717_v2 = vunpack.i.l.bf16 %v7139_v51 }
 0x16b   : > { %v1617_v38 = vsel %vm1616_vm9, %v1584_v61, %v4637_v4  ;;  %v1619_v21 = vsel %vm1616_vm9, %v1586_v59, %v4642_v20  ;;  %v1620_v26 = vsel %vm1616_vm9, %v1587_v54, %v4643_v15  ;;  %v4722_v37 = vunpack.i.l.bf16 %v7168_v62 }
 0x16c   : > { %v7285_v35 = vpop.permute.xlu1 %4750  ;;  %v7297_v63 = vpop.permute.xlu0 %4755  ;;  %v1618_v14 = vsel %vm1616_vm9, %v1585_v12, %v4638_v18  ;;  %v1621_v60 = vsel %vm1616_vm9, %v1588_v13, %v4647_v57  ;;  %v1622_v34 = vsel %vm1616_vm9, %v1589_v8, %v4648_v39  ;;  %v4653_v25 = vunpack.i.h.bf16 %v6863_v33 }
 0x16d   : > { %v4723_v51 = vunpack.i.h.bf16 %v7168_v62  ;;  %v4728_v61 = vunpack.i.h.bf16 %v7180_v31  ;;  %v4727_v59 = vunpack.i.l.bf16 %v7180_v31  ;;  %v4652_v15 = vunpack.i.l.bf16 %v6863_v33 }
 0x16e   : > { %v4658_v20 = vunpack.i.h.bf16 %v6881_v45  ;;  %v1650_v12 = vsel %vm1649_vm10, %v1617_v38, %v4717_v2  ;;  %v1651_v13 = vsel %vm1649_vm10, %v1618_v14, %v4718_v3  ;;  %v4657_v8 = vunpack.i.l.bf16 %v6881_v45 }
 0x16f   : > { %v1652_v18 = vsel %vm1649_vm10, %v1619_v21, %v4722_v37  ;;  %v1653_v31 = vsel %vm1649_vm10, %v1620_v26, %v4723_v51  ;;  %v1654_v50 = vsel %vm1649_vm10, %v1621_v60, %v4727_v59  ;;  %v1655_v2 = vsel %vm1649_vm10, %v1622_v34, %v4728_v61 }
 0x170   : > { %v7319_v47 = vpop.permute.xlu1 %4760  ;;  %v4766_v22 = vpop.permute.xlu0 %4765  ;;  %v4733_v45 = vunpack.i.h.bf16 %v7215_v27  ;;  %v4732_v21 = vunpack.i.l.bf16 %v7215_v27  ;;  %v4738_v26 = vunpack.i.h.bf16 %v7227_v28  ;;  %v4737_v61 = vunpack.i.l.bf16 %v7227_v28 }
 0x171   : > { %v4768_v54 = vunpack.i.h.bf16 %v4766_v22  ;;  %v4767_v4 = vunpack.i.l.bf16 %v4766_v22  ;;  %v1623_v28 = vsel %vm1616_vm9, %v7280_v19, %v4652_v15 }
 0x173   : > { %v1683_v39 = vsel %vm1682_vm11, %v1650_v12, %v4767_v4  ;;  %v1684_v57 = vsel %vm1682_vm11, %v1651_v13, %v4768_v54 }
 0x174   : > { %v4771_v62 = vpop.permute.xlu1 %4770  ;;  %v4776_v33 = vpop.permute.xlu0 %4775  ;;  %v1715_v44 = vpack.c.bf16 %v1684_v57, %v1683_v39  ;;  %v1624_v57 = vsel %vm1616_vm9, %v7289_v24, %v4653_v25 }
 0x175   : > { %v4773_v22 = vunpack.i.h.bf16 %v4771_v62  ;;  %v4772_v6 = vunpack.i.l.bf16 %v4771_v62  ;;  %v4778_v3 = vunpack.i.h.bf16 %v4776_v33  ;;  %v4777_v38 = vunpack.i.l.bf16 %v4776_v33  ;;  %v9689_v33 = vld [vmem:[#allocation10_spill] sm:$0xff] }
 0x176   : > { %4106 = vmatprep.mubr.msk.bf16.mxu0 %vm1751_vm12, %v1715_v44  ;;  %v1597_v44 = vsel %vm1583_vm8, %v7163_v56, %v4588_v53  ;;  %v1626_v56 = vsel %vm1616_vm9, %v7301_v52, %v4658_v20  ;;  %v1656_v53 = vsel %vm1649_vm10, %v1623_v28, %v4732_v21  ;;  %v4743_v21 = vunpack.i.h.bf16 %v7256_v40  ;;  %v9690_v28 = vld [vmem:[#allocation11_spill] sm:$0xff] }
 0x177   : > { %v1685_v37 = vsel %vm1682_vm11, %v1652_v18, %v4772_v6  ;;  %v1686_v14 = vsel %vm1682_vm11, %v1653_v31, %v4773_v22  ;;  %v1687_v51 = vsel %vm1682_vm11, %v1654_v50, %v4777_v38  ;;  %v1688_v60 = vsel %vm1682_vm11, %v1655_v2, %v4778_v3  ;;  %v9688_v50 = vld [vmem:[#allocation85_spill] sm:$0xff] }
 0x178   : > { %v4781_v59 = vpop.permute.xlu1 %4780  ;;  %v1716_v34 = vpack.c.bf16 %v1686_v14, %v1685_v37  ;;  %v4786_v12 = vpop.permute.xlu0 %4785  ;;  %v1717_v27 = vpack.c.bf16 %v1688_v60, %v1687_v51  ;;  %v1596_v6 = vsel %vm1583_vm8, %v7157_v32, %v4587_v29  ;;  %v4593_v62 = vunpack.i.h.bf16 %v9688_v50 }
 0x179   : > { %v4783_v54 = vunpack.i.h.bf16 %v4781_v59  ;;  %v4782_v4 = vunpack.i.l.bf16 %v4781_v59  ;;  %v4788_v13 = vunpack.i.h.bf16 %v4786_v12  ;;  %v4787_v18 = vunpack.i.l.bf16 %v4786_v12 }
 0x17a   : > { %4107 = vmatmul.mubr.msk.bf16.vlgmr.msra.gmra.mrb[0].mxu0 %vm1751_vm12, %v1716_v34  ;;  %v4592_v39 = vunpack.i.l.bf16 %v9688_v50  ;;  %v1625_v32 = vsel %vm1616_vm9, %v7293_v0, %v4657_v8  ;;  %v1657_v29 = vsel %vm1649_vm10, %v1624_v57, %v4733_v45  ;;  %v1659_v19 = vsel %vm1649_vm10, %v1626_v56, %v4738_v26 }
 0x17b   : > { %4110 = vmatprep.mubr.msk.bf16.mxu0 %vm1751_vm12, %v1717_v27  ;;  %v1658_v22 = vsel %vm1649_vm10, %v1625_v32, %v4737_v61  ;;  %v1689_v15 = vsel %vm1682_vm11, %v1656_v53, %v4782_v4  ;;  %v1690_v24 = vsel %vm1682_vm11, %v1657_v29, %v4783_v54  ;;  %v4598_v2 = vunpack.i.h.bf16 %v9689_v33 }
 0x17c   : > { %v4791_v31 = vpop.permute.xlu1 %4790  ;;  %v4796_v25 = vpop.permute.xlu0 %4795  ;;  %v4597_v0 = vunpack.i.l.bf16 %v9689_v33  ;;  %v1691_v52 = vsel %vm1682_vm11, %v1658_v22, %v4787_v18  ;;  %v1692_v20 = vsel %vm1682_vm11, %v1659_v19, %v4788_v13  ;;  %v4663_v8 = vunpack.i.h.bf16 %v6910_v49 }
 0x17d   : > { %v4662_v3 = vunpack.i.l.bf16 %v6910_v49  ;;  %v4668_v38 = vunpack.i.h.bf16 %v6916_v41  ;;  %v4667_v45 = vunpack.i.l.bf16 %v6916_v41  ;;  %v4742_v37 = vunpack.i.l.bf16 %v7256_v40 }
 0x17e   : > { %v4748_v14 = vunpack.i.h.bf16 %v7264_v11  ;;  %v1718_v51 = vpack.c.bf16 %v1690_v24, %v1689_v15  ;;  %v4747_v60 = vunpack.i.l.bf16 %v7264_v11  ;;  %v4793_v59 = vunpack.i.h.bf16 %v4791_v31 }
 0x17f   : > { %v4792_v34 = vunpack.i.l.bf16 %v4791_v31  ;;  %v1719_v49 = vpack.c.bf16 %v1692_v20, %v1691_v52  ;;  %v1598_v54 = vsel %vm1583_vm8, %v7172_v42, %v4592_v39  ;;  %v1599_v41 = vsel %vm1583_vm8, %v7176_v36, %v4593_v62  ;;  %v9691_v20 = vld [vmem:[#allocation12_spill] sm:$0xff] }
 0x180   : > { %v7381_v26 = vpop.permute.xlu1 %4800  ;;  %v7384_v61 = vpop.permute.xlu0 %4805  ;;  %v4798_v4 = vunpack.i.h.bf16 %v4796_v25  ;;  %v4797_v40 = vunpack.i.l.bf16 %v4796_v25  ;;  %v1600_v12 = vsel %vm1583_vm8, %v7184_v5, %v4597_v0  ;;  %v1601_v11 = vsel %vm1583_vm8, %v7188_v30, %v4598_v2 }
 0x181   : > { %v1627_v27 = vsel %vm1616_vm9, %v7305_v48, %v4662_v3  ;;  %v1628_v13 = vsel %vm1616_vm9, %v7311_v46, %v4663_v8  ;;  %v1629_v42 = vsel %vm1616_vm9, %v1596_v6, %v4667_v45  ;;  %v1630_v36 = vsel %vm1616_vm9, %v1597_v44, %v4668_v38 }
 0x182   : > { %4111 = vmatmul.mubr.msk.bf16.gmra.mrb[4].mxu0 %vm1751_vm12, %v1718_v51  ;;  %v1660_v18 = vsel %vm1649_vm10, %v1627_v27, %v4742_v37  ;;  %v1661_v50 = vsel %vm1649_vm10, %v1628_v13, %v4743_v21  ;;  %v1662_v30 = vsel %vm1649_vm10, %v1629_v42, %v4747_v60  ;;  %v1663_v62 = vsel %vm1649_vm10, %v1630_v36, %v4748_v14 }
 0x183   : > { %4114 = vmatprep.mubr.msk.bf16.mxu0 %vm1751_vm12, %v1719_v49  ;;  %v1693_v48 = vsel %vm1682_vm11, %v1660_v18, %v4792_v34  ;;  %v1694_v46 = vsel %vm1682_vm11, %v1661_v50, %v4793_v59  ;;  %v4603_v6 = vunpack.i.h.bf16 %v9690_v28  ;;  %v4602_v44 = vunpack.i.l.bf16 %v9690_v28 }
 0x184   : > { %v7404_v5 = vpop.permute.xlu1 %4810  ;;  %v7410_v39 = vpop.permute.xlu0 %4815  ;;  %v1695_v57 = vsel %vm1682_vm11, %v1662_v30, %v4797_v40  ;;  %v1696_v32 = vsel %vm1682_vm11, %v1663_v62, %v4798_v4  ;;  %v4673_v56 = vunpack.i.h.bf16 %v6951_v55  ;;  %v4672_v53 = vunpack.i.l.bf16 %v6951_v55  ;;  %v9692_v62 = vld [vmem:[#allocation8_spill] sm:$0xff] }
 0x185   : > { %v4678_v29 = vunpack.i.h.bf16 %v6969_v43  ;;  %v4677_v31 = vunpack.i.l.bf16 %v6969_v43  ;;  %v4753_v22 = vunpack.i.h.bf16 %v7285_v35  ;;  %v4752_v19 = vunpack.i.l.bf16 %v7285_v35 }
 0x186   : > { %v4758_v15 = vunpack.i.h.bf16 %v7297_v63  ;;  %v1720_v25 = vpack.c.bf16 %v1694_v46, %v1693_v48  ;;  %v4757_v33 = vunpack.i.l.bf16 %v7297_v63  ;;  %v4803_v2 = vunpack.i.h.bf16 %v7381_v26 }
 0x187   : > { %v4802_v0 = vunpack.i.l.bf16 %v7381_v26  ;;  %v1721_v52 = vpack.c.bf16 %v1696_v32, %v1695_v57  ;;  %v4608_v43 = vunpack.i.h.bf16 %v9691_v20  ;;  %v4607_v8 = vunpack.i.l.bf16 %v9691_v20 }
 0x188   : > { %v7423_v24 = vpop.permute.xlu1 %4820  ;;  %v7428_v55 = vpop.permute.xlu0 %4825  ;;  %v4808_v35 = vunpack.i.h.bf16 %v7384_v61  ;;  %v4807_v3 = vunpack.i.l.bf16 %v7384_v61  ;;  %v1602_v63 = vsel %vm1583_vm8, %v7194_v58, %v4602_v44  ;;  %v1603_v38 = vsel %vm1583_vm8, %v7198_v16, %v4603_v6 }
 0x189   : > { %v1631_v45 = vsel %vm1616_vm9, %v1598_v54, %v4672_v53  ;;  %v1632_v21 = vsel %vm1616_vm9, %v1599_v41, %v4673_v56  ;;  %v1633_v37 = vsel %vm1616_vm9, %v1600_v12, %v4677_v31  ;;  %v1634_v14 = vsel %vm1616_vm9, %v1601_v11, %v4678_v29 }
 0x18a   : > { %4115 = vmatmul.mubr.msk.bf16.gmra.mrb[8].mxu0 %vm1751_vm12, %v1720_v25  ;;  %v1664_v26 = vsel %vm1649_vm10, %v1631_v45, %v4752_v19  ;;  %v1665_v51 = vsel %vm1649_vm10, %v1632_v21, %v4753_v22  ;;  %v1666_v60 = vsel %vm1649_vm10, %v1633_v37, %v4757_v33  ;;  %v1667_v58 = vsel %vm1649_vm10, %v1634_v14, %v4758_v15 }
 0x18b   : > { %4118 = vmatprep.mubr.msk.bf16.mxu0 %vm1751_vm12, %v1721_v52  ;;  %v1697_v16 = vsel %vm1682_vm11, %v1664_v26, %v4802_v0  ;;  %v1698_v59 = vsel %vm1682_vm11, %v1665_v51, %v4803_v2  ;;  %v1604_v61 = vsel %vm1583_vm8, %v7204_v10, %v4607_v8  ;;  %v1605_v49 = vsel %vm1583_vm8, %v7208_v9, %v4608_v43  ;;  %v9695_v43 = vld [vmem:[#allocation23_spill] sm:$0xff]  ;;  %v9696_v26 = vld [vmem:[#allocation21_spill] sm:$0xff] }
 0x18c   : > { %v7450_v34 = vpop.permute.xlu0 %4835  ;;  %v1699_v54 = vsel %vm1682_vm11, %v1666_v60, %v4807_v3  ;;  %v1700_v41 = vsel %vm1682_vm11, %v1667_v58, %v4808_v35  ;;  %v7458_v4 = vpop.permute.xlu1 %4830  ;;  %v4683_v40 = vunpack.i.h.bf16 %v6998_v17  ;;  %v4682_v12 = vunpack.i.l.bf16 %v6998_v17  ;;  %v9697_v60 = vld [vmem:[#allocation22_spill] sm:$0xff] }
 0x18d   : > { %v4688_v11 = vunpack.i.h.bf16 %v7004_v1  ;;  %v4687_v27 = vunpack.i.l.bf16 %v7004_v1  ;;  %v4763_v13 = vunpack.i.h.bf16 %v7319_v47  ;;  %v4762_v10 = vunpack.i.l.bf16 %v7319_v47  ;;  %v9693_v47 = vld [vmem:[#allocation13_spill] sm:$0xff] }
 0x18e   : > { %v4813_v9 = vunpack.i.h.bf16 %v7404_v5  ;;  %v1722_v42 = vpack.c.bf16 %v1698_v59, %v1697_v16  ;;  %v4812_v36 = vunpack.i.l.bf16 %v7404_v5  ;;  %v4818_v18 = vunpack.i.h.bf16 %v7410_v39 }
 0x18f   : > { %v4817_v50 = vunpack.i.l.bf16 %v7410_v39  ;;  %v1723_v30 = vpack.c.bf16 %v1700_v41, %v1699_v54  ;;  %v4613_v17 = vunpack.i.h.bf16 %v9692_v62  ;;  %v4612_v48 = vunpack.i.l.bf16 %v9692_v62  ;;  %v9700_v62 = vld [vmem:[#allocation18_spill] sm:$0xff] }
 0x190   : > { %v4828_v1 = vunpack.i.h.bf16 %v7428_v55  ;;  %v4827_v46 = vunpack.i.l.bf16 %v7428_v55  ;;  %v4618_v28 = vunpack.i.h.bf16 %v9693_v47  ;;  %v4617_v6 = vunpack.i.l.bf16 %v9693_v47  ;;  %v4846_v39 = vpop.permute.xlu0 %4845  ;;  %v7484_v29 = vpop.permute.xlu1 %4840  ;;  %v9694_v55 = vld [vmem:[#allocation20_spill] sm:$0xff] }
 0x191   : > { %v1635_v5 = vsel %vm1616_vm9, %v1602_v63, %v4682_v12  ;;  %v1636_v44 = vsel %vm1616_vm9, %v1603_v38, %v4683_v40  ;;  %v1637_v57 = vsel %vm1616_vm9, %v1604_v61, %v4687_v27  ;;  %v1638_v32 = vsel %vm1616_vm9, %v1605_v49, %v4688_v11  ;;  %v9698_v61 = vld [vmem:[#allocation15_spill] sm:$0xff] }
 0x192   : > { %4119 = vmatmul.mubr.msk.bf16.gmra.mrb[12].mxu0 %vm1751_vm12, %v1722_v42  ;;  %v1668_v56 = vsel %vm1649_vm10, %v1635_v5, %v4762_v10  ;;  %v1669_v53 = vsel %vm1649_vm10, %v1636_v44, %v4763_v13  ;;  %v1670_v19 = vsel %vm1649_vm10, %v1637_v57, %v4817_v50  ;;  %v1671_v15 = vsel %vm1649_vm10, %v1638_v32, %v4818_v18  ;;  %v9699_v42 = vld [vmem:[#allocation9_spill] sm:$0xff] }
 0x193   : > { %4122 = vmatprep.mubr.msk.bf16.mxu0 %vm1751_vm12, %v1723_v30  ;;  %v1701_v31 = vsel %vm1682_vm11, %v1668_v56, %v4812_v36  ;;  %v1702_v22 = vsel %vm1682_vm11, %v1669_v53, %v4813_v9  ;;  %v1606_v25 = vsel %vm1583_vm8, %v7212_v7, %v4612_v48  ;;  %v1607_v33 = vsel %vm1583_vm8, %v7219_v23, %v4613_v17 }
 0x194   : > { %v1703_v2 = vsel %vm1682_vm11, %v1670_v19, %v4827_v46  ;;  %v1704_v0 = vsel %vm1682_vm11, %v1671_v15, %v4828_v1  ;;  %v4693_v52 = vunpack.i.h.bf16 %v9694_v55  ;;  %v4692_v20 = vunpack.i.l.bf16 %v9694_v55  ;;  %v4856_v37 = vpop.permute.xlu0 %4855  ;;  %v9701_v1 = vld [vmem:[#allocation19_spill] sm:$0xff]  ;;  %v9703_v15 = vld [vmem:[#allocation24_spill] sm:$0xff] }
 0x195   : > { %v4698_v8 = vunpack.i.h.bf16 %v9695_v43  ;;  %v4697_v35 = vunpack.i.l.bf16 %v9695_v43  ;;  %v4823_v3 = vunpack.i.h.bf16 %v7423_v24  ;;  %v4822_v63 = vunpack.i.l.bf16 %v7423_v24  ;;  %v4851_v24 = vpop.permute.xlu1 %4850  ;;  %v9705_v55 = vld [vmem:[#allocation27_spill] sm:$0xff] }
 0x196   : > { %v4833_v7 = vunpack.i.h.bf16 %v7458_v4  ;;  %v1724_v38 = vpack.c.bf16 %v1702_v22, %v1701_v31  ;;  %v4832_v23 = vunpack.i.l.bf16 %v7458_v4  ;;  %v4838_v45 = vunpack.i.h.bf16 %v7450_v34  ;;  %v9702_v22 = vld [vmem:[#allocation29_spill] sm:$0xff] }
 0x197   : > { %v4837_v21 = vunpack.i.l.bf16 %v7450_v34  ;;  %v1725_v14 = vpack.c.bf16 %v1704_v0, %v1703_v2  ;;  %v1608_v51 = vsel %vm1583_vm8, %v9696_v26, %v4617_v6  ;;  %v1609_v58 = vsel %vm1583_vm8, %v9697_v60, %v4618_v28  ;;  %v9704_v0 = vld [vmem:[#allocation25_spill] sm:$0xff] }
 0x198   : > { %v4848_v16 = vunpack.i.h.bf16 %v4846_v39  ;;  %v4847_v59 = vunpack.i.l.bf16 %v4846_v39  ;;  %v4623_v49 = vunpack.i.h.bf16 %v9698_v61  ;;  %v4622_v54 = vunpack.i.l.bf16 %v9698_v61  ;;  %v4866_v28 = vpop.permute.xlu0 %4865 }
 0x199   : > { %v1639_v41 = vsel %vm1616_vm9, %v1606_v25, %v4692_v20  ;;  %v1640_v34 = vsel %vm1616_vm9, %v1607_v33, %v4693_v52  ;;  %v1641_v4 = vsel %vm1616_vm9, %v1608_v51, %v4697_v35  ;;  %v1642_v40 = vsel %vm1616_vm9, %v1609_v58, %v4698_v8  ;;  %v4861_v39 = vpop.permute.xlu1 %4860  ;;  %v9707_v58 = vld [vmem:[#allocation61_spill] sm:$0xff] }
 0x19a   : > { %4123 = vmatmul.mubr.msk.bf16.gmra.mrb[16].mxu0 %vm1751_vm12, %v1724_v38  ;;  %v1672_v12 = vsel %vm1649_vm10, %v1639_v41, %v4822_v63  ;;  %v1673_v11 = vsel %vm1649_vm10, %v1640_v34, %v4823_v3  ;;  %v1674_v10 = vsel %vm1649_vm10, %v1641_v4, %v4837_v21  ;;  %v1675_v9 = vsel %vm1649_vm10, %v1642_v40, %v4838_v45  ;;  %v9706_v21 = vld [vmem:[#allocation16_spill] sm:$0xff]  ;;  %v9712_v41 = vld [vmem:[#allocation26_spill] sm:$0xff]  ;;  %v9713_v40 = vld [vmem:[#allocation77_spill] sm:$0xff] }
 0x19b   : > { %4126 = vmatprep.mubr.msk.bf16.mxu0 %vm1751_vm12, %v1725_v14  ;;  %v1705_v27 = vsel %vm1682_vm11, %v1672_v12, %v4832_v23  ;;  %v1706_v13 = vsel %vm1682_vm11, %v1673_v11, %v4833_v7  ;;  %v4628_v36 = vunpack.i.h.bf16 %v9699_v42  ;;  %v4627_v18 = vunpack.i.l.bf16 %v9699_v42 }
 0x19c   : > { %v1707_v50 = vsel %vm1682_vm11, %v1674_v10, %v4847_v59  ;;  %v1708_v30 = vsel %vm1682_vm11, %v1675_v9, %v4848_v16  ;;  %v4703_v17 = vunpack.i.h.bf16 %v9700_v62  ;;  %v4702_v48 = vunpack.i.l.bf16 %v9700_v62  ;;  %v9709_v59 = vld [vmem:[#allocation17_spill] sm:$0xff] }
 0x19d   : > { %v4708_v46 = vunpack.i.h.bf16 %v9701_v1  ;;  %v4707_v47 = vunpack.i.l.bf16 %v9701_v1  ;;  %v4843_v6 = vunpack.i.h.bf16 %v7484_v29  ;;  %v4842_v5 = vunpack.i.l.bf16 %v7484_v29  ;;  %v4871_v60 = vpop.permute.xlu1 %4870 }
 0x19e   : > { %v4853_v44 = vunpack.i.h.bf16 %v4851_v24  ;;  %v1726_v57 = vpack.c.bf16 %v1706_v13, %v1705_v27  ;;  %v4852_v32 = vunpack.i.l.bf16 %v4851_v24  ;;  %v4858_v56 = vunpack.i.h.bf16 %v4856_v37 }
 0x19f   : > { %v4857_v53 = vunpack.i.l.bf16 %v4856_v37  ;;  %v1727_v31 = vpack.c.bf16 %v1708_v30, %v1707_v50  ;;  %v1610_v19 = vsel %vm1583_vm8, %v9702_v22, %v4622_v54  ;;  %v1611_v25 = vsel %vm1583_vm8, %v9703_v15, %v4623_v49  ;;  %v9711_v49 = vld [vmem:[#allocation14_spill] sm:$0xff] }
 0x1a0   : > { %v4868_v33 = vunpack.i.h.bf16 %v4866_v28  ;;  %v4867_v2 = vunpack.i.l.bf16 %v4866_v28  ;;  %v1612_v29 = vsel %vm1583_vm8, %v9704_v0, %v4627_v18  ;;  %v1613_v52 = vsel %vm1583_vm8, %v9705_v55, %v4628_v36 }
 0x1a1   : > { %v1643_v20 = vsel %vm1616_vm9, %v1610_v19, %v4702_v48  ;;  %v1644_v43 = vsel %vm1616_vm9, %v1611_v25, %v4703_v17  ;;  %v1645_v8 = vsel %vm1616_vm9, %v1612_v29, %v4707_v47  ;;  %v1646_v35 = vsel %vm1616_vm9, %v1613_v52, %v4708_v46 }
 0x1a2   : > { %4127 = vmatmul.mubr.msk.bf16.gmra.mrb[20].mxu0 %vm1751_vm12, %v1726_v57  ;;  %v1676_v3 = vsel %vm1649_vm10, %v1643_v20, %v4842_v5  ;;  %v1677_v63 = vsel %vm1649_vm10, %v1644_v43, %v4843_v6  ;;  %v1678_v23 = vsel %vm1649_vm10, %v1645_v8, %v4857_v53  ;;  %v1679_v45 = vsel %vm1649_vm10, %v1646_v35, %v4858_v56  ;;  %v9716_v5 = vld [vmem:[#allocation7_spill] sm:$0xff] }
 0x1a3   : > { %4130 = vmatprep.mubr.msk.bf16.mxu0 %vm1751_vm12, %v1727_v31  ;;  %v1709_v7 = vsel %vm1682_vm11, %v1676_v3, %v4852_v32  ;;  %v1710_v38 = vsel %vm1682_vm11, %v1677_v63, %v4853_v44  ;;  %v4633_v37 = vunpack.i.h.bf16 %v9706_v21  ;;  %v4632_v14 = vunpack.i.l.bf16 %v9706_v21  ;;  %4875 = vrot.lane.b32.xlu0 %v9716_v5, %s5588_s19  ;;  %v9717_v44 = vld [vmem:[#allocation45_spill] sm:$0xff] }
 0x1a4   : > { %v1711_v26 = vsel %vm1682_vm11, %v1678_v23, %v4867_v2  ;;  %v1712_v51 = vsel %vm1682_vm11, %v1679_v45, %v4868_v33  ;;  %v9708_v16 = vunpack.i.l.bf16 %v9707_v58  ;;  %v9710_v61 = vunpack.i.h.bf16 %v9707_v58  ;;  %v7597_v32 = vld [vmem:[%s9267_s3] ss:$0 sm:$0xff] }
 0x1a5   : > { %v4713_v34 = vunpack.i.h.bf16 %v9712_v41  ;;  %v4712_v4 = vunpack.i.l.bf16 %v9712_v41  ;;  %v9714_v12 = vunpack.i.l.bf16 %v9713_v40  ;;  %v4863_v27 = vunpack.i.h.bf16 %v4861_v39 }
 0x1a6   : > { %v1548_v24 = vsel %vm1517_vm6, %v9709_v59, %v9708_v16  ;;  %v1549_v54 = vsel %vm1517_vm6, %v9711_v49, %v9710_v61  ;;  %v4862_v13 = vunpack.i.l.bf16 %v4861_v39  ;;  %v1728_v10 = vpack.c.bf16 %v1710_v38, %v1709_v7  ;;  %v7592_v39 = vld [vmem:[%s9266_s2] ss:$0 sm:$0xff] }
 0x1a7   : > { %v1581_v11 = vsel %vm1550_vm7, %v1548_v24, %v9714_v12  ;;  %v9715_v9 = vunpack.i.h.bf16 %v9713_v40  ;;  %v4873_v36 = vunpack.i.h.bf16 %v4871_v60  ;;  %v4872_v18 = vunpack.i.l.bf16 %v4871_v60  ;;  %4880 = vrot.lane.b32.xlu0 %v9717_v44, %s5590_s21 }
 0x1a8   : > { %v1729_v50 = vpack.c.bf16 %v1712_v51, %v1711_v26  ;;  %v1614_v30 = vsel %vm1583_vm8, %v1581_v11, %v4632_v14 }
 0x1a9   : > { %v1582_v42 = vsel %vm1550_vm7, %v1549_v54, %v9715_v9  ;;  %v1647_v17 = vsel %vm1616_vm9, %v1614_v30, %v4712_v4 }
 0x1aa   : > { %v1615_v62 = vsel %vm1583_vm8, %v1582_v42, %v4633_v37  ;;  %4131 = vmatmul.mubr.msk.bf16.gmra.mrb[24].mxu0 %vm1751_vm12, %v1728_v10  ;;  %v1680_v1 = vsel %vm1649_vm10, %v1647_v17, %v4862_v13 }
 0x1ab   : > { %v1648_v48 = vsel %vm1616_vm9, %v1615_v62, %v4713_v34  ;;  %4134 = vmatprep.mubr.msk.bf16.mxu0 %vm1751_vm12, %v1729_v50  ;;  %v1713_v47 = vsel %vm1682_vm11, %v1680_v1, %v4872_v18 }
 0x1ac   : > { %v1681_v46 = vsel %vm1649_vm10, %v1648_v48, %v4863_v27 }
 0x1ad   : > { %v1714_v28 = vsel %vm1682_vm11, %v1681_v46, %v4873_v36 }
 0x1ae   : > { %v1730_v6 = vpack.c.bf16 %v1714_v28, %v1713_v47 }
 0x1b2   : > { %4135 = vmatmul.mubr.msk.bf16.gmra.mrb[28].mxu0 %vm1751_vm12, %v1730_v6 }
 0x24d   : > { %v4108_v57 = vpop.f32.mrb[0].mxu0 }
 0x24e   : > { %v1974_v56 = vmul.f32 %v4108_v57, %v7592_v39  ;;  %v1838_v53 = vpop.f32.mrb[1].mxu0 }
 0x24f   : > { %v1972_v31 = vmul.f32 %v7592_v39, %v1838_v53  ;;  %v4109_v22 = vpop.f32.mrb[2].mxu0 }
 0x250   : > { %v7602_v19 = vadd.f32 %v7597_v32, %v1974_v56  ;;  %v1975_v15 = vmul.f32 %v4109_v22, %v7592_v39  ;;  %v1841_v25 = vpop.f32.mrb[3].mxu0 }
 0x251   : > { %v1973_v33 = vmul.f32 %v7592_v39, %v1841_v25  ;;  %v7608_v0 = vadd.f32 %v7597_v32, %v1972_v31 }
 0x252   : > { %9718 = vst [vmem:[#allocation28_spill] sm:$0xff] %v7602_v19  ;;  %v9407_v2 = vmax.f32 %v7602_v19, 0.0  ;;  %v7611_v29 = vadd.f32 %v7597_v32, %v1975_v15 }
 0x253   : > { %9719 = vst [vmem:[#allocation30_spill] sm:$0xff] %v7608_v0  ;;  %v7614_v55 = vadd.f32 %v7597_v32, %v1973_v33  ;;  %v9413_v35 = vmax.f32 %v7608_v0, 0.0 }
 0x254   : > { %9720 = vst [vmem:[#allocation31_spill] sm:$0xff] %v7611_v29  ;;  %v9406_v52 = vmax.f32 %v7611_v29, 0.0  ;;  %v2110_v20 = vrot.slane %v9407_v2, 7 }
 0x255   : > { %9721 = vst [vmem:[#allocation34_spill] sm:$0xff] %v7614_v55  ;;  %v9412_v43 = vmax.f32 %v7614_v55, 0.0  ;;  %v4112_v8 = vpop.f32.mrb[4].mxu0  ;;  %v2107_v14 = vrot.slane %v9413_v35, 7 }
 0x256   : > { %v2111_v3 = vrot.slane %v9406_v52, 7  ;;  %v1854_v63 = vpop.f32.mrb[5].mxu0  ;;  %v7630_v37 = vsel %vm343_vm0, 0.0, %v2110_v20  ;;  %v1978_v42 = vmul.f32 %v4112_v8, %v7592_v39 }
 0x257   : > { %v4113_v7 = vpop.f32.mrb[6].mxu0  ;;  %v2108_v45 = vrot.slane %v9412_v43, 7  ;;  %v2269_v60 = vrot.slane %v7630_v37, 1  ;;  %v7646_v24 = vsel %vm343_vm0, 0.0, %v2107_v14  ;;  %v2344_v27 = vrot.slane %v7630_v37, 2 }
 0x258   : > { %v7624_v38 = vsel %vm343_vm0, %v2110_v20, %v2111_v3  ;;  %v2219_v23 = vsel %vm343_vm0, %v2111_v3, 0.0  ;;  %v1857_v21 = vpop.f32.mrb[7].mxu0  ;;  %v1979_v10 = vmul.f32 %v4113_v7, %v7592_v39  ;;  %v2264_v46 = vrot.slane %v7646_v24, 1 }
 0x259   : > { %v2272_v26 = vrot.slane %v2219_v23, 1  ;;  %v4889_v51 = vpack.i.bf16 %v7624_v38, %v7630_v37  ;;  %v7638_v58 = vsel %vm343_vm0, %v2107_v14, %v2108_v45  ;;  %v2270_v16 = vrot.slane %v7624_v38, 1 }
 0x25a   : > { %v4894_v41 = vpack.i.bf16 %v7638_v58, %v7646_v24  ;;  %v2347_v12 = vrot.slane %v2219_v23, 2  ;;  %v2345_v11 = vrot.slane %v7624_v38, 2  ;;  %v2218_v13 = vsel %vm343_vm0, %v2108_v45, 0.0 }
 0x25b   : > { %4890 = vrot.lane.b32.xlu0 %v4889_v51, %s5595_s8  ;;  %4885 = vrot.lane.b32.xlu1 %v4889_v51, %s5592_s23  ;;  %v2271_v49 = vsel %vm509_vm1, %v2269_v60, %v2270_v16  ;;  %v2273_v54 = vsel %vm509_vm1, %v2270_v16, %v2272_v26  ;;  %v2267_v30 = vrot.slane %v2218_v13, 1  ;;  %v2265_v17 = vrot.slane %v7638_v58, 1 }
 0x25c   : > { %v4909_v4 = vpack.i.bf16 %v2273_v54, %v2271_v49  ;;  %v2346_v36 = vsel %vm590_vm2, %v2344_v27, %v2345_v11  ;;  %v2348_v18 = vsel %vm590_vm2, %v2345_v11, %v2347_v12  ;;  %v7678_v47 = vadd.f32 %v7597_v32, %v1979_v10 }
 0x25d   : > { %v7643_v59 = vpop.f32.mrb[8].mxu0  ;;  %v4914_v62 = vpack.i.bf16 %v2348_v18, %v2346_v36  ;;  %v1977_v28 = vmul.f32 %v7592_v39, %v1857_v21  ;;  %v7684_v6 = vadd.f32 %v7597_v32, %v1978_v42  ;;  %v1976_v57 = vmul.f32 %v7592_v39, %v1854_v63 }
 0x25e   : > { %v7648_v61 = vpop.f32.mrb[9].mxu0  ;;  %9722 = vst [vmem:[#allocation33_spill] sm:$0xff] %v7678_v47  ;;  %v2266_v56 = vsel %vm509_vm1, %v2264_v46, %v2265_v17  ;;  %v2268_v53 = vsel %vm509_vm1, %v2265_v17, %v2267_v30  ;;  %v9402_v22 = vmax.f32 %v7678_v47, 0.0  ;;  %v2342_v20 = vrot.slane %v2218_v13, 2 }
 0x25f   : > { %v7654_v34 = vpop.f32.mrb[10].mxu0  ;;  %4895 = vrot.lane.b32.xlu0 %v4894_v41, %s5592_s23  ;;  %4910 = vrot.lane.b32.xlu1 %v4909_v4, %s5594_s17  ;;  %9723 = vst [vmem:[#allocation36_spill] sm:$0xff] %v7684_v6  ;;  %v4929_v31 = vpack.i.bf16 %v2268_v53, %v2266_v56  ;;  %v7691_v15 = vadd.f32 %v7597_v32, %v1977_v28  ;;  %v9403_v8 = vmax.f32 %v7684_v6, 0.0  ;;  %v2340_v7 = vrot.slane %v7638_v58, 2 }
 0x260   : > { %v7656_v40 = vpop.f32.mrb[11].mxu0  ;;  %v7701_v3 = vadd.f32 %v7597_v32, %v1976_v57  ;;  %v2339_v45 = vrot.slane %v7646_v24, 2  ;;  %v2117_v21 = vrot.slane %v9402_v22, 7  ;;  %v5517_v57 = vld [vmem:[%s9268_s4] sm:$0xff]  }
 0x261   : > { %9724 = vst [vmem:[#allocation32_spill] sm:$0xff] %v7691_v15  ;;  %v9404_v14 = vmax.f32 %v7691_v15, 0.0  ;;  %v2116_v26 = vrot.slane %v9403_v8, 7  ;;  %v2343_v16 = vsel %vm590_vm2, %v2340_v7, %v2342_v20  ;;  %4138 = vmatprep.subr.bf16.mxu1 %v5517_v57 }
 0x262   : > { %9725 = vst [vmem:[#allocation37_spill] sm:$0xff] %v7701_v3  ;;  %v9405_v51 = vmax.f32 %v7701_v3, 0.0  ;;  %v2341_v60 = vsel %vm590_vm2, %v2339_v45, %v2340_v7  ;;  %v2221_v13 = vsel %vm343_vm0, %v2117_v21, 0.0  ;;  %4139 = vmatpush3.bf16.msra.mxu1 %v5517_v57 }
 0x263   : > { %4915 = vrot.lane.b32.xlu1 %v4914_v62, %s5596_s9  ;;  %4900 = vrot.lane.b32.xlu0 %v4909_v4, %s5588_s19  ;;  %v4934_v49 = vpack.i.bf16 %v2343_v16, %v2341_v60  ;;  %v7719_v54 = vsel %vm343_vm0, %v2116_v26, %v2117_v21  ;;  %v2114_v41 = vrot.slane %v9404_v14, 7  ;;  %v7730_v11 = vsel %vm343_vm0, 0.0, %v2116_v26 }
 0x264   : > { %9726 = vst [vmem:[#allocation39_spill] sm:$0xff] %v7719_v54  ;;  %9727 = vst [vmem:[#allocation35_spill] sm:$0xff] %v7730_v11  ;;  %v2113_v27 = vrot.slane %v9405_v51, 7  ;;  %v4949_v42 = vpack.i.bf16 %v7719_v54, %v7730_v11  ;;  %v2282_v30 = vrot.slane %v2221_v13, 1  ;;  %v2279_v46 = vrot.slane %v7730_v11, 1 }
 0x265   : > { %v7664_v9 = vpop.f32.mrb[12].mxu0  ;;  %v2357_v45 = vrot.slane %v2221_v13, 2  ;;  %v2354_v60 = vrot.slane %v7730_v11, 2  ;;  %v2355_v16 = vrot.slane %v7719_v54, 2  ;;  %v1980_v13 = vmul.f32 %v7592_v39, %v7648_v61 }
 0x266   : > { %v7669_v50 = vpop.f32.mrb[13].mxu0  ;;  %v7742_v18 = vsel %vm343_vm0, %v2113_v27, %v2114_v41  ;;  %v7748_v17 = vsel %vm343_vm0, 0.0, %v2113_v27  ;;  %v1982_v27 = vmul.f32 %v7643_v59, %v7592_v39  ;;  %v5518_v59 = vld [vmem:[%s9268_s4 + $0x8] sm:$0xff]   ;;  %v2220_v57 = vsel %vm343_vm0, %v2114_v41, 0.0 }
 0x267   : > { %v7672_v48 = vpop.f32.mrb[14].mxu0  ;;  %4905 = vrot.lane.b32.xlu0 %v4914_v62, %s5590_s21  ;;  %4930 = vrot.lane.b32.xlu1 %v4929_v31, %s5588_s19  ;;  %9728 = vst [vmem:[#allocation40_spill] sm:$0xff] %v7748_v17  ;;  %v4964_v28 = vpack.i.bf16 %v7742_v18, %v7748_v17  ;;  %v1981_v41 = vmul.f32 %v7592_v39, %v7656_v40  ;;  %v5519_v40 = vld [vmem:[%s9268_s4 + $0x10] sm:$0xff]   ;;  %v2350_v8 = vrot.slane %v7742_v18, 2 }
 0x268   : > { %v7674_v1 = vpop.f32.mrb[15].mxu0  ;;  %4140 = vmatprep.subr.bf16.mxu1 %v5518_v59 }
 0x269   : > { %4141 = vmatpush3.bf16.msra.mxu1 %v5518_v59  ;;  %v7823_v14 = vadd.f32 %v7597_v32, %v1981_v41  ;;  %v1987_v41 = vmul.f32 %v7672_v48, %v7592_v39 }
 0x26a   : > { %4142 = vmatprep.subr.bf16.mxu1 %v5519_v40 }
 0x26b   : > { %4920 = vrot.lane.b32.xlu0 %v4909_v4, %s5597_s13  ;;  %4935 = vrot.lane.b32.xlu1 %v4934_v49, %s5590_s21  ;;  %9732 = vst [vmem:[#allocation42_spill] sm:$0xff] %v7823_v14  ;;  %v9411_v48 = vmax.f32 %v7823_v14, 0.0 }
 0x26d   : > { %v7694_v25 = vpop.f32.mrb[16].mxu0  ;;  %4143 = vmatpush3.bf16.msra.mxu1 %v5519_v40 }
 0x26e   : > { %v7697_v33 = vpop.f32.mrb[17].mxu0 }
 0x26f   : > { %v7703_v63 = vpop.f32.mrb[18].mxu0  ;;  %4925 = vrot.lane.b32.xlu0 %v4914_v62, %s5598_s14  ;;  %4950 = vrot.lane.b32.xlu1 %v4949_v42, %s5592_s23  ;;  %v2280_v62 = vrot.slane %v7719_v54, 1 }
 0x270   : > { %v7706_v23 = vpop.f32.mrb[19].mxu0 }
 0x271   : > { %v2281_v53 = vsel %vm509_vm1, %v2279_v46, %v2280_v62 }
 0x273   : > { %4940 = vrot.lane.b32.xlu0 %v4929_v31, %s5594_s17  ;;  %4965 = vrot.lane.b32.xlu1 %v4964_v28, %s5595_s8  ;;  %v2283_v31 = vsel %vm509_vm1, %v2280_v62, %v2282_v30  ;;  %v2358_v30 = vsel %vm590_vm2, %v2355_v16, %v2357_v45  ;;  %v7801_v45 = vadd.f32 %v7597_v32, %v1980_v13  ;;  %v2352_v13 = vrot.slane %v2220_v57, 2 }
 0x274   : > { %v7768_v26 = vpack.i.bf16 %v2283_v31, %v2281_v53  ;;  %v1983_v53 = vmul.f32 %v7654_v34, %v7592_v39  ;;  %v2274_v34 = vrot.slane %v7748_v17, 1 }
 0x275   : > { %v7723_v12 = vpop.f32.mrb[20].mxu0  ;;  %9730 = vst [vmem:[#allocation41_spill] sm:$0xff] %v7801_v45 }
 0x276   : > { %v7727_v4 = vpop.f32.mrb[21].mxu0 }
 0x277   : > { %v7735_v10 = vpop.f32.mrb[22].mxu0  ;;  %4945 = vrot.lane.b32.xlu0 %v4934_v49, %s5596_s9  ;;  %4980 = vrot.lane.b32.xlu1 %v7768_v26, %s5594_s17  ;;  %v2356_v49 = vsel %vm590_vm2, %v2354_v60, %v2355_v16  ;;  %v2277_v16 = vrot.slane %v2220_v57, 1 }
 0x278   : > { %v7739_v36 = vpop.f32.mrb[23].mxu0  ;;  %v7781_v62 = vpack.i.bf16 %v2358_v30, %v2356_v49  ;;  %v2275_v49 = vrot.slane %v7742_v18, 1  ;;  %v7812_v30 = vadd.f32 %v7597_v32, %v1983_v53  ;;  %v1984_v53 = vmul.f32 %v7592_v39, %v7669_v50 }
 0x27a   : > { %9731 = vst [vmem:[#allocation44_spill] sm:$0xff] %v7812_v30  ;;  %v2276_v22 = vsel %vm509_vm1, %v2274_v34, %v2275_v49  ;;  %v2278_v57 = vsel %vm509_vm1, %v2275_v49, %v2277_v16  ;;  %v5520_v34 = vld [vmem:[%s9268_s4 + $0x18] sm:$0xff]   ;;  %v9409_v52 = vmax.f32 %v7812_v30, 0.0  ;;  %v1985_v16 = vmul.f32 %v7592_v39, %v7674_v1 }
 0x27b   : > { %4955 = vrot.lane.b32.xlu0 %v4949_v42, %s5595_s8  ;;  %v7794_v42 = vadd.f32 %v7597_v32, %v1982_v27  ;;  %4985 = vrot.lane.b32.xlu1 %v7781_v62, %s5596_s9  ;;  %v1986_v27 = vmul.f32 %v7664_v9, %v7592_v39  ;;  %v9410_v9 = vmax.f32 %v7801_v45, 0.0  ;;  %v7838_v2 = vpack.i.bf16 %v2278_v57, %v2276_v22 }
 0x27c   : > { %v2353_v49 = vsel %vm590_vm2, %v2350_v8, %v2352_v13  ;;  %4144 = vmatprep.subr.bf16.mxu1 %v5520_v34  ;;  %v7852_v22 = vadd.f32 %v7597_v32, %v1984_v53  ;;  %v2123_v1 = vrot.slane %v9409_v52, 7  ;;  %v7868_v53 = vadd.f32 %v7597_v32, %v1985_v16 }
 0x27d   : > { %v7756_v56 = vpop.f32.mrb[24].mxu0  ;;  %9729 = vst [vmem:[#allocation38_spill] sm:$0xff] %v7794_v42  ;;  %v9408_v59 = vmax.f32 %v7794_v42, 0.0  ;;  %v7829_v51 = vadd.f32 %v7597_v32, %v1986_v27  ;;  %v2119_v40 = vrot.slane %v9410_v9, 7  ;;  %4145 = vmatpush3.bf16.msra.mxu1 %v5520_v34  ;;  %v2120_v34 = vrot.slane %v9411_v48, 7 }
 0x27e   : > { %v7761_v20 = vpop.f32.mrb[25].mxu0  ;;  %9734 = vst [vmem:[#allocation46_spill] sm:$0xff] %v7852_v22  ;;  %9737 = vst [vmem:[#allocation49_spill] sm:$0xff] %v7868_v53 }
 0x27f   : > { %v7763_v7 = vpop.f32.mrb[26].mxu0  ;;  %4960 = vrot.lane.b32.xlu0 %v4964_v28, %s5592_s23  ;;  %v2349_v28 = vrot.slane %v7748_v17, 2  ;;  %9733 = vst [vmem:[#allocation43_spill] sm:$0xff] %v7829_v51  ;;  %v2122_v50 = vrot.slane %v9408_v59, 7  ;;  %5000 = vrot.lane.b32.xlu1 %v7838_v2, %s5588_s19  ;;  %v9414_v57 = vmax.f32 %v7829_v51, 0.0  ;;  %v7873_v59 = vsel %vm343_vm0, 0.0, %v2119_v40 }
 0x280   : > { %v7766_v21 = vpop.f32.mrb[27].mxu0  ;;  %9738 = vst [vmem:[#allocation50_spill] sm:$0xff] %v7873_v59  ;;  %v9769_v15 = vrot.slane %v7873_v59, 2 }
 0x281   : > { %v2351_v27 = vsel %vm590_vm2, %v2349_v28, %v2350_v8  ;;  %v7860_v8 = vadd.f32 %v7597_v32, %v1987_v41  ;;  %v7865_v28 = vsel %vm343_vm0, 0.0, %v2122_v50  ;;  %v2128_v16 = vrot.slane %v9414_v57, 7 }
 0x282   : > { %v7862_v13 = vpack.i.bf16 %v2353_v49, %v2351_v27  ;;  %9736 = vst [vmem:[#allocation48_spill] sm:$0xff] %v7865_v28  ;;  %v1994_v27 = vmul.f32 %v7723_v12, %v7592_v39  ;;  %v7885_v49 = vsel %vm343_vm0, %v2123_v1, 0.0  ;;  %v2289_v9 = vrot.slane %v7865_v28, 1 }
 0x283   : > { %4970 = vrot.lane.b32.xlu0 %v7768_v26, %s5588_s19  ;;  %9735 = vst [vmem:[#allocation47_spill] sm:$0xff] %v7860_v8  ;;  %v9420_v52 = vmax.f32 %v7860_v8, 0.0  ;;  %v7894_v41 = vsel %vm343_vm0, %v2120_v34, 0.0  ;;  %v9739_v57 = vmax.f32 %v7852_v22, 0.0  ;;  %v7906_v43 = vsel %vm343_vm0, %v2122_v50, %v2123_v1 }
 0x284   : > { %5005 = vrot.lane.b32.xlu1 %v7862_v13, %s5590_s21  ;;  %v7899_v30 = vadd.f32 %v7597_v32, %v1994_v27  ;;  %9741 = vst [vmem:[#allocation53_spill] sm:$0xff] %v7906_v43  ;;  %v2292_v12 = vrot.slane %v7885_v49, 1  ;;  %v2367_v48 = vrot.slane %v7885_v49, 2  ;;  %v7911_v35 = vsel %vm343_vm0, 0.0, %v2128_v16 }
 0x285   : > { %v7783_v46 = vpop.f32.mrb[28].mxu0  ;;  %v2125_v51 = vrot.slane %v9739_v57, 7  ;;  %9742 = vst [vmem:[#allocation54_spill] sm:$0xff] %v7911_v35  ;;  %v2129_v57 = vrot.slane %v9420_v52, 7  ;;  %v1995_v27 = vmul.f32 %v7735_v10, %v7592_v39  ;;  %v7918_v22 = vsel %vm343_vm0, %v2119_v40, %v2120_v34 }
 0x286   : > { %v7791_v61 = vpop.f32.mrb[29].mxu0  ;;  %9740 = vst [vmem:[#allocation52_spill] sm:$0xff] %v7899_v30  ;;  %9743 = vst [vmem:[#allocation55_spill] sm:$0xff] %v7918_v22  ;;  %v9744_v1 = vmax.f32 %v7868_v53, 0.0  ;;  %v7929_v8 = vmul.f32 %v7694_v25, %v7592_v39  ;;  %v9422_v52 = vmax.f32 %v7899_v30, 0.0  ;;  %v1998_v10 = vmul.f32 %v7756_v56, %v7592_v39 }
 0x287   : > { %v7798_v31 = vpop.f32.mrb[30].mxu0  ;;  %4975 = vrot.lane.b32.xlu0 %v7781_v62, %s5590_s21  ;;  %v7925_v49 = vsel %vm343_vm0, 0.0, %v2125_v51  ;;  %v1996_v25 = vmul.f32 %v7592_v39, %v7761_v20  ;;  %v7945_v50 = vsel %vm343_vm0, %v2129_v57, 0.0  ;;  %v7948_v56 = vadd.f32 %v7597_v32, %v1995_v27 }
 0x288   : > { %v7805_v60 = vpop.f32.mrb[31].mxu0  ;;  %5015 = vrot.lane.b32.xlu1 %v7838_v2, %s5597_s13  ;;  %v2126_v42 = vrot.slane %v9744_v1, 7  ;;  %9745 = vst [vmem:[#allocation56_spill] sm:$0xff] %v7925_v49  ;;  %v1991_v1 = vmul.f32 %v7703_v63, %v7592_v39  ;;  %v7960_v63 = vmul.f32 %v7592_v39, %v7706_v23  ;;  %v2290_v20 = vrot.slane %v7906_v43, 1 }
 0x289   : > { %9746 = vst [vmem:[#allocation57_spill] sm:$0xff] %v7948_v56  ;;  %v2140_v27 = vrot.slane %v9422_v52, 7  ;;  %v7969_v53 = vadd.f32 %v7597_v32, %v1998_v10  ;;  %v5044_v52 = vpack.i.bf16 %v7918_v22, %v7873_v59  ;;  %v9754_v30 = vmax.f32 %v7948_v56, 0.0 }
 0x28a   : > { %v7956_v34 = vsel %vm343_vm0, %v2125_v51, %v2126_v42  ;;  %v7964_v40 = vsel %vm343_vm0, %v2126_v42, 0.0  ;;  %v7979_v42 = vadd.f32 %v7597_v32, %v1996_v25  ;;  %v2291_v23 = vsel %vm509_vm1, %v2289_v9, %v2290_v20 }
 0x28b   : > { %4990 = vrot.lane.b32.xlu0 %v7768_v26, %s5597_s13  ;;  %v5029_v26 = vpack.i.bf16 %v7906_v43, %v7865_v28  ;;  %9748 = vst [vmem:[#allocation59_spill] sm:$0xff] %v7956_v34  ;;  %9749 = vst [vmem:[#allocation60_spill] sm:$0xff] %v7969_v53  ;;  %v2293_v51 = vsel %vm509_vm1, %v2290_v20, %v2292_v12  ;;  %v2365_v25 = vrot.slane %v7906_v43, 2  ;;  %v2285_v45 = vrot.slane %v7918_v22, 1 }
 0x28c   : > { %5020 = vrot.lane.b32.xlu1 %v7862_v13, %s5598_s14  ;;  %9750 = vst [vmem:[#allocation62_spill] sm:$0xff] %v7979_v42  ;;  %v2003_v12 = vmul.f32 %v7798_v31, %v7592_v39  ;;  %v2001_v20 = vmul.f32 %v7592_v39, %v7805_v60  ;;  %v8017_v14 = vpack.i.bf16 %v2293_v51, %v2291_v23  ;;  %v9773_v29 = vrot.slane %v7911_v35, 1 }
 0x28d   : > { %v2368_v31 = vsel %vm590_vm2, %v2365_v25, %v2367_v48  ;;  %v8028_v60 = vadd.f32 %v7597_v32, %v1991_v1 }
 0x28e   : > { %v8041_v1 = vadd.f32 %v7597_v32, %v2003_v12 }
 0x28f   : > { %4995 = vrot.lane.b32.xlu0 %v7781_v62, %s5598_s14  ;;  %v7953_v62 = vsel %vm343_vm0, %v2128_v16, %v2129_v57  ;;  %v1999_v16 = vmul.f32 %v7763_v7, %v7592_v39  ;;  %v1997_v57 = vmul.f32 %v7592_v39, %v7766_v21  ;;  %v2002_v7 = vmul.f32 %v7783_v46, %v7592_v39 }
 0x290   : > { %9747 = vst [vmem:[#allocation58_spill] sm:$0xff] %v7953_v62  ;;  %5030 = vrot.lane.b32.xlu1 %v5029_v26, %s5592_s23  ;;  %v7995_v21 = vsel %vm343_vm0, 0.0, %v2140_v27  ;;  %9758 = vst [vmem:[#allocation68_spill] sm:$0xff] %v8028_v60 }
 0x291   : > { %9751 = vst [vmem:[#allocation63_spill] sm:$0xff] %v7995_v21  ;;  %v7999_v46 = vadd.f32 %v7597_v32, %v1999_v16  ;;  %v8006_v9 = vadd.f32 %v7597_v32, %v1997_v57  ;;  %v2141_v16 = vrot.slane %v9754_v30, 7  ;;  %v8015_v10 = vadd.f32 %v7597_v32, %v2002_v7  ;;  %9761 = vst [vmem:[#allocation69_spill] sm:$0xff] %v8041_v1 }
 0x292   : > { %v9757_v57 = vrot.slane %v7865_v28, 2  ;;  %v9759_v7 = vmax.f32 %v7969_v53, 0.0  ;;  %v9763_v53 = vrot.slane %v7873_v59, 1 }
 0x293   : > { %5010 = vrot.lane.b32.xlu0 %v7838_v2, %s5594_s17  ;;  %v2000_v2 = vmul.f32 %v7592_v39, %v7791_v61  ;;  %9752 = vst [vmem:[#allocation64_spill] sm:$0xff] %v7999_v46  ;;  %9753 = vst [vmem:[#allocation65_spill] sm:$0xff] %v8006_v9  ;;  %v9434_v30 = vmax.f32 %v8015_v10, 0.0  ;;  %v8062_v56 = vsel %vm343_vm0, %v2140_v27, %v2141_v16  ;;  %v9770_v27 = vrot.slane %v7894_v41, 2 }
 0x294   : > { %5045 = vrot.lane.b32.xlu1 %v5044_v52, %s5595_s8  ;;  %9755 = vst [vmem:[#allocation66_spill] sm:$0xff] %v8015_v10  ;;  %v2366_v61 = vsel %vm590_vm2, %v9757_v57, %v2365_v25  ;;  %v2146_v23 = vrot.slane %v9759_v7, 7  ;;  %v8044_v57 = vadd.f32 %v7597_v32, %v2001_v20  ;;  %v8047_v7 = vsel %vm343_vm0, %v2141_v16, 0.0  ;;  %9765 = vst [vmem:[#allocation71_spill] sm:$0xff] %v8062_v56 }
 0x295   : > { %v8050_v51 = vpack.i.bf16 %v2368_v31, %v2366_v61  ;;  %v9764_v25 = vrot.slane %v7894_v41, 1  ;;  %v2360_v20 = vrot.slane %v7918_v22, 2  ;;  %v9766_v31 = vmax.f32 %v7999_v46, 0.0 }
 0x296   : > { %9762 = vst [vmem:[#allocation70_spill] sm:$0xff] %v8044_v57  ;;  %v8065_v61 = vsel %vm343_vm0, 0.0, %v2146_v23  ;;  %v2320_v44 = vrot.slane %v8062_v56, 1  ;;  %v9780_v11 = vrot.slane %v8047_v7, 2 }
 0x297   : > { %5025 = vrot.lane.b32.xlu0 %v7862_v13, %s5596_s9  ;;  %v8020_v13 = vadd.f32 %v7597_v32, %v2000_v2  ;;  %v9760_v2 = vmax.f32 %v7979_v42, 0.0  ;;  %v2288_v12 = vsel %vm509_vm1, %v2285_v45, %v9764_v25  ;;  %v2363_v16 = vsel %vm590_vm2, %v2360_v20, %v9770_v27 }
 0x298   : > { %5060 = vrot.lane.b32.xlu1 %v8017_v14, %s5594_s17  ;;  %v2329_v42 = vrot.slane %v8065_v61, 1 }
 0x299   : > { %9756 = vst [vmem:[#allocation67_spill] sm:$0xff] %v8020_v13  ;;  %v2143_v48 = vrot.slane %v9760_v2, 7  ;;  %v2286_v2 = vsel %vm509_vm1, %v9763_v53, %v2285_v45  ;;  %v9767_v53 = vmax.f32 %v8006_v9, 0.0 }
 0x29a   : > { %v8082_v46 = vpack.i.bf16 %v2288_v12, %v2286_v2 }
 0x29b   : > { %5035 = vrot.lane.b32.xlu0 %v5029_v26, %s5595_s8  ;;  %v2147_v26 = vrot.slane %v9766_v31, 7  ;;  %v8073_v45 = vsel %vm343_vm0, 0.0, %v2143_v48  ;;  %v2144_v25 = vrot.slane %v9767_v53, 7  ;;  %v2152_v31 = vrot.slane %v9434_v30, 7 }
 0x29c   : > { %5065 = vrot.lane.b32.xlu1 %v8050_v51, %s5596_s9  ;;  %v2361_v53 = vsel %vm590_vm2, %v9769_v15, %v2360_v20  ;;  %v9771_v20 = vmax.f32 %v8041_v1, 0.0  ;;  %v9781_v43 = vrot.slane %v8073_v45, 1 }
 0x29d   : > { %v8097_v12 = vsel %vm343_vm0, %v2147_v26, 0.0  ;;  %v8105_v41 = vsel %vm343_vm0, %v2144_v25, 0.0  ;;  %v8112_v10 = vsel %vm343_vm0, %v2146_v23, %v2147_v26  ;;  %v8115_v2 = vsel %vm343_vm0, 0.0, %v2152_v31 }
 0x29e   : > { %v2153_v27 = vrot.slane %v9771_v20, 7  ;;  %v8117_v47 = vpack.i.bf16 %v2363_v16, %v2361_v53  ;;  %v8121_v15 = vsel %vm343_vm0, %v2143_v48, %v2144_v25  ;;  %v2300_v20 = vrot.slane %v7953_v62, 1 }
 0x29f   : > { %5040 = vrot.lane.b32.xlu0 %v5044_v52, %s5592_s23  ;;  %v9768_v52 = vmax.f32 %v8020_v13, 0.0  ;;  %v2332_v13 = vrot.slane %v8097_v12, 1  ;;  %v2327_v23 = vrot.slane %v8105_v41, 1  ;;  %v2402_v26 = vrot.slane %v8105_v41, 2 }
 0x2a0   : > { %5080 = vrot.lane.b32.xlu1 %v8082_v46, %s5588_s19  ;;  %v2375_v48 = vrot.slane %v7953_v62, 2  ;;  %v8138_v53 = vsel %vm343_vm0, %v2153_v27, 0.0  ;;  %v2301_v25 = vsel %vm509_vm1, %v9773_v29, %v2300_v20  ;;  %v9774_v16 = vrot.slane %v7945_v50, 1 }
 0x2a1   : > { %v2149_v6 = vrot.slane %v9768_v52, 7  ;;  %v9772_v52 = vmax.f32 %v8044_v57, 0.0  ;;  %v8144_v57 = vsel %vm343_vm0, %v2152_v31, %v2153_v27  ;;  %v2419_v55 = vrot.slane %v8138_v53, 1  ;;  %v5521_v27 = vld [vmem:[%s9268_s4 + $0x20] ss:$0 sps:$4 sm:$0xff]  }
 0x2a2   : > { %v2303_v19 = vsel %vm509_vm1, %v2300_v20, %v9774_v16  ;;  %v9776_v31 = vrot.slane %v7945_v50, 2  ;;  %v8171_v16 = vpack.i.bf16 %v7953_v62, %v7911_v35  ;;  %v2330_v5 = vrot.slane %v8112_v10, 1  ;;  %4181 = vmatprep.subr.msk.bf16.mxu1 %vm3555_vm13, %v5521_v27 }
 0x2a3   : > { %5050 = vrot.lane.b32.xlu0 %v8017_v14, %s5588_s19  ;;  %v2150_v30 = vrot.slane %v9772_v52, 7  ;;  %v8124_v9 = vsel %vm343_vm0, 0.0, %v2149_v6  ;;  %v2407_v52 = vrot.slane %v8097_v12, 2  ;;  %v2325_v50 = vrot.slane %v8121_v15, 1 }
 0x2a4   : > { %5085 = vrot.lane.b32.xlu1 %v8117_v47, %s5590_s21  ;;  %v2334_v1 = vrot.slane %v8124_v9, 1  ;;  %v2409_v41 = vrot.slane %v8124_v9, 2  ;;  %v2378_v29 = vsel %vm590_vm2, %v2375_v48, %v9776_v31  ;;  %v2405_v31 = vrot.slane %v8112_v10, 2 }
 0x2a5   : > { %v2232_v12 = vsel %vm343_vm0, %v2150_v30, 0.0  ;;  %v8147_v3 = vsel %vm343_vm0, %v2149_v6, %v2150_v30  ;;  %v9775_v6 = vrot.slane %v7911_v35, 2  ;;  %v2400_v35 = vrot.slane %v8121_v15, 2 }
 0x2a6   : > { %v2337_v0 = vrot.slane %v2232_v12, 1  ;;  %v2412_v20 = vrot.slane %v2232_v12, 2  ;;  %v5119_v12 = vpack.i.bf16 %v7956_v34, %v7925_v49  ;;  %v2331_v28 = vsel %vm509_vm1, %v2329_v42, %v2330_v5 }
 0x2a7   : > { %5055 = vrot.lane.b32.xlu0 %v8050_v51, %s5590_s21  ;;  %v2376_v30 = vsel %vm590_vm2, %v9775_v6, %v2375_v48  ;;  %v8176_v6 = vpack.i.bf16 %v2303_v19, %v2301_v25  ;;  %v3557_v19 = vsel %vm3555_vm13, %v5521_v27, 0  ;;  %v9777_v25 = vrot.slane %v7995_v21, 1 }
 0x2a8   : > { %5090 = vrot.lane.b32.xlu1 %v8082_v46, %s5597_s13  ;;  %v8179_v48 = vpack.i.bf16 %v2378_v29, %v2376_v30  ;;  %v2335_v30 = vrot.slane %v8147_v3, 1  ;;  %v9778_v29 = vrot.slane %v8047_v7, 1  ;;  %4147 = vmatpush3.bf16.msra.mxu1 %v3557_v19  ;;  %v2326_v27 = vsel %vm509_vm1, %v9781_v43, %v2325_v50  ;;  %v8229_v19 = vpop.permute.xlu0 %4875 }
 0x2a9   : > { %v2321_v62 = vsel %vm509_vm1, %v9777_v25, %v2320_v44  ;;  %v2333_v25 = vsel %vm509_vm1, %v2330_v5, %v2332_v13  ;;  %v2328_v17 = vsel %vm509_vm1, %v2325_v50, %v2327_v23  ;;  %v9783_v42 = vrot.slane %v8073_v45, 2 }
 0x2aa   : > { %v2323_v59 = vsel %vm509_vm1, %v2320_v44, %v9778_v29  ;;  %v2410_v44 = vrot.slane %v8147_v3, 2  ;;  %v2424_v29 = vrot.slane %v8138_v53, 2  ;;  %v2403_v13 = vsel %vm590_vm2, %v2400_v35, %v2402_v26 }
 0x2ab   : > { %5070 = vrot.lane.b32.xlu0 %v8017_v14, %s5597_s13  ;;  %v2395_v14 = vrot.slane %v8062_v56, 2  ;;  %v2401_v43 = vsel %vm590_vm2, %v9783_v42, %v2400_v35  ;;  %v2408_v7 = vsel %vm590_vm2, %v2405_v31, %v2407_v52  ;;  %v2336_v23 = vsel %vm509_vm1, %v2334_v1, %v2335_v30 }
 0x2ac   : > { %5095 = vrot.lane.b32.xlu1 %v8117_v47, %s5598_s14  ;;  %v8223_v53 = vpack.i.bf16 %v2323_v59, %v2321_v62  ;;  %v8233_v42 = vpack.i.bf16 %v2328_v17, %v2326_v27  ;;  %v8235_v35 = vpack.i.bf16 %v2403_v13, %v2401_v43  ;;  %v2422_v59 = vrot.slane %v8144_v57, 2 }
 0x2ad   : > { %v2398_v54 = vsel %vm590_vm2, %v2395_v14, %v9780_v11  ;;  %v9782_v11 = vrot.slane %v8065_v61, 2  ;;  %v8251_v17 = vpack.i.bf16 %v8144_v57, %v8115_v2  ;;  %v9784_v1 = vrot.slane %v8115_v2, 1 }
 0x2ae   : > { %v9785_v26 = vrot.slane %v8115_v2, 2  ;;  %v2372_v2 = vrot.slane %v7964_v40, 2  ;;  %v8277_v27 = vadd.f32 %v7597_v32, %v7929_v8  ;;  %v9453_v43 = vmax.f32 %v8028_v60, 0.0 }
 0x2af   : > { %5075 = vrot.lane.b32.xlu0 %v8050_v51, %s5598_s14  ;;  %v9779_v51 = vrot.slane %v7995_v21, 2  ;;  %v2406_v5 = vsel %vm590_vm2, %v9782_v11, %v2405_v31  ;;  %v2413_v11 = vsel %vm590_vm2, %v2410_v44, %v2412_v20  ;;  %v2425_v20 = vsel %vm590_vm2, %v2422_v59, %v2424_v29 }
 0x2b0   : > { %5110 = vrot.lane.b32.xlu1 %v8171_v16, %s5592_s23  ;;  %9788 = vst [vmem:[#allocation74_spill] sm:$0xff] %v8277_v27  ;;  %v9790_v29 = vrot.slane %v7964_v40, 1  ;;  %v2369_v8 = vrot.slane %v7925_v49, 2  ;;  %v9454_v13 = vmax.f32 %v8277_v27, 0.0 }
 0x2b1   : > { %v2396_v22 = vsel %vm590_vm2, %v9779_v51, %v2395_v14  ;;  %v2338_v14 = vsel %vm509_vm1, %v2335_v30, %v2337_v0  ;;  %v2411_v51 = vsel %vm590_vm2, %v2409_v41, %v2410_v44  ;;  %v8240_v0 = vpack.i.bf16 %v2333_v25, %v2331_v28  ;;  %v8272_v25 = vpop.permute.xlu0 %4880 }
 0x2b2   : > { %v8226_v50 = vpack.i.bf16 %v2398_v54, %v2396_v22  ;;  %v8242_v54 = vpack.i.bf16 %v2408_v7, %v2406_v5  ;;  %v8245_v22 = vpack.i.bf16 %v2338_v14, %v2336_v23  ;;  %v8247_v62 = vpack.i.bf16 %v2413_v11, %v2411_v51 }
 0x2b3   : > { %5100 = vrot.lane.b32.xlu0 %v8082_v46, %s5594_s17  ;;  %v2417_v46 = vrot.slane %v8144_v57, 1  ;;  %v2423_v41 = vsel %vm590_vm2, %v9785_v26, %v2422_v59  ;;  %v2294_v30 = vrot.slane %v7925_v49, 1  ;;  %v2135_v51 = vrot.slane %v9453_v43, 7 }
 0x2b4   : > { %5120 = vrot.lane.b32.xlu1 %v5119_v12, %s5595_s8  ;;  %v8267_v31 = vpack.i.bf16 %v2425_v20, %v2423_v41 }
 0x2b5   : > { %v2418_v52 = vsel %vm509_vm1, %v9784_v1, %v2417_v46  ;;  %v2420_v28 = vsel %vm509_vm1, %v2417_v46, %v2419_v55  ;;  %v1988_v55 = vmul.f32 %v7592_v39, %v7697_v33  ;;  %v2370_v33 = vrot.slane %v7956_v34, 2 }
 0x2b6   : > { %v8265_v57 = vpack.i.bf16 %v2420_v28, %v2418_v52  ;;  %9787 = vst [vmem:[#allocation73_spill] sm:$0xff] %v8267_v31  ;;  %v2134_v1 = vrot.slane %v9454_v13, 7  ;;  %v1993_v52 = vmul.f32 %v7592_v39, %v7739_v36  ;;  %v2227_v41 = vsel %vm343_vm0, %v2135_v51, 0.0 }
 0x2b7   : > { %5105 = vrot.lane.b32.xlu0 %v8117_v47, %s5596_s9  ;;  %v2295_v47 = vrot.slane %v7956_v34, 1  ;;  %v2371_v23 = vsel %vm590_vm2, %v2369_v8, %v2370_v33  ;;  %v2373_v14 = vsel %vm590_vm2, %v2370_v33, %v2372_v2 }
 0x2b8   : > { %5135 = vrot.lane.b32.xlu1 %v8176_v6, %s5594_s17  ;;  %9786 = vst [vmem:[#allocation72_spill] sm:$0xff] %v8265_v57  ;;  %v8318_v26 = vsel %vm343_vm0, %v2134_v1, %v2135_v51  ;;  %v8333_v2 = vadd.f32 %v7597_v32, %v1993_v52  ;;  %v4883_v57 = vunpack.i.h.bf16 %v8272_v25 }
 0x2b9   : > { %v2296_v44 = vsel %vm509_vm1, %v2294_v30, %v2295_v47  ;;  %v2298_v5 = vsel %vm509_vm1, %v2295_v47, %v9790_v29  ;;  %v5149_v47 = vpack.i.bf16 %v2373_v14, %v2371_v23  ;;  %9792 = vst [vmem:[#allocation78_spill] sm:$0xff] %v8318_v26  ;;  %v1992_v30 = vmul.f32 %v7592_v39, %v7727_v4 }
 0x2ba   : > { %v5144_v40 = vpack.i.bf16 %v2298_v5, %v2296_v44  ;;  %9794 = vst [vmem:[#allocation80_spill] sm:$0xff] %v8333_v2  ;;  %v2312_v29 = vrot.slane %v2227_v41, 1  ;;  %v2310_v8 = vrot.slane %v8318_v26, 1  ;;  %v2387_v23 = vrot.slane %v2227_v41, 2 }
 0x2bb   : > { %5115 = vrot.lane.b32.xlu0 %v5119_v12, %s5592_s23  ;;  %v8281_v12 = vadd.f32 %v7597_v32, %v7960_v63  ;;  %v8295_v63 = vadd.f32 %v7597_v32, %v1988_v55  ;;  %v8330_v55 = vsel %vm343_vm0, 0.0, %v2134_v1  ;;  %v8349_v14 = vadd.f32 %v7597_v32, %v1992_v30 }
 0x2bc   : > { %5140 = vrot.lane.b32.xlu1 %v8179_v48, %s5596_s9  ;;  %9793 = vst [vmem:[#allocation79_spill] sm:$0xff] %v8330_v55  ;;  %v2309_v39 = vrot.slane %v8330_v55, 1  ;;  %v9460_v1 = vmax.f32 %v8333_v2, 0.0  ;;  %v2385_v41 = vrot.slane %v8318_v26, 2 }
 0x2bd   : > { %9789 = vst [vmem:[#allocation75_spill] sm:$0xff] %v8281_v12  ;;  %9791 = vst [vmem:[#allocation76_spill] sm:$0xff] %v8295_v63  ;;  %v9455_v7 = vmax.f32 %v8281_v12, 0.0  ;;  %v9456_v59 = vmax.f32 %v8295_v63, 0.0 }
 0x2be   : > { %9797 = vst [vmem:[#allocation83_spill] sm:$0xff] %v8349_v14 }
 0x2bf   : > { %5125 = vrot.lane.b32.xlu0 %v8176_v6, %s5588_s19  ;;  %v2132_v28 = vrot.slane %v9455_v7, 7  ;;  %v2131_v20 = vrot.slane %v9456_v59, 7  ;;  %v8374_v7 = vpack.i.bf16 %v8318_v26, %v8330_v55 }
 0x2c0   : > { %5145 = vrot.lane.b32.xlu1 %v5144_v40, %s5588_s19 }
 0x2c1   : > { %v8338_v5 = vsel %vm343_vm0, %v2131_v20, %v2132_v28  ;;  %v2226_v33 = vsel %vm343_vm0, %v2132_v28, 0.0  ;;  %v8346_v4 = vsel %vm343_vm0, 0.0, %v2131_v20  ;;  %v2313_v28 = vsel %vm509_vm1, %v2310_v8, %v2312_v29 }
 0x2c2   : > { %9795 = vst [vmem:[#allocation81_spill] sm:$0xff] %v8338_v5  ;;  %9796 = vst [vmem:[#allocation82_spill] sm:$0xff] %v8346_v4  ;;  %v2307_v51 = vrot.slane %v2226_v33, 1  ;;  %v8354_v52 = vpack.i.bf16 %v8338_v5, %v8346_v4  ;;  %v2305_v43 = vrot.slane %v8338_v5, 1  ;;  %v2384_v20 = vrot.slane %v8330_v55, 2 }
 0x2c3   : > { %5130 = vrot.lane.b32.xlu0 %v8179_v48, %s5590_s21  ;;  %v2304_v30 = vrot.slane %v8346_v4, 1  ;;  %v2380_v59 = vrot.slane %v8338_v5, 2  ;;  %v4882_v55 = vunpack.i.l.bf16 %v8272_v25 }
 0x2c4   : > { %5150 = vrot.lane.b32.xlu1 %v5149_v47, %s5590_s21  ;;  %v2308_v27 = vsel %vm509_vm1, %v2305_v43, %v2307_v51  ;;  %v2386_v12 = vsel %vm590_vm2, %v2384_v20, %v2385_v41 }
 0x2c5   : > { %v2306_v60 = vsel %vm509_vm1, %v2304_v30, %v2305_v43 }
 0x2c6   : > { %v8392_v30 = vpack.i.bf16 %v2308_v27, %v2306_v60 }
 0x2c7   : > { %5165 = vrot.lane.b32.xlu0 %v5144_v40, %s5594_s17 }
 0x2c8   : > { %5155 = vrot.lane.b32.xlu1 %v5144_v40, %s5597_s13  ;;  %v2311_v40 = vsel %vm509_vm1, %v2309_v39, %v2310_v8  ;;  %v2382_v39 = vrot.slane %v2226_v33, 2  ;;  %v2138_v8 = vrot.slane %v9460_v1, 7  ;;  %v2388_v33 = vsel %vm590_vm2, %v2385_v41, %v2387_v23 }
 0x2c9   : > { %v8394_v43 = vpack.i.bf16 %v2388_v33, %v2386_v12 }
 0x2ca   : > { %v2383_v20 = vsel %vm590_vm2, %v2380_v59, %v2382_v39  ;;  %v2228_v2 = vsel %vm343_vm0, %v2138_v8, 0.0 }
 0x2cb   : > { %5170 = vrot.lane.b32.xlu0 %v5149_v47, %s5596_s9 }
 0x2cc   : > { %5160 = vrot.lane.b32.xlu1 %v5149_v47, %s5598_s14  ;;  %v8376_v47 = vpack.i.bf16 %v2313_v28, %v2311_v40  ;;  %v2379_v40 = vrot.slane %v8346_v4, 2  ;;  %v9798_v28 = vmax.f32 %v8349_v14, 0.0  ;;  %v8433_v14 = vpack.i.bf16 %v8062_v56, %v7995_v21  ;;  %v9802_v21 = vld [vmem:[#allocation6_spill] sm:$0xff] }
 0x2cd   : > { %v8301_v46 = vpop.permute.xlu0 %4890  ;;  %v8308_v11 = vpop.permute.xlu1 %4885 }
 0x2ce   : > { %v2137_v1 = vrot.slane %v9798_v28, 7  ;;  %v2381_v41 = vsel %vm590_vm2, %v2379_v40, %v2380_v59  ;;  %v2317_v59 = vrot.slane %v2228_v2, 1  ;;  %v4878_v28 = vunpack.i.h.bf16 %v8229_v19 }
 0x2cf   : > { %5180 = vrot.lane.b32.xlu0 %v8354_v52, %s5592_s23  ;;  %v8413_v12 = vpack.i.bf16 %v2383_v20, %v2381_v41  ;;  %v4877_v41 = vunpack.i.l.bf16 %v8229_v19  ;;  %v2392_v20 = vrot.slane %v2228_v2, 2 }
 0x2d0   : > { %5175 = vrot.lane.b32.xlu1 %v8374_v7, %s5592_s23  ;;  %v8399_v23 = vsel %vm343_vm0, %v2137_v1, %v2138_v8  ;;  %v8411_v27 = vsel %vm343_vm0, 0.0, %v2137_v1  ;;  %vm3388_vm0 = vcmask 457728  }
 0x2d1   : > { %v8327_v36 = vpop.permute.xlu0 %4895  ;;  %v8335_v44 = vpop.permute.xlu1 %4910  ;;  %9799 = vst [vmem:[#allocation84_spill] sm:$0xff] %v8399_v23  ;;  %9800 = vst [vmem:[#allocation85_spill] sm:$0xff] %v8411_v27  ;;  %v8417_v33 = vpack.i.bf16 %v8399_v23, %v8411_v27  ;;  %v2315_v39 = vrot.slane %v8399_v23, 1  ;;  %v2314_v1 = vrot.slane %v8411_v27, 1  ;;  %v2390_v63 = vrot.slane %v8399_v23, 2  ;;  %v9801_v23 = vld [vmem:[#allocation5_spill] sm:$0xff] }
 0x2d2   : > { %v2389_v5 = vrot.slane %v8411_v27, 2  ;;  %v4898_v56 = vunpack.i.h.bf16 %v8327_v36  ;;  %v4897_v26 = vunpack.i.l.bf16 %v8327_v36 }
 0x2d3   : > { %5185 = vrot.lane.b32.xlu0 %v8376_v47, %s5588_s19  ;;  %v2316_v31 = vsel %vm509_vm1, %v2314_v1, %v2315_v39  ;;  %v2318_v4 = vsel %vm509_vm1, %v2315_v39, %v2317_v59  ;;  %v3195_v1 = vsel %vm1484_vm5, %v9801_v23, %v4878_v28  ;;  %v3194_v59 = vsel %vm1484_vm5, %v9802_v21, %v4877_v41 }
 0x2d4   : > { %5195 = vrot.lane.b32.xlu1 %v8392_v30, %s5588_s19  ;;  %v8451_v39 = vpack.i.bf16 %v2318_v4, %v2316_v31  ;;  %v2391_v27 = vsel %vm590_vm2, %v2389_v5, %v2390_v63  ;;  %v2393_v25 = vsel %vm590_vm2, %v2390_v63, %v2392_v20  ;;  %v3226_v49 = vsel %vm1550_vm7, %v3194_v59, %v4882_v55 }
 0x2d5   : > { %v8359_v13 = vpop.permute.xlu0 %4900  ;;  %v8365_v32 = vpop.permute.xlu1 %4915  ;;  %v3227_v34 = vsel %vm1550_vm7, %v3195_v1, %v4883_v57  ;;  %v8465_v5 = vpack.i.bf16 %v2393_v25, %v2391_v27  ;;  %v8469_v63 = vpack.i.bf16 %v8112_v10, %v8065_v61  ;;  %v8473_v57 = vpack.i.bf16 %v8121_v15, %v8073_v45 }
 0x2d6   : > { %vm3421_vm1 = vcmask 523264   ;;  %v3259_v55 = vsel %vm1616_vm9, %v3227_v34, %v4898_v56  ;;  %v3258_v23 = vsel %vm1616_vm9, %v3226_v49, %v4897_v26  ;;  %v4893_v41 = vunpack.i.h.bf16 %v8301_v46 }
 0x2d7   : > { %5190 = vrot.lane.b32.xlu0 %v8394_v43, %s5590_s21  ;;  %v4892_v20 = vunpack.i.l.bf16 %v8301_v46  ;;  %vm3506_vm2 = vcmask 588800  }
 0x2d8   : > { %5200 = vrot.lane.b32.xlu1 %v8413_v12, %s5590_s21 }
 0x2d9   : > { %v8383_v29 = vpop.permute.xlu0 %4905  ;;  %v8396_v51 = vpop.permute.xlu1 %4930 }
 0x2db   : > { %5210 = vrot.lane.b32.xlu0 %v8417_v33, %s5592_s23 }
 0x2dc   : > { %5205 = vrot.lane.b32.xlu1 %v8433_v14, %s5592_s23 }
 0x2dd   : > { %v8408_v60 = vpop.permute.xlu0 %4920  ;;  %v8424_v8 = vpop.permute.xlu1 %4935 }
 0x2de   : > { %v4923_v34 = vunpack.i.h.bf16 %v8408_v60  ;;  %v4922_v49 = vunpack.i.l.bf16 %v8408_v60 }
 0x2df   : > { %5215 = vrot.lane.b32.xlu0 %v8223_v53, %s5588_s19 }
 0x2e0   : > { %5225 = vrot.lane.b32.xlu1 %v8451_v39, %s5588_s19 }
 0x2e1   : > { %v8426_v40 = vpop.permute.xlu0 %4925  ;;  %v8445_v19 = vpop.permute.xlu1 %4950 }
 0x2e2   : > { %v4928_v46 = vunpack.i.h.bf16 %v8426_v40  ;;  %v4927_v59 = vunpack.i.l.bf16 %v8426_v40 }
 0x2e3   : > { %5220 = vrot.lane.b32.xlu0 %v8226_v50, %s5590_s21 }
 0x2e4   : > { %5230 = vrot.lane.b32.xlu1 %v8465_v5, %s5590_s21 }
 0x2e5   : > { %v4941_v2 = vpop.permute.xlu0 %4940  ;;  %v8463_v4 = vpop.permute.xlu1 %4965 }
 0x2e6   : > { %v4943_v21 = vunpack.i.h.bf16 %v4941_v2  ;;  %v4942_v31 = vunpack.i.l.bf16 %v4941_v2 }
 0x2e7   : > { %5240 = vrot.lane.b32.xlu0 %v8473_v57, %s5592_s23 }
 0x2e8   : > { %v3291_v2 = vsel %vm1682_vm11, %v3259_v55, %v4943_v21  ;;  %v3290_v1 = vsel %vm1682_vm11, %v3258_v23, %v4942_v31  ;;  %5235 = vrot.lane.b32.xlu1 %v8469_v63, %s5592_s23 }
 0x2e9   : > { %v4946_v36 = vpop.permute.xlu0 %4945  ;;  %v8491_v25 = vpop.permute.xlu1 %4980 }
 0x2ea   : > { %v4948_v28 = vunpack.i.h.bf16 %v4946_v36  ;;  %v4947_v27 = vunpack.i.l.bf16 %v4946_v36 }
 0x2eb   : > { %5245 = vrot.lane.b32.xlu0 %v8240_v0, %s5588_s19 }
 0x2ec   : > { %v3323_v56 = vsel %vm3322_vm14, %v3290_v1, %v4947_v27  ;;  %v3324_v26 = vsel %vm3322_vm14, %v3291_v2, %v4948_v28  ;;  %5255 = vrot.lane.b32.xlu1 %v8233_v42, %s5588_s19  ;;  %v4933_v2 = vunpack.i.h.bf16 %v8396_v51  ;;  %v4932_v1 = vunpack.i.l.bf16 %v8396_v51 }
 0x2ed   : > { %v8493_v21 = vpop.permute.xlu0 %4955  ;;  %v3356_v31 = vsel %vm3355_vm15, %v3323_v56, %v4892_v20  ;;  %v3357_v36 = vsel %vm3355_vm15, %v3324_v26, %v4893_v41  ;;  %v8508_v27 = vpop.permute.xlu1 %4985  ;;  %v8516_v20 = vpack.i.bf16 %v8147_v3, %v8124_v9  ;;  %v4937_v56 = vunpack.i.l.bf16 %v8424_v8 }
 0x2ee   : > { %v3389_v55 = vsel %vm3388_vm0, %v3356_v31, %v4922_v49  ;;  %v3390_v60 = vsel %vm3388_vm0, %v3357_v36, %v4923_v34  ;;  %v4938_v49 = vunpack.i.h.bf16 %v8424_v8  ;;  %v3196_v51 = vsel %vm1484_vm5, %v7646_v24, %v4932_v1 }
 0x2ef   : > { %v3422_v40 = vsel %vm3421_vm1, %v3389_v55, %v4927_v59  ;;  %v3423_v23 = vsel %vm3421_vm1, %v3390_v60, %v4928_v46  ;;  %5250 = vrot.lane.b32.xlu0 %v8242_v54, %s5590_s21  ;;  %v3197_v46 = vsel %vm1484_vm5, %v7638_v58, %v4933_v2  ;;  %v3228_v59 = vsel %vm1550_vm7, %v3196_v51, %v4937_v56 }
 0x2f0   : > { %v3454_v28 = vpack.c.bf16 %v3423_v23, %v3422_v40  ;;  %5260 = vrot.lane.b32.xlu1 %v8235_v35, %s5590_s21  ;;  %v3229_v31 = vsel %vm1550_vm7, %v3197_v46, %v4938_v49  ;;  %v4888_v8 = vunpack.i.h.bf16 %v8308_v11  ;;  %v4887_v55 = vunpack.i.l.bf16 %v8308_v11 }
 0x2f1   : > { %v8512_v41 = vpop.permute.xlu0 %4960  ;;  %v8528_v26 = vpop.permute.xlu1 %5000  ;;  %v4912_v40 = vunpack.i.l.bf16 %v8335_v44  ;;  %v4968_v1 = vunpack.i.h.bf16 %v8463_v4  ;;  %v4967_v49 = vunpack.i.l.bf16 %v8463_v4  ;;  %v4917_v56 = vunpack.i.l.bf16 %v8365_v32 }
 0x2f2   : > { %4148 = vmatprep.mubr.msk.bf16.mxu1 %vm3506_vm2, %v3454_v28  ;;  %v3260_v24 = vsel %vm1616_vm9, %v3228_v59, %v4887_v55  ;;  %v3261_v60 = vsel %vm1616_vm9, %v3229_v31, %v4888_v8 }
 0x2f3   : > { %5270 = vrot.lane.b32.xlu0 %v8516_v20, %s5592_s23  ;;  %v3292_v11 = vsel %vm1682_vm11, %v3260_v24, %v4912_v40 }
 0x2f4   : > { %5265 = vrot.lane.b32.xlu1 %v8251_v17, %s5592_s23 }
 0x2f5   : > { %v8524_v34 = vpop.permute.xlu0 %4970 }
 0x2f6   : > { %v8544_v58 = vpop.permute.xlu1 %5005 }
 0x2f7   : > { %5275 = vrot.lane.b32.xlu0 %v8171_v16, %s5595_s8  ;;  %v4913_v16 = vunpack.i.h.bf16 %v8335_v44  ;;  %v3325_v44 = vsel %vm3322_vm14, %v3292_v11, %v4917_v56  ;;  %v4908_v11 = vunpack.i.h.bf16 %v8383_v29  ;;  %v4963_v56 = vunpack.i.h.bf16 %v8512_v41 }
 0x2f8   : > { %5280 = vrot.lane.b32.xlu1 %v8354_v52, %s5595_s8  ;;  %v4918_v52 = vunpack.i.h.bf16 %v8365_v32  ;;  %v3358_v8 = vsel %vm3355_vm15, %v3325_v44, %v4967_v49 }
 0x2f9   : > { %v8540_v36 = vpop.permute.xlu0 %4975  ;;  %v3293_v2 = vsel %vm1682_vm11, %v3261_v60, %v4913_v16  ;;  %v4902_v16 = vunpack.i.l.bf16 %v8359_v13 }
 0x2fa   : > { %v5016_v23 = vpop.permute.xlu1 %5015  ;;  %v3326_v51 = vsel %vm3322_vm14, %v3293_v2, %v4918_v52  ;;  %v4907_v2 = vunpack.i.l.bf16 %v8383_v29 }
 0x2fb   : > { %5285 = vrot.lane.b32.xlu0 %v8176_v6, %s5597_s13  ;;  %v5018_v6 = vunpack.i.h.bf16 %v5016_v23  ;;  %v5017_v46 = vunpack.i.l.bf16 %v5016_v23  ;;  %v3359_v4 = vsel %vm3355_vm15, %v3326_v51, %v4968_v1  ;;  %v3198_v29 = vsel %vm1484_vm5, %v7630_v37, %v4902_v16 }
 0x2fc   : > { %5290 = vrot.lane.b32.xlu1 %v8245_v22, %s5588_s19  ;;  %v3230_v51 = vsel %vm1550_vm7, %v3198_v29, %v4907_v2  ;;  %v4957_v37 = vunpack.i.l.bf16 %v8493_v21  ;;  %v5002_v29 = vunpack.i.l.bf16 %v8528_v26  ;;  %s5526_s19 = sshll.u32 %s5599_s28, 4  ;;  %s5527_s19 = int_to_ptr.vmem [resolvable:$false] %s5526_s19 }
 0x2fd   : > { %v8554_v28 = vpop.permute.xlu0 %4990  ;;  %v3392_v24 = vsel %vm3388_vm0, %v3359_v4, %v5018_v6  ;;  %v3391_v60 = vsel %vm3388_vm0, %v3358_v8, %v5017_v46  ;;  %v4962_v6 = vunpack.i.l.bf16 %v8512_v41 }
 0x2fe   : > { %v5021_v59 = vpop.permute.xlu1 %5020 }
 0x2ff   : > { %5305 = vrot.lane.b32.xlu0 %v8179_v48, %s5598_s14  ;;  %v5023_v55 = vunpack.i.h.bf16 %v5021_v59  ;;  %v5022_v32 = vunpack.i.l.bf16 %v5021_v59  ;;  %v4903_v48 = vunpack.i.h.bf16 %v8359_v13  ;;  %v3262_v8 = vsel %vm1616_vm9, %v3230_v51, %v4962_v6 }
 0x300   : > { %5295 = vrot.lane.b32.xlu1 %v8247_v62, %s5590_s21  ;;  %v5007_v51 = vunpack.i.l.bf16 %v8544_v58  ;;  %s5528_s21 = scalar_lea.vmem %s5527_s19, 512 }
 0x301   : > { %v4996_v31 = vpop.permute.xlu0 %4995  ;;  %v3424_v40 = vsel %vm3421_vm1, %v3391_v60, %v5022_v32  ;;  %v3425_v23 = vsel %vm3421_vm1, %v3392_v24, %v5023_v55  ;;  %v3199_v44 = vsel %vm1484_vm5, %v7624_v38, %v4903_v48  ;;  %v4958_v38 = vunpack.i.h.bf16 %v8493_v21 }
 0x302   : > { %v8582_v1 = vpop.permute.xlu1 %5030  ;;  %v3455_v49 = vpack.c.bf16 %v3425_v23, %v3424_v40  ;;  %v3231_v41 = vsel %vm1550_vm7, %v3199_v44, %v4908_v11  ;;  %v4993_v40 = vunpack.i.h.bf16 %v8554_v28  ;;  %v4992_v23 = vunpack.i.l.bf16 %v8554_v28 }
 0x303   : > { %5315 = vrot.lane.b32.xlu0 %v8392_v30, %s5594_s17 }
 0x304   : > { %4149 = vmatmul.mubr.msk.bf16.vlgmr.msra.gmra.mrb[0].mxu1 %vm3506_vm2, %v3455_v49  ;;  %5300 = vrot.lane.b32.xlu1 %v8392_v30, %s5597_s13  ;;  %v3263_v30 = vsel %vm1616_vm9, %v3231_v41, %v4963_v56 }
 0x305   : > { %v5011_v52 = vpop.permute.xlu0 %5010 }
 0x306   : > { %v5013_v13 = vunpack.i.h.bf16 %v5011_v52  ;;  %v5012_v46 = vunpack.i.l.bf16 %v5011_v52  ;;  %v8597_v59 = vpop.permute.xlu1 %5045  ;;  %v4997_v52 = vunpack.i.l.bf16 %v4996_v31 }
 0x307   : > { %5325 = vrot.lane.b32.xlu0 %v8413_v12, %s5596_s9 }
 0x308   : > { %v3295_v24 = vsel %vm1682_vm11, %v3263_v30, %v5013_v13  ;;  %v3294_v60 = vsel %vm1682_vm11, %v3262_v8, %v5012_v46  ;;  %5310 = vrot.lane.b32.xlu1 %v8413_v12, %s5598_s14  ;;  %v4998_v12 = vunpack.i.h.bf16 %v4996_v31  ;;  %v5003_v31 = vunpack.i.h.bf16 %v8528_v26  ;;  %v9803_v8 = vld [vmem:[#allocation40_spill] sm:$0xff] }
 0x309   : > { %v5026_v4 = vpop.permute.xlu0 %5025  ;;  %v3200_v26 = vsel %vm1484_vm5, %v9803_v8, %v5002_v29  ;;  %v4987_v29 = vunpack.i.l.bf16 %v8508_v27 }
 0x30a   : > { %v5028_v55 = vunpack.i.h.bf16 %v5026_v4  ;;  %v5027_v32 = vunpack.i.l.bf16 %v5026_v4  ;;  %v8615_v2 = vpop.permute.xlu1 %5060  ;;  %v3201_v30 = vsel %vm1484_vm5, %v7742_v18, %v5003_v31  ;;  %v4988_v31 = vunpack.i.h.bf16 %v8508_v27 }
 0x30b   : > { %5335 = vrot.lane.b32.xlu0 %v8374_v7, %s5595_s8 }
 0x30c   : > { %v3327_v48 = vsel %vm3322_vm14, %v3294_v60, %v5027_v32  ;;  %v3328_v16 = vsel %vm3322_vm14, %v3295_v24, %v5028_v55  ;;  %5320 = vrot.lane.b32.xlu1 %v8376_v47, %s5594_s17 }
 0x30d   : > { %v3360_v21 = vsel %vm3355_vm15, %v3327_v48, %v4957_v37  ;;  %v3361_v11 = vsel %vm3355_vm15, %v3328_v16, %v4958_v38  ;;  %v8617_v49 = vpop.permute.xlu0 %5035  ;;  %v3232_v38 = vsel %vm1550_vm7, %v3200_v26, %v5007_v51  ;;  %v4952_v37 = vunpack.i.l.bf16 %v8445_v19 }
 0x30e   : > { %v3393_v56 = vsel %vm3388_vm0, %v3360_v21, %v4992_v23  ;;  %v3394_v7 = vsel %vm3388_vm0, %v3361_v11, %v4993_v40  ;;  %v8627_v13 = vpop.permute.xlu1 %5065  ;;  %v9804_v40 = vld [vmem:[#allocation53_spill] sm:$0xff]  ;;  %v9805_v21 = vld [vmem:[#allocation48_spill] sm:$0xff] }
 0x30f   : > { %5345 = vrot.lane.b32.xlu0 %v8376_v47, %s5597_s13  ;;  %v3426_v28 = vsel %vm3421_vm1, %v3393_v56, %v4997_v52  ;;  %v3427_v6 = vsel %vm3421_vm1, %v3394_v7, %v4998_v12  ;;  %v5008_v47 = vunpack.i.h.bf16 %v8544_v58  ;;  %v4982_v12 = vunpack.i.l.bf16 %v8491_v25 }
 0x310   : > { %v3456_v44 = vpack.c.bf16 %v3427_v6, %v3426_v28  ;;  %5330 = vrot.lane.b32.xlu1 %v8394_v43, %s5596_s9 }
 0x311   : > { %v8629_v46 = vpop.permute.xlu0 %5040  ;;  %v3233_v58 = vsel %vm1550_vm7, %v3201_v30, %v5008_v47 }
 0x312   : > { %4152 = vmatprep.mubr.msk.bf16.mxu1 %vm3506_vm2, %v3456_v44  ;;  %v8640_v41 = vpop.permute.xlu1 %5080  ;;  %v5048_v44 = vunpack.i.h.bf16 %v8597_v59 }
 0x313   : > { %5355 = vrot.lane.b32.xlu0 %v8394_v43, %s5598_s14  ;;  %v4953_v43 = vunpack.i.h.bf16 %v8445_v19  ;;  %v4983_v19 = vunpack.i.h.bf16 %v8491_v25  ;;  %v5047_v25 = vunpack.i.l.bf16 %v8597_v59 }
 0x314   : > { %5340 = vrot.lane.b32.xlu1 %v8417_v33, %s5595_s8  ;;  %v3264_v33 = vsel %vm1616_vm9, %v3232_v38, %v4952_v37 }
 0x315   : > { %v5051_v4 = vpop.permute.xlu0 %5050  ;;  %v3265_v16 = vsel %vm1616_vm9, %v3233_v58, %v4953_v43  ;;  %v3296_v6 = vsel %vm1682_vm11, %v3264_v33, %v4982_v12 }
 0x316   : > { %v5053_v55 = vunpack.i.h.bf16 %v5051_v4  ;;  %v5052_v32 = vunpack.i.l.bf16 %v5051_v4  ;;  %v8654_v18 = vpop.permute.xlu1 %5085  ;;  %v3329_v4 = vsel %vm3322_vm14, %v3296_v6, %v4987_v29  ;;  %v5038_v29 = vunpack.i.h.bf16 %v8617_v49 }
 0x317   : > { %5365 = vrot.lane.b32.xlu0 %v8451_v39, %s5594_s17 }
 0x318   : > { %v3207_v23 = vsel %vm1484_vm5, %v9804_v40, %v5053_v55  ;;  %v3206_v11 = vsel %vm1484_vm5, %v9805_v21, %v5052_v32  ;;  %5350 = vrot.lane.b32.xlu1 %v8451_v39, %s5597_s13  ;;  %v3297_v39 = vsel %vm1682_vm11, %v3265_v16, %v4983_v19  ;;  %v3362_v55 = vsel %vm3355_vm15, %v3329_v4, %v5047_v25  ;;  %v9807_v19 = vld [vmem:[#allocation35_spill] sm:$0xff] }
 0x319   : > { %v5056_v24 = vpop.permute.xlu0 %5055  ;;  %v3330_v30 = vsel %vm3322_vm14, %v3297_v39, %v4988_v31  ;;  %v5043_v40 = vunpack.i.h.bf16 %v8629_v46 }
 0x31a   : > { %v5058_v60 = vunpack.i.h.bf16 %v5056_v24  ;;  %v5057_v48 = vunpack.i.l.bf16 %v5056_v24  ;;  %v5091_v7 = vpop.permute.xlu1 %5090  ;;  %v3363_v59 = vsel %vm3355_vm15, %v3330_v30, %v5048_v44  ;;  %v4978_v24 = vunpack.i.h.bf16 %v8540_v36 }
 0x31b   : > { %5375 = vrot.lane.b32.xlu0 %v8465_v5, %s5596_s9  ;;  %v5093_v47 = vunpack.i.h.bf16 %v5091_v7  ;;  %v5092_v51 = vunpack.i.l.bf16 %v5091_v7 }
 0x31c   : > { %v8667_v52 = vsel %vm1550_vm7, %v3206_v11, %v5057_v48  ;;  %v8670_v56 = vsel %vm1550_vm7, %v3207_v23, %v5058_v60  ;;  %5360 = vrot.lane.b32.xlu1 %v8465_v5, %s5598_s14  ;;  %v4972_v5 = vunpack.i.l.bf16 %v8524_v34  ;;  %v4977_v60 = vunpack.i.l.bf16 %v8540_v36 }
 0x31d   : > { %v8674_v28 = vpop.permute.xlu0 %5070  ;;  %v3396_v38 = vsel %vm3388_vm0, %v3363_v59, %v5093_v47  ;;  %v3395_v58 = vsel %vm3388_vm0, %v3362_v55, %v5092_v51  ;;  %v5042_v23 = vunpack.i.l.bf16 %v8629_v46  ;;  %v5037_v47 = vunpack.i.l.bf16 %v8617_v49 }
 0x31e   : > { %v5096_v8 = vpop.permute.xlu1 %5095  ;;  %v3202_v36 = vsel %vm1484_vm5, %v9807_v19, %v4972_v5  ;;  %v5072_v59 = vunpack.i.l.bf16 %v8674_v28  ;;  %v5088_v5 = vunpack.i.h.bf16 %v8654_v18  ;;  %v5032_v19 = vunpack.i.l.bf16 %v8582_v1 }
 0x31f   : > { %5385 = vrot.lane.b32.xlu0 %v8433_v14, %s5595_s8  ;;  %v5098_v32 = vunpack.i.h.bf16 %v5096_v8  ;;  %v5097_v27 = vunpack.i.l.bf16 %v5096_v8  ;;  %v4973_v14 = vunpack.i.h.bf16 %v8524_v34  ;;  %v3234_v12 = vsel %vm1550_vm7, %v3202_v36, %v4977_v60 }
 0x320   : > { %5370 = vrot.lane.b32.xlu1 %v8223_v53, %s5594_s17  ;;  %v3266_v44 = vsel %vm1616_vm9, %v3234_v12, %v5042_v23  ;;  %v5073_v8 = vunpack.i.h.bf16 %v8674_v28 }
 0x321   : > { %v5076_v26 = vpop.permute.xlu0 %5075  ;;  %v3428_v43 = vsel %vm3421_vm1, %v3395_v58, %v5097_v27  ;;  %v3429_v37 = vsel %vm3421_vm1, %v3396_v38, %v5098_v32  ;;  %v5082_v38 = vunpack.i.l.bf16 %v8640_v41 }
 0x322   : > { %v3457_v48 = vpack.c.bf16 %v3429_v37, %v3428_v43  ;;  %v8702_v33 = vpop.permute.xlu1 %5110  ;;  %v5078_v58 = vunpack.i.h.bf16 %v5076_v26  ;;  %v5087_v43 = vunpack.i.l.bf16 %v8654_v18 }
 0x323   : > { %5395 = vrot.lane.b32.xlu0 %v8223_v53, %s5597_s13  ;;  %v9806_v53 = vld [vmem:[#allocation39_spill] sm:$0xff] }
 0x324   : > { %4153 = vmatmul.mubr.msk.bf16.gmra.mrb[4].mxu1 %vm3506_vm2, %v3457_v48  ;;  %5380 = vrot.lane.b32.xlu1 %v8226_v50, %s5596_s9  ;;  %v3203_v11 = vsel %vm1484_vm5, %v9806_v53, %v4973_v14  ;;  %v5077_v14 = vunpack.i.l.bf16 %v5076_v26 }
 0x325   : > { %v5101_v16 = vpop.permute.xlu0 %5100  ;;  %v3235_v46 = vsel %vm1550_vm7, %v3203_v11, %v4978_v24  ;;  %v5033_v11 = vunpack.i.h.bf16 %v8582_v1  ;;  %v5062_v1 = vunpack.i.l.bf16 %v8615_v2 }
 0x326   : > { %v5103_v34 = vunpack.i.h.bf16 %v5101_v16  ;;  %v5102_v21 = vunpack.i.l.bf16 %v5101_v16  ;;  %v8717_v7 = vpop.permute.xlu1 %5120  ;;  %v3267_v39 = vsel %vm1616_vm9, %v3235_v46, %v5043_v40  ;;  %v9808_v16 = vld [vmem:[#allocation55_spill] sm:$0xff]  ;;  %v9809_v40 = vld [vmem:[#allocation50_spill] sm:$0xff] }
 0x327   : > { %5405 = vrot.lane.b32.xlu0 %v8226_v50, %s5598_s14 }
 0x328   : > { %v3299_v51 = vsel %vm1682_vm11, %v3267_v39, %v5103_v34  ;;  %v3298_v50 = vsel %vm1682_vm11, %v3266_v44, %v5102_v21  ;;  %5390 = vrot.lane.b32.xlu1 %v8473_v57, %s5595_s8  ;;  %v5083_v57 = vunpack.i.h.bf16 %v8640_v41 }
 0x329   : > { %v5106_v6 = vpop.permute.xlu0 %5105 }
 0x32a   : > { %v5108_v25 = vunpack.i.h.bf16 %v5106_v6  ;;  %v5107_v31 = vunpack.i.l.bf16 %v5106_v6  ;;  %v8735_v32 = vpop.permute.xlu1 %5135  ;;  %v3205_v18 = vsel %vm1484_vm5, %v9808_v16, %v5083_v57 }
 0x32b   : > { %5415 = vrot.lane.b32.xlu0 %v8233_v42, %s5594_s17  ;;  %v3237_v34 = vsel %vm1550_vm7, %v3205_v18, %v5088_v5  ;;  %v9813_v5 = vld [vmem:[#allocation56_spill] sm:$0xff] }
 0x32c   : > { %v3331_v4 = vsel %vm3322_vm14, %v3298_v50, %v5107_v31  ;;  %v3332_v30 = vsel %vm3322_vm14, %v3299_v51, %v5108_v25  ;;  %5400 = vrot.lane.b32.xlu1 %v8233_v42, %s5597_s13  ;;  %v3204_v42 = vsel %vm1484_vm5, %v9809_v40, %v5082_v38  ;;  %v3269_v6 = vsel %vm1616_vm9, %v3237_v34, %v5033_v11  ;;  %v9811_v31 = vld [vmem:[#allocation54_spill] sm:$0xff] }
 0x32d   : > { %v3364_v49 = vsel %vm3355_vm15, %v3331_v4, %v5037_v47  ;;  %v3365_v55 = vsel %vm3355_vm15, %v3332_v30, %v5038_v29  ;;  %v8737_v27 = vpop.permute.xlu0 %5115  ;;  %v3236_v23 = vsel %vm1550_vm7, %v3204_v42, %v5087_v43  ;;  %v5113_v38 = vunpack.i.h.bf16 %v8702_v33 }
 0x32e   : > { %v3397_v28 = vsel %vm3388_vm0, %v3364_v49, %v5072_v59  ;;  %v3398_v37 = vsel %vm3388_vm0, %v3365_v55, %v5073_v8  ;;  %v8751_v60 = vpop.permute.xlu1 %5140  ;;  %v3268_v46 = vsel %vm1616_vm9, %v3236_v23, %v5032_v19  ;;  %v5067_v40 = vunpack.i.l.bf16 %v8627_v13 }
 0x32f   : > { %5425 = vrot.lane.b32.xlu0 %v8235_v35, %s5596_s9  ;;  %v3430_v24 = vsel %vm3421_vm1, %v3397_v28, %v5077_v14  ;;  %v3431_v41 = vsel %vm3421_vm1, %v3398_v37, %v5078_v58  ;;  %v3300_v59 = vsel %vm1682_vm11, %v3268_v46, %v5062_v1  ;;  %v9812_v58 = vld [vmem:[#allocation59_spill] sm:$0xff]  ;;  %v5122_v28 = vunpack.i.l.bf16 %v8717_v7 }
 0x330   : > { %v3458_v48 = vpack.c.bf16 %v3431_v41, %v3430_v24  ;;  %5410 = vrot.lane.b32.xlu1 %v8235_v35, %s5598_s14  ;;  %v9810_v35 = vld [vmem:[#allocation58_spill] sm:$0xff]  ;;  %v5137_v41 = vunpack.i.l.bf16 %v8735_v32  ;;  %v5143_v42 = vunpack.i.h.bf16 %v8751_v60  ;;  %v5142_v23 = vunpack.i.l.bf16 %v8751_v60 }
 0x331   : > { %v5126_v26 = vpop.permute.xlu0 %5125 }
 0x332   : > { %v5128_v21 = vunpack.i.h.bf16 %v5126_v26  ;;  %v5127_v53 = vunpack.i.l.bf16 %v5126_v26  ;;  %4156 = vmatprep.mubr.msk.bf16.mxu1 %vm3506_vm2, %v3458_v48  ;;  %v5146_v36 = vpop.permute.xlu1 %5145 }
 0x333   : > { %5435 = vrot.lane.b32.xlu0 %v8469_v63, %s5595_s8  ;;  %v5148_v47 = vunpack.i.h.bf16 %v5146_v36  ;;  %v5147_v51 = vunpack.i.l.bf16 %v5146_v36  ;;  %v5063_v63 = vunpack.i.h.bf16 %v8615_v2  ;;  %v5112_v2 = vunpack.i.l.bf16 %v8702_v33 }
 0x334   : > { %v3211_v25 = vsel %vm1484_vm5, %v9810_v35, %v5128_v21  ;;  %v3210_v29 = vsel %vm1484_vm5, %v9811_v31, %v5127_v53  ;;  %5420 = vrot.lane.b32.xlu1 %v8240_v0, %s5594_s17  ;;  %v5138_v33 = vunpack.i.h.bf16 %v8735_v32  ;;  %v3333_v53 = vsel %vm3322_vm14, %v3300_v59, %v5067_v40  ;;  %v9818_v40 = vld [vmem:[#allocation82_spill] sm:$0xff] }
 0x335   : > { %v5131_v12 = vpop.permute.xlu0 %5130  ;;  %v3301_v49 = vsel %vm1682_vm11, %v3269_v6, %v5063_v63  ;;  %v3209_v14 = vsel %vm1484_vm5, %v9812_v58, %v5148_v47  ;;  %v3208_v43 = vsel %vm1484_vm5, %v9813_v5, %v5147_v51  ;;  %v3366_v60 = vsel %vm3355_vm15, %v3333_v53, %v5122_v28 }
 0x336   : > { %v5133_v39 = vunpack.i.h.bf16 %v5131_v12  ;;  %v5132_v44 = vunpack.i.l.bf16 %v5131_v12  ;;  %v5151_v30 = vpop.permute.xlu1 %5150 }
 0x337   : > { %5445 = vrot.lane.b32.xlu0 %v8240_v0, %s5597_s13  ;;  %v5153_v55 = vunpack.i.h.bf16 %v5151_v30  ;;  %v5152_v57 = vunpack.i.l.bf16 %v5151_v30  ;;  %v5123_v0 = vunpack.i.h.bf16 %v8717_v7  ;;  %v5068_v7 = vunpack.i.h.bf16 %v8627_v13 }
 0x338   : > { %v3242_v50 = vsel %vm1550_vm7, %v3210_v29, %v5132_v44  ;;  %v3243_v4 = vsel %vm1550_vm7, %v3211_v25, %v5133_v39  ;;  %5430 = vrot.lane.b32.xlu1 %v8242_v54, %s5596_s9 }
 0x339   : > { %v8780_v8 = vpop.permute.xlu0 %5165  ;;  %v3240_v37 = vsel %vm1550_vm7, %v3208_v43, %v5152_v57  ;;  %v3241_v24 = vsel %vm1550_vm7, %v3209_v14, %v5153_v55  ;;  %v3334_v11 = vsel %vm3322_vm14, %v3301_v49, %v5068_v7  ;;  %v9814_v57 = vld [vmem:[#allocation78_spill] sm:$0xff]  ;;  %v9816_v43 = vld [vmem:[#allocation72_spill] sm:$0xff] }
 0x33a   : > { %v3272_v26 = vsel %vm1616_vm9, %v3240_v37, %v5112_v2  ;;  %v3273_v48 = vsel %vm1616_vm9, %v3241_v24, %v5113_v38  ;;  %v5156_v16 = vpop.permute.xlu1 %5155  ;;  %v3367_v13 = vsel %vm3355_vm15, %v3334_v11, %v5123_v0  ;;  %v9815_v2 = vld [vmem:[#allocation79_spill] sm:$0xff] }
 0x33b   : > { %5455 = vrot.lane.b32.xlu0 %v8242_v54, %s5598_s14  ;;  %v5158_v54 = vunpack.i.h.bf16 %v5156_v16  ;;  %v5157_v34 = vunpack.i.l.bf16 %v5156_v16  ;;  %v3304_v32 = vsel %vm1682_vm11, %v3272_v26, %v5137_v41  ;;  %v3305_v21 = vsel %vm1682_vm11, %v3273_v48, %v5138_v33  ;;  %v9817_v16 = vld [vmem:[#allocation81_spill] sm:$0xff] }
 0x33c   : > { %5440 = vrot.lane.b32.xlu1 %v8516_v20, %s5595_s8  ;;  %v8819_v12 = vsel %vm3322_vm14, %v3304_v32, %v5142_v23  ;;  %v8822_v20 = vsel %vm3322_vm14, %v3305_v21, %v5143_v42  ;;  %v9819_v23 = vld [vmem:[#allocation73_spill] sm:$0xff] }
 0x33d   : > { %v8802_v18 = vpop.permute.xlu0 %5170  ;;  %v3400_v35 = vsel %vm3388_vm0, %v3367_v13, %v5158_v54  ;;  %v3399_v25 = vsel %vm3388_vm0, %v3366_v60, %v5157_v34 }
 0x33e   : > { %v5161_v19 = vpop.permute.xlu1 %5160 }
 0x33f   : > { %5465 = vrot.lane.b32.xlu0 %v8245_v22, %s5594_s17  ;;  %v5163_v46 = vunpack.i.h.bf16 %v5161_v19  ;;  %v5162_v6 = vunpack.i.l.bf16 %v5161_v19  ;;  %v9820_v19 = vld [vmem:[#allocation51_spill] sm:$0xff] }
 0x340   : > { %5450 = vrot.lane.b32.xlu1 %v8245_v22, %s5597_s13 }
 0x341   : > { %v5181_v36 = vpop.permute.xlu0 %5180  ;;  %v3432_v31 = vsel %vm3421_vm1, %v3399_v25, %v5162_v6  ;;  %v3433_v29 = vsel %vm3421_vm1, %v3400_v35, %v5163_v46  ;;  %v9821_v25 = vld [vmem:[#allocation71_spill] sm:$0xff] }
 0x342   : > { %v5183_v39 = vunpack.i.h.bf16 %v5181_v36  ;;  %v5182_v44 = vunpack.i.l.bf16 %v5181_v36  ;;  %v3459_v63 = vpack.c.bf16 %v3433_v29, %v3432_v31  ;;  %v5176_v1 = vpop.permute.xlu1 %5175  ;;  %v9822_v29 = vld [vmem:[#allocation63_spill] sm:$0xff] }
 0x343   : > { %5475 = vrot.lane.b32.xlu0 %v8247_v62, %s5596_s9  ;;  %v5178_v26 = vunpack.i.h.bf16 %v5176_v1  ;;  %v5177_v48 = vunpack.i.l.bf16 %v5176_v1 }
 0x344   : > { %v8831_v47 = vsel %vm1616_vm9, %v3243_v4, %v5183_v39  ;;  %v8834_v51 = vsel %vm1616_vm9, %v3242_v50, %v5182_v44  ;;  %4157 = vmatmul.mubr.msk.bf16.gmra.mrb[8].mxu1 %vm3506_vm2, %v3459_v63  ;;  %5460 = vrot.lane.b32.xlu1 %v8247_v62, %s5598_s14 }
 0x345   : > { %v5186_v30 = vpop.permute.xlu0 %5185 }
 0x346   : > { %v5188_v22 = vunpack.i.h.bf16 %v5186_v30  ;;  %v5187_v59 = vunpack.i.l.bf16 %v5186_v30  ;;  %v5196_v4 = vpop.permute.xlu1 %5195 }
 0x347   : > { %5485 = vrot.lane.b32.xlu0 %v8251_v17, %s5595_s8  ;;  %v5198_v14 = vunpack.i.h.bf16 %v5196_v4  ;;  %v5197_v5 = vunpack.i.l.bf16 %v5196_v4 }
 0x348   : > { %v3215_v38 = vsel %vm1484_vm5, %v9814_v57, %v5188_v22  ;;  %v3214_v58 = vsel %vm1484_vm5, %v9815_v2, %v5187_v59  ;;  %5470 = vrot.lane.b32.xlu1 %v9816_v43, %s5594_s17  ;;  %v9823_v22 = vld [vmem:[#allocation7_spill] sm:$0xff] }
 0x349   : > { %v5191_v49 = vpop.permute.xlu0 %5190  ;;  %v3213_v7 = vsel %vm1484_vm5, %v9817_v16, %v5198_v14  ;;  %v3212_v42 = vsel %vm1484_vm5, %v9818_v40, %v5197_v5  ;;  %v9824_v5 = vld [vmem:[#allocation84_spill] sm:$0xff] }
 0x34a   : > { %v5193_v50 = vunpack.i.h.bf16 %v5191_v49  ;;  %v5192_v55 = vunpack.i.l.bf16 %v5191_v49  ;;  %v5201_v17 = vpop.permute.xlu1 %5200 }
 0x34b   : > { %5495 = vrot.lane.b32.xlu0 %v9816_v43, %s5597_s13  ;;  %v5203_v37 = vunpack.i.h.bf16 %v5201_v17  ;;  %v5202_v24 = vunpack.i.l.bf16 %v5201_v17  ;;  %v9826_v17 = vld [vmem:[#allocation45_spill] sm:$0xff] }
 0x34c   : > { %v3246_v62 = vsel %vm1550_vm7, %v3214_v58, %v5192_v55  ;;  %v3247_v0 = vsel %vm1550_vm7, %v3215_v38, %v5193_v50  ;;  %5480 = vrot.lane.b32.xlu1 %v9819_v23, %s5596_s9 }
 0x34d   : > { %v5211_v28 = vpop.permute.xlu0 %5210  ;;  %v3244_v54 = vsel %vm1550_vm7, %v3212_v42, %v5202_v24  ;;  %v3245_v34 = vsel %vm1550_vm7, %v3213_v7, %v5203_v37 }
 0x34e   : > { %v5213_v33 = vunpack.i.h.bf16 %v5211_v28  ;;  %v5212_v41 = vunpack.i.l.bf16 %v5211_v28  ;;  %v5206_v53 = vpop.permute.xlu1 %5205  ;;  %v8870_v13 = vsel %vm1616_vm9, %v3244_v54, %v5177_v48  ;;  %v8873_v60 = vsel %vm1616_vm9, %v3245_v34, %v5178_v26 }
 0x34f   : > { %5505 = vrot.lane.b32.xlu0 %v9819_v23, %s5598_s14  ;;  %v5208_v58 = vunpack.i.h.bf16 %v5206_v53  ;;  %v5207_v14 = vunpack.i.l.bf16 %v5206_v53 }
 0x350   : > { %v8862_v32 = vsel %vm1616_vm9, %v3247_v0, %v5213_v33  ;;  %v8865_v21 = vsel %vm1616_vm9, %v3246_v62, %v5212_v41  ;;  %5490 = vrot.lane.b32.xlu1 %v9820_v19, %s5595_s8  ;;  %v9825_v62 = vld [vmem:[#allocation85_spill] sm:$0xff]  ;;  %s269_s8 = sand.u32 1, %s5576_s25  }
 0x351   : > { %v5216_v11 = vpop.permute.xlu0 %5215  ;;  %s4006_s9 = sshll.u32 %s269_s8, 4  ;;  %s3929_s18 = scalar_lea.sflag [#allocation3], %s269_s8 }
 0x352   : > { %v5218_v36 = vunpack.i.h.bf16 %v5216_v11  ;;  %v5217_v46 = vunpack.i.l.bf16 %v5216_v11  ;;  %v5226_v6 = vpop.permute.xlu1 %5225 }
 0x353   : > { %v5228_v1 = vunpack.i.h.bf16 %v5226_v6  ;;  %v5227_v30 = vunpack.i.l.bf16 %v5226_v6 }
 0x354   : > { %v3219_v31 = vsel %vm1484_vm5, %v9821_v25, %v5218_v36  ;;  %v3218_v63 = vsel %vm1484_vm5, %v9822_v29, %v5217_v46  ;;  %5500 = vrot.lane.b32.xlu1 %v9823_v22, %s5597_s13  ;;  %s271_s13 = scalar_lea.vmem [#allocation2], %s4006_s9 }
 0x355   : > { %v5221_v39 = vpop.permute.xlu0 %5220  ;;  %v3217_v43 = vsel %vm1484_vm5, %v9824_v5, %v5228_v1  ;;  %v3216_v0 = vsel %vm1484_vm5, %v9825_v62, %v5227_v30 }
 0x356   : > { %v5223_v44 = vunpack.i.h.bf16 %v5221_v39  ;;  %v5222_v35 = vunpack.i.l.bf16 %v5221_v39  ;;  %v5231_v49 = vpop.permute.xlu1 %5230 }
 0x357   : > { %v5233_v55 = vunpack.i.h.bf16 %v5231_v49  ;;  %v5232_v57 = vunpack.i.l.bf16 %v5231_v49 }
 0x358   : > { %v3250_v59 = vsel %vm1550_vm7, %v3218_v63, %v5222_v35  ;;  %v3251_v4 = vsel %vm1550_vm7, %v3219_v31, %v5223_v44  ;;  %5510 = vrot.lane.b32.xlu1 %v9826_v17, %s5598_s14  ;;  %s3943_s14 = sshll.u32 %s271_s13, 4  ;;  %s9217_s14 = int_to_ptr.vmem [resolvable:$true] %s3943_s14 }
 0x359   : > { %v5241_v50 = vpop.permute.xlu0 %5240  ;;  %v3248_v28 = vsel %vm1550_vm7, %v3216_v0, %v5232_v57  ;;  %v3249_v37 = vsel %vm1550_vm7, %v3217_v43, %v5233_v55  ;;  %v5117_v57 = vunpack.i.l.bf16 %v8737_v27  ;;  %s5522_s20 = scalar_lea.vmem %s9217_s14, 256  ;;  %p5529_p0 = scmp.lt.s32.totalorder %s9217_s14, %s5527_s19 }
 0x35a   : > { %v5243_v38 = vunpack.i.h.bf16 %v5241_v50  ;;  %v5242_v2 = vunpack.i.l.bf16 %v5241_v50  ;;  %v5236_v41 = vpop.permute.xlu1 %5235  ;;  %v8900_v48 = vsel %vm1616_vm9, %v3248_v28, %v5207_v14  ;;  %v8903_v16 = vsel %vm1616_vm9, %v3249_v37, %v5208_v58  ;;  %p5523_p11 = scmp.ne.s32.totalorder %s9217_s14, %s5522_s20  ;;  %p5530_p1 = scmp.lt.s32.totalorder %s5528_s21, %s5522_s20 }
 0x35b   : > { %v5238_v63 = vunpack.i.h.bf16 %v5236_v41  ;;  %v5237_v1 = vunpack.i.l.bf16 %v5236_v41  ;;  %v5173_v58 = vunpack.i.h.bf16 %v8802_v18  ;;  %v5172_v14 = vunpack.i.l.bf16 %v8802_v18 }
 0x35c   : > { %v8894_v24 = vsel %vm1616_vm9, %v3251_v4, %v5243_v38  ;;  %v8897_v33 = vsel %vm1616_vm9, %v3250_v59, %v5242_v2  ;;  %v5168_v38 = vunpack.i.h.bf16 %v8780_v8  ;;  %v5167_v2 = vunpack.i.l.bf16 %v8780_v8  ;;  %p5524_p12 = pnand %p5523_p11, %p5678_p5  ;;  %p5531_p2 = por %p5530_p1, %p5529_p0 }
 0x35d   : > { %v5246_v26 = vpop.permute.xlu0 %5245  ;;  %v3270_v28 = vsel %vm1616_vm9, %v8667_v52, %v5117_v57 }
 0x35e   : > { %v5248_v7 = vunpack.i.h.bf16 %v5246_v26  ;;  %v5247_v40 = vunpack.i.l.bf16 %v5246_v26  ;;  %v5256_v42 = vpop.permute.xlu1 %5255  ;;  %v3302_v8 = vsel %vm1682_vm11, %v3270_v28, %v5167_v2  ;;  %p5525_p13 = pneg %p5524_p12 }
 0x35f   : > { %v5258_v19 = vunpack.i.h.bf16 %v5256_v42  ;;  %v5257_v36 = vunpack.i.l.bf16 %v5256_v42  ;;  %v3335_v26 = vsel %vm3322_vm14, %v3302_v8, %v5172_v14 }
 0x360   : > { %v3223_v53 = vsel %vm1484_vm5, %v8112_v10, %v5248_v7  ;;  %v3222_v11 = vsel %vm1484_vm5, %v8065_v61, %v5247_v40  ;;  %p5532_p3 = pnand %p5531_p2, %p5525_p13 }
 0x361   : > { %v5251_v23 = vpop.permute.xlu0 %5250  ;;  %v3221_v10 = vsel %vm1484_vm5, %v8121_v15, %v5258_v19  ;;  %v3220_v61 = vsel %vm1484_vm5, %v8073_v45, %v5257_v36  ;;  %v5118_v45 = vunpack.i.h.bf16 %v8737_v27 }
 0x362   : > { %v5253_v54 = vunpack.i.h.bf16 %v5251_v23  ;;  %v5252_v34 = vunpack.i.l.bf16 %v5251_v23  ;;  %v5261_v39 = vpop.permute.xlu1 %5260 }
 0x363   : > { %v5263_v35 = vunpack.i.h.bf16 %v5261_v39  ;;  %v5262_v25 = vunpack.i.l.bf16 %v5261_v39  ;;  %v3271_v17 = vsel %vm1616_vm9, %v8670_v56, %v5118_v45 }
 0x364   : > { %v3254_v46 = vsel %vm1550_vm7, %v3222_v11, %v5252_v34  ;;  %v3255_v6 = vsel %vm1550_vm7, %v3223_v53, %v5253_v54  ;;  %v3303_v41 = vsel %vm1682_vm11, %v3271_v17, %v5168_v38 }
 0x365   : > { %v5271_v44 = vpop.permute.xlu0 %5270  ;;  %v3252_v30 = vsel %vm1550_vm7, %v3220_v61, %v5262_v25  ;;  %v3253_v22 = vsel %vm1550_vm7, %v3221_v10, %v5263_v35  ;;  %v3336_v18 = vsel %vm3322_vm14, %v3303_v41, %v5173_v58 }
 0x366   : > { %v5273_v31 = vunpack.i.h.bf16 %v5271_v44  ;;  %v5272_v29 = vunpack.i.l.bf16 %v5271_v44  ;;  %v5266_v49 = vpop.permute.xlu1 %5265  ;;  %v8924_v55 = vsel %vm1616_vm9, %v3252_v30, %v5237_v1  ;;  %v8927_v15 = vsel %vm1616_vm9, %v3253_v22, %v5238_v63 }
 0x367   : > { %v5268_v25 = vunpack.i.h.bf16 %v5266_v49 }
 0x368   : > { %v8918_v59 = vsel %vm1616_vm9, %v3255_v6, %v5273_v31  ;;  %v8921_v4 = vsel %vm1616_vm9, %v3254_v46, %v5272_v29  ;;  %v5267_v31 = vunpack.i.l.bf16 %v5266_v49 }
 0x369   : > { %v5276_v50 = vpop.permute.xlu0 %5275 }
 0x36a   : > { %v5281_v5 = vpop.permute.xlu1 %5280  ;;  %v5278_v62 = vunpack.i.h.bf16 %v5276_v50  ;;  %v5277_v0 = vunpack.i.l.bf16 %v5276_v50 }
 0x36b   : > { %v5283_v49 = vunpack.i.h.bf16 %v5281_v5  ;;  %v5282_v50 = vunpack.i.l.bf16 %v5281_v5 }
 0x36c   : > { %v3369_v42 = vsel %vm3355_vm15, %v3336_v18, %v5278_v62  ;;  %v3368_v23 = vsel %vm3355_vm15, %v3335_v26, %v5277_v0 }
 0x36d   : > { %v5286_v43 = vpop.permute.xlu0 %5285  ;;  %v3370_v2 = vsel %vm3355_vm15, %v8819_v12, %v5282_v50 }
 0x36e   : > { %v5288_v37 = vunpack.i.h.bf16 %v5286_v43  ;;  %v5287_v27 = vunpack.i.l.bf16 %v5286_v43  ;;  %v5291_v7 = vpop.permute.xlu1 %5290 }
 0x36f   : > { %v5293_v53 = vunpack.i.h.bf16 %v5291_v7  ;;  %v5292_v11 = vunpack.i.l.bf16 %v5291_v7 }
 0x370   : > { %v3401_v52 = vsel %vm3388_vm0, %v3368_v23, %v5287_v27  ;;  %v3402_v34 = vsel %vm3388_vm0, %v3369_v42, %v5288_v37 }
 0x371   : > { %v5306_v40 = vpop.permute.xlu0 %5305  ;;  %v3225_v29 = vsel %vm1484_vm5, %v8147_v3, %v5293_v53  ;;  %v3224_v63 = vsel %vm1484_vm5, %v8124_v9, %v5292_v11  ;;  %v3371_v9 = vsel %vm3355_vm15, %v8822_v20, %v5283_v49 }
 0x372   : > { %v5308_v56 = vunpack.i.h.bf16 %v5306_v40  ;;  %v5307_v54 = vunpack.i.l.bf16 %v5306_v40  ;;  %v5296_v6 = vpop.permute.xlu1 %5295 }
 0x373   : > { %v5298_v44 = vunpack.i.h.bf16 %v5296_v6  ;;  %v5297_v35 = vunpack.i.l.bf16 %v5296_v6 }
 0x374   : > { %v3434_v19 = vsel %vm3421_vm1, %v3401_v52, %v5307_v54  ;;  %v3435_v36 = vsel %vm3421_vm1, %v3402_v34, %v5308_v56 }
 0x375   : > { %v3460_v46 = vpack.c.bf16 %v3435_v36, %v3434_v19  ;;  %v5316_v39 = vpop.permute.xlu0 %5315  ;;  %v3256_v1 = vsel %vm1550_vm7, %v3224_v63, %v5297_v35  ;;  %v3257_v10 = vsel %vm1550_vm7, %v3225_v29, %v5298_v44 }
 0x376   : > { %v5301_v61 = vpop.permute.xlu1 %5300  ;;  %v8957_v30 = vsel %vm1616_vm9, %v3256_v1, %v5267_v31  ;;  %v8960_v22 = vsel %vm1616_vm9, %v3257_v10, %v5268_v25  ;;  %v5318_v28 = vunpack.i.h.bf16 %v5316_v39  ;;  %v5317_v37 = vunpack.i.l.bf16 %v5316_v39 }
 0x377   : > { %4160 = vmatprep.mubr.msk.bf16.mxu1 %vm3506_vm2, %v3460_v46  ;;  %v5303_v3 = vunpack.i.h.bf16 %v5301_v61  ;;  %v5302_v57 = vunpack.i.l.bf16 %v5301_v61 }
 0x378   : > { %v3307_v42 = vsel %vm1682_vm11, %v8831_v47, %v5318_v28  ;;  %v3306_v23 = vsel %vm1682_vm11, %v8834_v51, %v5317_v37 }
 0x379   : > { %v5326_v45 = vpop.permute.xlu0 %5325  ;;  %v3404_v62 = vsel %vm3388_vm0, %v3371_v9, %v5303_v3  ;;  %v3403_v0 = vsel %vm3388_vm0, %v3370_v2, %v5302_v57 }
 0x37a   : > { %v5311_v38 = vpop.permute.xlu1 %5310  ;;  %v5328_v8 = vunpack.i.h.bf16 %v5326_v45  ;;  %v5327_v20 = vunpack.i.l.bf16 %v5326_v45 }
 0x37b   : > { %v5313_v58 = vunpack.i.h.bf16 %v5311_v38  ;;  %v5312_v14 = vunpack.i.l.bf16 %v5311_v38 }
 0x37c   : > { %v3339_v54 = vsel %vm3322_vm14, %v3306_v23, %v5327_v20  ;;  %v3340_v52 = vsel %vm3322_vm14, %v3307_v42, %v5328_v8 }
 0x37d   : > { %v5336_v43 = vpop.permute.xlu0 %5335  ;;  %v3436_v17 = vsel %vm3421_vm1, %v3403_v0, %v5312_v14  ;;  %v3437_v5 = vsel %vm3421_vm1, %v3404_v62, %v5313_v58 }
 0x37e   : > { %v3461_v27 = vpack.c.bf16 %v3437_v5, %v3436_v17  ;;  %v5321_v41 = vpop.permute.xlu1 %5320  ;;  %v5338_v18 = vunpack.i.h.bf16 %v5336_v43  ;;  %v5337_v12 = vunpack.i.l.bf16 %v5336_v43 }
 0x37f   : > { %v5323_v25 = vunpack.i.h.bf16 %v5321_v41  ;;  %v5322_v31 = vunpack.i.l.bf16 %v5321_v41 }
 0x380   : > { %4161 = vmatmul.mubr.msk.bf16.gmra.mrb[12].mxu1 %vm3506_vm2, %v3461_v27  ;;  %v3372_v53 = vsel %vm3355_vm15, %v3339_v54, %v5337_v12  ;;  %v3373_v11 = vsel %vm3355_vm15, %v3340_v52, %v5338_v18 }
 0x381   : > { %v5346_v26 = vpop.permute.xlu0 %5345  ;;  %v3309_v3 = vsel %vm1682_vm11, %v8873_v60, %v5323_v25  ;;  %v3308_v57 = vsel %vm1682_vm11, %v8870_v13, %v5322_v31 }
 0x382   : > { %v5348_v7 = vunpack.i.h.bf16 %v5346_v26  ;;  %v5347_v40 = vunpack.i.l.bf16 %v5346_v26  ;;  %v5331_v56 = vpop.permute.xlu1 %5330 }
 0x383   : > { %v5333_v29 = vunpack.i.h.bf16 %v5331_v56  ;;  %v5332_v63 = vunpack.i.l.bf16 %v5331_v56 }
 0x384   : > { %v3405_v46 = vsel %vm3388_vm0, %v3372_v53, %v5347_v40  ;;  %v3406_v6 = vsel %vm3388_vm0, %v3373_v11, %v5348_v7 }
 0x385   : > { %v5356_v34 = vpop.permute.xlu0 %5355  ;;  %v3341_v38 = vsel %vm3322_vm14, %v3308_v57, %v5332_v63  ;;  %v3342_v9 = vsel %vm3322_vm14, %v3309_v3, %v5333_v29 }
 0x386   : > { %v5358_v19 = vunpack.i.h.bf16 %v5356_v34  ;;  %v5357_v36 = vunpack.i.l.bf16 %v5356_v34  ;;  %v5341_v39 = vpop.permute.xlu1 %5340 }
 0x387   : > { %v5343_v10 = vunpack.i.h.bf16 %v5341_v39  ;;  %v5342_v61 = vunpack.i.l.bf16 %v5341_v39 }
 0x388   : > { %v3438_v47 = vsel %vm3421_vm1, %v3405_v46, %v5357_v36  ;;  %v3439_v51 = vsel %vm3421_vm1, %v3406_v6, %v5358_v19 }
 0x389   : > { %v3462_v44 = vpack.c.bf16 %v3439_v51, %v3438_v47  ;;  %v5366_v35 = vpop.permute.xlu0 %5365  ;;  %v3374_v58 = vsel %vm3355_vm15, %v3341_v38, %v5342_v61  ;;  %v3375_v14 = vsel %vm3355_vm15, %v3342_v9, %v5343_v10 }
 0x38a   : > { %v5351_v1 = vpop.permute.xlu1 %5350  ;;  %v5368_v28 = vunpack.i.h.bf16 %v5366_v35  ;;  %v5367_v37 = vunpack.i.l.bf16 %v5366_v35 }
 0x38b   : > { %4164 = vmatprep.mubr.msk.bf16.mxu1 %vm3506_vm2, %v3462_v44  ;;  %v5353_v50 = vunpack.i.h.bf16 %v5351_v1  ;;  %v5352_v45 = vunpack.i.l.bf16 %v5351_v1 }
 0x38c   : > { %v3311_v42 = vsel %vm1682_vm11, %v8862_v32, %v5368_v28  ;;  %v3310_v23 = vsel %vm1682_vm11, %v8865_v21, %v5367_v37 }
 0x38d   : > { %v5376_v49 = vpop.permute.xlu0 %5375  ;;  %v3407_v17 = vsel %vm3388_vm0, %v3374_v58, %v5352_v45  ;;  %v3408_v5 = vsel %vm3388_vm0, %v3375_v14, %v5353_v50 }
 0x38e   : > { %v5361_v2 = vpop.permute.xlu1 %5360  ;;  %v5378_v8 = vunpack.i.h.bf16 %v5376_v49  ;;  %v5377_v20 = vunpack.i.l.bf16 %v5376_v49 }
 0x38f   : > { %v5363_v43 = vunpack.i.h.bf16 %v5361_v2  ;;  %v5362_v62 = vunpack.i.l.bf16 %v5361_v2 }
 0x390   : > { %v3343_v54 = vsel %vm3322_vm14, %v3310_v23, %v5377_v20  ;;  %v3344_v52 = vsel %vm3322_vm14, %v3311_v42, %v5378_v8 }
 0x391   : > { %v5386_v0 = vpop.permute.xlu0 %5385  ;;  %v3440_v60 = vsel %vm3421_vm1, %v3407_v17, %v5362_v62  ;;  %v3441_v13 = vsel %vm3421_vm1, %v3408_v5, %v5363_v43 }
 0x392   : > { %v3463_v27 = vpack.c.bf16 %v3441_v13, %v3440_v60  ;;  %v5371_v41 = vpop.permute.xlu1 %5370  ;;  %v5388_v18 = vunpack.i.h.bf16 %v5386_v0  ;;  %v5387_v12 = vunpack.i.l.bf16 %v5386_v0 }
 0x393   : > { %v5373_v44 = vunpack.i.h.bf16 %v5371_v41  ;;  %v5372_v35 = vunpack.i.l.bf16 %v5371_v41 }
 0x394   : > { %4165 = vmatmul.mubr.msk.bf16.gmra.mrb[16].mxu1 %vm3506_vm2, %v3463_v27  ;;  %v3376_v53 = vsel %vm3355_vm15, %v3343_v54, %v5387_v12  ;;  %v3377_v11 = vsel %vm3355_vm15, %v3344_v52, %v5388_v18 }
 0x395   : > { %v5396_v26 = vpop.permute.xlu0 %5395  ;;  %v3313_v50 = vsel %vm1682_vm11, %v8903_v16, %v5373_v44  ;;  %v3312_v45 = vsel %vm1682_vm11, %v8900_v48, %v5372_v35 }
 0x396   : > { %v5398_v7 = vunpack.i.h.bf16 %v5396_v26  ;;  %v5397_v40 = vunpack.i.l.bf16 %v5396_v26  ;;  %v5381_v56 = vpop.permute.xlu1 %5380 }
 0x397   : > { %v5383_v25 = vunpack.i.h.bf16 %v5381_v56  ;;  %v5382_v31 = vunpack.i.l.bf16 %v5381_v56 }
 0x398   : > { %v3409_v46 = vsel %vm3388_vm0, %v3376_v53, %v5397_v40  ;;  %v3410_v6 = vsel %vm3388_vm0, %v3377_v11, %v5398_v7 }
 0x399   : > { %v5406_v34 = vpop.permute.xlu0 %5405  ;;  %v3345_v3 = vsel %vm3322_vm14, %v3312_v45, %v5382_v31  ;;  %v3346_v57 = vsel %vm3322_vm14, %v3313_v50, %v5383_v25 }
 0x39a   : > { %v5408_v19 = vunpack.i.h.bf16 %v5406_v34  ;;  %v5407_v36 = vunpack.i.l.bf16 %v5406_v34  ;;  %v5391_v47 = vpop.permute.xlu1 %5390 }
 0x39b   : > { %v5393_v63 = vunpack.i.h.bf16 %v5391_v47  ;;  %v5392_v1 = vunpack.i.l.bf16 %v5391_v47 }
 0x39c   : > { %v3442_v32 = vsel %vm3421_vm1, %v3409_v46, %v5407_v36  ;;  %v3443_v21 = vsel %vm3421_vm1, %v3410_v6, %v5408_v19 }
 0x39d   : > { %v3464_v51 = vpack.c.bf16 %v3443_v21, %v3442_v32  ;;  %v5416_v39 = vpop.permute.xlu0 %5415  ;;  %v3378_v9 = vsel %vm3355_vm15, %v3345_v3, %v5392_v1  ;;  %v3379_v2 = vsel %vm3355_vm15, %v3346_v57, %v5393_v63 }
 0x39e   : > { %v5401_v29 = vpop.permute.xlu1 %5400  ;;  %v5418_v17 = vunpack.i.h.bf16 %v5416_v39  ;;  %v5417_v5 = vunpack.i.l.bf16 %v5416_v39 }
 0x39f   : > { %4168 = vmatprep.mubr.msk.bf16.mxu1 %vm3506_vm2, %v3464_v51  ;;  %v5403_v61 = vunpack.i.h.bf16 %v5401_v29  ;;  %v5402_v49 = vunpack.i.l.bf16 %v5401_v29 }
 0x3a0   : > { %v3315_v18 = vsel %vm1682_vm11, %v8894_v24, %v5418_v17  ;;  %v3314_v12 = vsel %vm1682_vm11, %v8897_v33, %v5417_v5 }
 0x3a1   : > { %v5426_v10 = vpop.permute.xlu0 %5425  ;;  %v3411_v62 = vsel %vm3388_vm0, %v3378_v9, %v5402_v49  ;;  %v3412_v0 = vsel %vm3388_vm0, %v3379_v2, %v5403_v61 }
 0x3a2   : > { %v5411_v38 = vpop.permute.xlu1 %5410  ;;  %v5428_v28 = vunpack.i.h.bf16 %v5426_v10  ;;  %v5427_v37 = vunpack.i.l.bf16 %v5426_v10 }
 0x3a3   : > { %v5413_v58 = vunpack.i.h.bf16 %v5411_v38  ;;  %v5412_v14 = vunpack.i.l.bf16 %v5411_v38 }
 0x3a4   : > { %v3347_v40 = vsel %vm3322_vm14, %v3314_v12, %v5427_v37  ;;  %v3348_v42 = vsel %vm3322_vm14, %v3315_v18, %v5428_v28 }
 0x3a5   : > { %v5436_v43 = vpop.permute.xlu0 %5435  ;;  %v3444_v16 = vsel %vm3421_vm1, %v3411_v62, %v5412_v14  ;;  %v3445_v48 = vsel %vm3421_vm1, %v3412_v0, %v5413_v58 }
 0x3a6   : > { %v3465_v60 = vpack.c.bf16 %v3445_v48, %v3444_v16  ;;  %v5421_v13 = vpop.permute.xlu1 %5420  ;;  %v5438_v41 = vunpack.i.h.bf16 %v5436_v43  ;;  %v5437_v8 = vunpack.i.l.bf16 %v5436_v43 }
 0x3a7   : > { %v5423_v6 = vunpack.i.h.bf16 %v5421_v13  ;;  %v5422_v32 = vunpack.i.l.bf16 %v5421_v13 }
 0x3a8   : > { %4169 = vmatmul.mubr.msk.bf16.gmra.mrb[20].mxu1 %vm3506_vm2, %v3465_v60  ;;  %v3380_v56 = vsel %vm3355_vm15, %v3347_v40, %v5437_v8  ;;  %v3381_v54 = vsel %vm3355_vm15, %v3348_v42, %v5438_v41 }
 0x3a9   : > { %v5446_v27 = vpop.permute.xlu0 %5445  ;;  %v3317_v29 = vsel %vm1682_vm11, %v8927_v15, %v5423_v6  ;;  %v3316_v63 = vsel %vm1682_vm11, %v8924_v55, %v5422_v32 }
 0x3aa   : > { %v5448_v20 = vunpack.i.h.bf16 %v5446_v27  ;;  %v5447_v26 = vunpack.i.l.bf16 %v5446_v27  ;;  %v5431_v7 = vpop.permute.xlu1 %5430 }
 0x3ab   : > { %v5433_v21 = vunpack.i.h.bf16 %v5431_v7  ;;  %v5432_v47 = vunpack.i.l.bf16 %v5431_v7 }
 0x3ac   : > { %v3413_v53 = vsel %vm3388_vm0, %v3380_v56, %v5447_v26  ;;  %v3414_v11 = vsel %vm3388_vm0, %v3381_v54, %v5448_v20 }
 0x3ad   : > { %v5456_v23 = vpop.permute.xlu0 %5455  ;;  %v3349_v1 = vsel %vm3322_vm14, %v3316_v63, %v5432_v47  ;;  %v3350_v10 = vsel %vm3322_vm14, %v3317_v29, %v5433_v21  ;;  %v9078_v29 = vld [vmem:[%s9269_s5] ss:$0 sm:$0xff] }
 0x3ae   : > { %v5458_v52 = vunpack.i.h.bf16 %v5456_v23  ;;  %v5457_v34 = vunpack.i.l.bf16 %v5456_v23  ;;  %v5441_v19 = vpop.permute.xlu1 %5440 }
 0x3af   : > { %v5443_v39 = vunpack.i.h.bf16 %v5441_v19  ;;  %v5442_v44 = vunpack.i.l.bf16 %v5441_v19 }
 0x3b0   : > { %v3446_v24 = vsel %vm3421_vm1, %v3413_v53, %v5457_v34  ;;  %v3447_v33 = vsel %vm3421_vm1, %v3414_v11, %v5458_v52 }
 0x3b1   : > { %v3466_v36 = vpack.c.bf16 %v3447_v33, %v3446_v24  ;;  %v5466_v46 = vpop.permute.xlu0 %5465  ;;  %v3382_v49 = vsel %vm3355_vm15, %v3349_v1, %v5442_v44  ;;  %v3383_v50 = vsel %vm3355_vm15, %v3350_v10, %v5443_v39  ;;  %v9083_v1 = vld [vmem:[%s9270_s6] ss:$0 sm:$0xff] }
 0x3b2   : > { %v5451_v51 = vpop.permute.xlu1 %5450  ;;  %v5468_v2 = vunpack.i.h.bf16 %v5466_v46  ;;  %v5467_v58 = vunpack.i.l.bf16 %v5466_v46 }
 0x3b3   : > { %4172 = vmatprep.mubr.msk.bf16.mxu1 %vm3506_vm2, %v3466_v36  ;;  %v5453_v25 = vunpack.i.h.bf16 %v5451_v51  ;;  %v5452_v31 = vunpack.i.l.bf16 %v5451_v51 }
 0x3b4   : > { %v3319_v13 = vsel %vm1682_vm11, %v8918_v59, %v5468_v2  ;;  %v3318_v28 = vsel %vm1682_vm11, %v8921_v4, %v5467_v58  ;;  %v9827_v58 = vld [vmem:[#allocation30_spill] sm:$0xff] }
 0x3b5   : > { %v5476_v35 = vpop.permute.xlu0 %5475  ;;  %v3415_v38 = vsel %vm3388_vm0, %v3382_v49, %v5452_v31  ;;  %v3416_v9 = vsel %vm3388_vm0, %v3383_v50, %v5453_v25 }
 0x3b6   : > { %v5461_v61 = vpop.permute.xlu1 %5460  ;;  %v5478_v62 = vunpack.i.h.bf16 %v5476_v35  ;;  %v5477_v0 = vunpack.i.l.bf16 %v5476_v35 }
 0x3b7   : > { %v5463_v45 = vunpack.i.h.bf16 %v5461_v61  ;;  %v5462_v3 = vunpack.i.l.bf16 %v5461_v61 }
 0x3b8   : > { %v3351_v27 = vsel %vm3322_vm14, %v3318_v28, %v5477_v0  ;;  %v3352_v41 = vsel %vm3322_vm14, %v3319_v13, %v5478_v62 }
 0x3b9   : > { %v5486_v57 = vpop.permute.xlu0 %5485  ;;  %v3448_v15 = vsel %vm3421_vm1, %v3415_v38, %v5462_v3  ;;  %v3449_v55 = vsel %vm3421_vm1, %v3416_v9, %v5463_v45 }
 0x3ba   : > { %v3467_v14 = vpack.c.bf16 %v3449_v55, %v3448_v15  ;;  %v5471_v43 = vpop.permute.xlu1 %5470  ;;  %v5488_v48 = vunpack.i.h.bf16 %v5486_v57  ;;  %v5487_v17 = vunpack.i.l.bf16 %v5486_v57 }
 0x3bb   : > { %v5473_v56 = vunpack.i.h.bf16 %v5471_v43  ;;  %v5472_v54 = vunpack.i.l.bf16 %v5471_v43 }
 0x3bc   : > { %4173 = vmatmul.mubr.msk.bf16.gmra.mrb[24].mxu1 %vm3506_vm2, %v3467_v14  ;;  %v3384_v20 = vsel %vm3355_vm15, %v3351_v27, %v5487_v17  ;;  %v3385_v26 = vsel %vm3355_vm15, %v3352_v41, %v5488_v48  ;;  %v9828_v14 = vmax.f32 %v9827_v58, 0.0 }
 0x3bd   : > { %v5496_v16 = vpop.permute.xlu0 %5495  ;;  %v3320_v36 = vsel %vm1682_vm11, %v8957_v30, %v5472_v54  ;;  %v3321_v46 = vsel %vm1682_vm11, %v8960_v22, %v5473_v56 }
 0x3be   : > { %v5498_v5 = vunpack.i.h.bf16 %v5496_v16  ;;  %v5497_v60 = vunpack.i.l.bf16 %v5496_v16  ;;  %v5481_v37 = vpop.permute.xlu1 %5480  ;;  %v9829_v16 = vld [vmem:[#allocation34_spill] sm:$0xff] }
 0x3bf   : > { %v5483_v52 = vunpack.i.h.bf16 %v5481_v37  ;;  %v5482_v34 = vunpack.i.l.bf16 %v5481_v37  ;;  %v9830_v48 = vmax.f32 %v9829_v16, 0.0  ;;  %v9833_v37 = vld [vmem:[#allocation31_spill] sm:$0xff] }
 0x3c0   : > { %v3417_v7 = vsel %vm3388_vm0, %v3384_v20, %v5497_v60  ;;  %v3418_v40 = vsel %vm3388_vm0, %v3385_v26, %v5498_v5  ;;  %v9831_v60 = vld [vmem:[#allocation28_spill] sm:$0xff]  ;;  %v9834_v27 = vmax.f32 %v9833_v37, 0.0 }
 0x3c1   : > { %v5506_v8 = vpop.permute.xlu0 %5505  ;;  %v3353_v6 = vsel %vm3322_vm14, %v3320_v36, %v5482_v34  ;;  %v3354_v32 = vsel %vm3322_vm14, %v3321_v46, %v5483_v52  ;;  %v9832_v13 = vmax.f32 %v9831_v60, 0.0  ;;  %v9835_v52 = vld [vmem:[#allocation37_spill] sm:$0xff] }
 0x3c2   : > { %v5508_v18 = vunpack.i.h.bf16 %v5506_v8  ;;  %v5507_v12 = vunpack.i.l.bf16 %v5506_v8  ;;  %v5491_v42 = vpop.permute.xlu1 %5490  ;;  %v9836_v34 = vmax.f32 %v9835_v52, 0.0 }
 0x3c3   : > { %v5493_v11 = vunpack.i.h.bf16 %v5491_v42  ;;  %v5492_v24 = vunpack.i.l.bf16 %v5491_v42 }
 0x3c4   : > { %v3450_v59 = vsel %vm3421_vm1, %v3417_v7, %v5507_v12  ;;  %v3451_v4 = vsel %vm3421_vm1, %v3418_v40, %v5508_v18 }
 0x3c5   : > { %v3468_v23 = vpack.c.bf16 %v3451_v4, %v3450_v59  ;;  %v3386_v47 = vsel %vm3355_vm15, %v3353_v6, %v5492_v24  ;;  %v3387_v51 = vsel %vm3355_vm15, %v3354_v32, %v5493_v11  ;;  %v9839_v6 = vld [vmem:[#allocation36_spill] sm:$0xff] }
 0x3c6   : > { %v5501_v53 = vpop.permute.xlu1 %5500  ;;  %v9840_v32 = vmax.f32 %v9839_v6, 0.0 }
 0x3c7   : > { %4176 = vmatprep.mubr.msk.bf16.mxu1 %vm3506_vm2, %v3468_v23  ;;  %v5503_v33 = vunpack.i.h.bf16 %v5501_v53  ;;  %v5502_v19 = vunpack.i.l.bf16 %v5501_v53 }
 0x3c9   : > { %v3419_v35 = vsel %vm3388_vm0, %v3386_v47, %v5502_v19  ;;  %v3420_v25 = vsel %vm3388_vm0, %v3387_v51, %v5503_v33  ;;  %v9837_v33 = vld [vmem:[#allocation32_spill] sm:$0xff]  ;;  %v9841_v47 = vld [vmem:[#allocation33_spill] sm:$0xff] }
 0x3ca   : > { %v5511_v21 = vpop.permute.xlu1 %5510  ;;  %v9838_v19 = vmax.f32 %v9837_v33, 0.0  ;;  %v9842_v51 = vmax.f32 %v9841_v47, 0.0 }
 0x3cb   : > { %v5513_v39 = vunpack.i.h.bf16 %v5511_v21  ;;  %v5512_v44 = vunpack.i.l.bf16 %v5511_v21 }
 0x3cd   : > { %v3452_v30 = vsel %vm3421_vm1, %v3419_v35, %v5512_v44  ;;  %v3453_v31 = vsel %vm3421_vm1, %v3420_v25, %v5513_v39 }
 0x3ce   : > { %v3469_v22 = vpack.c.bf16 %v3453_v31, %v3452_v30 }
 0x3d0   : > { %4177 = vmatmul.mubr.msk.bf16.gmra.mrb[28].mxu1 %vm3506_vm2, %v3469_v22 }
 0x3d7   : > { %v4150_v63 = vpop.f32.mrb[0].mxu1 }
 0x3d8   : > { %v3593_v10 = vpop.f32.mrb[1].mxu1  ;;  %v3729_v45 = vmul.f32 %v4150_v63, %v9078_v29 }
 0x3d9   : > { %v3727_v61 = vmul.f32 %v9078_v29, %v3593_v10  ;;  %v4151_v49 = vpop.f32.mrb[2].mxu1 }
 0x3da   : > { %v3596_v50 = vpop.f32.mrb[3].mxu1  ;;  %v3768_v15 = vadd.f32 %v9083_v1, %v3729_v45  ;;  %v3730_v55 = vmul.f32 %v4151_v49, %v9078_v29 }
 0x3db   : > { %v3766_v3 = vadd.f32 %v9083_v1, %v3727_v61  ;;  %v3728_v57 = vmul.f32 %v9078_v29, %v3596_v50 }
 0x3dc   : > { %v3800_v62 = vmax.f32 %v3768_v15, 0.0  ;;  %v3769_v0 = vadd.f32 %v9083_v1, %v3730_v55 }
 0x3dd   : > { %v3798_v38 = vmax.f32 %v3766_v3, 0.0  ;;  %v3767_v9 = vadd.f32 %v9083_v1, %v3728_v57  ;;  %v9843_v57 = vld [vmem:[#allocation41_spill] sm:$0xff] }
 0x3de   : > { %v3801_v5 = vmax.f32 %v3769_v0, 0.0  ;;  %v3832_v28 = vadd.f32 %v3800_v62, %v9832_v13  ;;  %v9847_v62 = vld [vmem:[#allocation38_spill] sm:$0xff] }
 0x3df   : > { %v3799_v2 = vmax.f32 %v3767_v9, 0.0  ;;  %v3830_v43 = vadd.f32 %v3798_v38, %v9828_v14  ;;  %v9844_v38 = vmax.f32 %v9843_v57, 0.0  ;;  %v9848_v0 = vmax.f32 %v9847_v62, 0.0 }
 0x3e0   : > { %v3833_v41 = vadd.f32 %v3801_v5, %v9834_v27 }
 0x3e1   : > { %3862 = vxpose.xlu0.b32.start [1/16] (narrow) %v3830_v43, 8  ;;  %v3831_v17 = vadd.f32 %v3799_v2, %v9830_v48  ;;  %v9845_v2 = vld [vmem:[#allocation42_spill] sm:$0xff]  ;;  %v9849_v48 = vld [vmem:[#allocation44_spill] sm:$0xff] }
 0x3e2   : > { %v9846_v58 = vmax.f32 %v9845_v2, 0.0 }
 0x3e5   : > { %3863 = vxpose.xlu0.b32.cont [2/16] (narrow) %v3831_v17, 8  ;;  %v9850_v17 = vmax.f32 %v9849_v48, 0.0 }
 0x3e9   : > { %3864 = vxpose.xlu0.b32.cont [3/16] (narrow) %v3832_v28, 8 }
 0x3ed   : > { %3865 = vxpose.xlu0.b32.cont [4/16] (narrow) %v3833_v41, 8 }
 0x3f7   : > { %v4154_v8 = vpop.f32.mrb[4].mxu1 }
 0x3f8   : > { %v3609_v20 = vpop.f32.mrb[5].mxu1  ;;  %v3733_v7 = vmul.f32 %v4154_v8, %v9078_v29 }
 0x3f9   : > { %v3731_v26 = vmul.f32 %v9078_v29, %v3609_v20  ;;  %v4155_v18 = vpop.f32.mrb[6].mxu1 }
 0x3fa   : > { %v3612_v12 = vpop.f32.mrb[7].mxu1  ;;  %v3772_v23 = vadd.f32 %v9083_v1, %v3733_v7  ;;  %v3734_v56 = vmul.f32 %v4155_v18, %v9078_v29 }
 0x3fb   : > { %v3770_v40 = vadd.f32 %v9083_v1, %v3731_v26  ;;  %v3732_v59 = vmul.f32 %v9078_v29, %v3612_v12 }
 0x3fc   : > { %v3804_v11 = vmax.f32 %v3772_v23, 0.0  ;;  %v3773_v24 = vadd.f32 %v9083_v1, %v3734_v56 }
 0x3fd   : > { %v3802_v4 = vmax.f32 %v3770_v40, 0.0  ;;  %v3771_v42 = vadd.f32 %v9083_v1, %v3732_v59  ;;  %v9851_v59 = vld [vmem:[#allocation46_spill] sm:$0xff] }
 0x3fe   : > { %v3805_v46 = vmax.f32 %v3773_v24, 0.0  ;;  %v3836_v21 = vadd.f32 %v3804_v11, %v9840_v32  ;;  %v9855_v11 = vld [vmem:[#allocation43_spill] sm:$0xff] }
 0x3ff   : > { %v3803_v54 = vmax.f32 %v3771_v42, 0.0  ;;  %v3834_v53 = vadd.f32 %v3802_v4, %v9836_v34  ;;  %v9852_v4 = vmax.f32 %v9851_v59, 0.0  ;;  %v9856_v24 = vmax.f32 %v9855_v11, 0.0 }
 0x400   : > { %v3837_v39 = vadd.f32 %v3805_v46, %v9842_v51 }
 0x401   : > { %3866 = vxpose.xlu0.b32.cont [5/16] (narrow) %v3834_v53, 8  ;;  %v3835_v36 = vadd.f32 %v3803_v54, %v9838_v19  ;;  %v9853_v54 = vld [vmem:[#allocation49_spill] sm:$0xff] }
 0x402   : > { %v9854_v52 = vmax.f32 %v9853_v54, 0.0 }
 0x405   : > { %3867 = vxpose.xlu0.b32.cont [6/16] (narrow) %v3835_v36, 8  ;;  %v9857_v36 = vld [vmem:[#allocation47_spill] sm:$0xff] }
 0x406   : > { %v9858_v46 = vmax.f32 %v9857_v36, 0.0 }
 0x409   : > { %3868 = vxpose.xlu0.b32.cont [7/16] (narrow) %v3836_v21, 8 }
 0x40d   : > { %3869 = vxpose.xlu0.b32.cont [8/16] (narrow) %v3837_v39, 8 }
 0x417   : > { %v4158_v44 = vpop.f32.mrb[8].mxu1 }
 0x418   : > { %v3625_v35 = vpop.f32.mrb[9].mxu1  ;;  %v3737_v22 = vmul.f32 %v4158_v44, %v9078_v29 }
 0x419   : > { %v3735_v25 = vmul.f32 %v9078_v29, %v3625_v35  ;;  %v4159_v30 = vpop.f32.mrb[10].mxu1 }
 0x41a   : > { %v3628_v31 = vpop.f32.mrb[11].mxu1  ;;  %v3776_v50 = vadd.f32 %v9083_v1, %v3737_v22  ;;  %v3738_v45 = vmul.f32 %v4159_v30, %v9078_v29 }
 0x41b   : > { %v3774_v63 = vadd.f32 %v9083_v1, %v3735_v25  ;;  %v3736_v10 = vmul.f32 %v9078_v29, %v3628_v31 }
 0x41c   : > { %v3808_v15 = vmax.f32 %v3776_v50, 0.0  ;;  %v3777_v55 = vadd.f32 %v9083_v1, %v3738_v45 }
 0x41d   : > { %v3806_v61 = vmax.f32 %v3774_v63, 0.0  ;;  %v3775_v49 = vadd.f32 %v9083_v1, %v3736_v10  ;;  %v9859_v10 = vld [vmem:[#allocation76_spill] sm:$0xff] }
 0x41e   : > { %v3809_v43 = vmax.f32 %v3777_v55, 0.0  ;;  %v3840_v16 = vadd.f32 %v3808_v15, %v9848_v0  ;;  %v9863_v15 = vld [vmem:[#allocation74_spill] sm:$0xff] }
 0x41f   : > { %v3807_v3 = vmax.f32 %v3775_v49, 0.0  ;;  %v3838_v9 = vadd.f32 %v3806_v61, %v9844_v38  ;;  %v9860_v61 = vmax.f32 %v9859_v10, 0.0  ;;  %v9864_v55 = vmax.f32 %v9863_v15, 0.0 }
 0x420   : > { %v3841_v5 = vadd.f32 %v3809_v43, %v9850_v17 }
 0x421   : > { %3870 = vxpose.xlu0.b32.cont [9/16] (narrow) %v3838_v9, 8  ;;  %v3839_v14 = vadd.f32 %v3807_v3, %v9846_v58  ;;  %v9861_v3 = vld [vmem:[#allocation75_spill] sm:$0xff] }
 0x422   : > { %v9862_v57 = vmax.f32 %v9861_v3, 0.0 }
 0x425   : > { %3871 = vxpose.xlu0.b32.cont [10/16] (narrow) %v3839_v14, 8  ;;  %v9865_v14 = vld [vmem:[#allocation68_spill] sm:$0xff] }
 0x426   : > { %v9866_v43 = vmax.f32 %v9865_v14, 0.0 }
 0x429   : > { %3872 = vxpose.xlu0.b32.cont [11/16] (narrow) %v3840_v16, 8 }
 0x42d   : > { %3873 = vxpose.xlu0.b32.cont [12/16] (narrow) %v3841_v5, 8 }
 0x453   : > { %v4162_v60 = vpop.f32.mrb[12].mxu1 }
 0x454   : > { %v3641_v13 = vpop.f32.mrb[13].mxu1  ;;  %v3741_v41 = vmul.f32 %v4162_v60, %v9078_v29 }
 0x455   : > { %v3739_v28 = vmul.f32 %v9078_v29, %v3641_v13  ;;  %v4163_v37 = vpop.f32.mrb[14].mxu1 }
 0x456   : > { %v3644_v27 = vpop.f32.mrb[15].mxu1  ;;  %v3780_v12 = vadd.f32 %v9083_v1, %v3741_v41  ;;  %v3742_v7 = vmul.f32 %v4163_v37, %v9078_v29 }
 0x457   : > { %v3778_v8 = vadd.f32 %v9083_v1, %v3739_v28  ;;  %v3740_v20 = vmul.f32 %v9078_v29, %v3644_v27 }
 0x458   : > { %v3812_v23 = vmax.f32 %v3780_v12, 0.0  ;;  %v3781_v56 = vadd.f32 %v9083_v1, %v3742_v7 }
 0x459   : > { %v3810_v26 = vmax.f32 %v3778_v8, 0.0  ;;  %v3779_v18 = vadd.f32 %v9083_v1, %v3740_v20  ;;  %v9867_v20 = vld [vmem:[#allocation83_spill] sm:$0xff] }
 0x45a   : > { %v3813_v53 = vmax.f32 %v3781_v56, 0.0  ;;  %v3844_v33 = vadd.f32 %v3812_v23, %v9856_v24  ;;  %v9871_v23 = vld [vmem:[#allocation52_spill] sm:$0xff] }
 0x45b   : > { %v3811_v40 = vmax.f32 %v3779_v18, 0.0  ;;  %v3842_v42 = vadd.f32 %v3810_v26, %v9852_v4  ;;  %v9868_v26 = vmax.f32 %v9867_v20, 0.0  ;;  %v9872_v56 = vmax.f32 %v9871_v23, 0.0  ;;  %v9885_v20 = vld [vmem:[#allocation70_spill] sm:$0xff] }
 0x45c   : > { %v3845_v6 = vadd.f32 %v3813_v53, %v9858_v46 }
 0x45d   : > { %3874 = vxpose.xlu0.b32.cont [13/16] (narrow) %v3842_v42, 8  ;;  %v3843_v34 = vadd.f32 %v3811_v40, %v9854_v52  ;;  %v9869_v40 = vld [vmem:[#allocation80_spill] sm:$0xff] }
 0x45e   : > { %v9870_v59 = vmax.f32 %v9869_v40, 0.0 }
 0x461   : > { %3875 = vxpose.xlu0.b32.cont [14/16] (narrow) %v3843_v34, 8  ;;  %v9873_v34 = vld [vmem:[#allocation57_spill] sm:$0xff] }
 0x462   : > { %v9874_v53 = vmax.f32 %v9873_v34, 0.0 }
 0x465   : > { %3876 = vxpose.xlu0.b32.cont [15/16] (narrow) %v3844_v33, 8 }
 0x467   : > { %v4166_v19 = vpop.f32.mrb[16].mxu1 }
 0x468   : > { %v3657_v32 = vpop.f32.mrb[17].mxu1  ;;  %v3745_v39 = vmul.f32 %v4166_v19, %v9078_v29 }
 0x469   : > { %v3743_v21 = vmul.f32 %v9078_v29, %v3657_v32  ;;  %3877 = vxpose.xlu0.b32.end [16/16] (narrow) %v3845_v6, 8  ;;  %v4167_v47 = vpop.f32.mrb[18].mxu1 }
 0x46a   : > { %v3660_v51 = vpop.f32.mrb[19].mxu1  ;;  %v3784_v31 = vadd.f32 %v9083_v1, %v3745_v39  ;;  %v3746_v22 = vmul.f32 %v4167_v47, %v9078_v29 }
 0x46b   : > { %v3782_v44 = vadd.f32 %v9083_v1, %v3743_v21  ;;  %v3744_v35 = vmul.f32 %v9078_v29, %v3660_v51 }
 0x46c   : > { %v3816_v50 = vmax.f32 %v3784_v31, 0.0  ;;  %v3785_v45 = vadd.f32 %v9083_v1, %v3746_v22 }
 0x46d   : > { %v3814_v25 = vmax.f32 %v3782_v44, 0.0  ;;  %v3783_v30 = vadd.f32 %v9083_v1, %v3744_v35  ;;  %v9875_v35 = vld [vmem:[#allocation62_spill] sm:$0xff] }
 0x46e   : > { %v3817_v9 = vmax.f32 %v3785_v45, 0.0  ;;  %v3848_v2 = vadd.f32 %v3816_v50, %v9864_v55  ;;  %v9879_v50 = vld [vmem:[#allocation60_spill] sm:$0xff] }
 0x46f   : > { %v3815_v63 = vmax.f32 %v3783_v30, 0.0  ;;  %v3846_v49 = vadd.f32 %v3814_v25, %v9860_v61  ;;  %v9876_v25 = vmax.f32 %v9875_v35, 0.0  ;;  %v9880_v45 = vmax.f32 %v9879_v50, 0.0 }
 0x470   : > { %v3849_v62 = vadd.f32 %v3817_v9, %v9866_v43 }
 0x471   : > { %3894 = vxpose.xlu1.b32.start [1/16] (narrow) %v3846_v49, 8  ;;  %v3847_v38 = vadd.f32 %v3815_v63, %v9862_v57  ;;  %v9877_v63 = vld [vmem:[#allocation65_spill] sm:$0xff] }
 0x472   : > { %v9878_v10 = vmax.f32 %v9877_v63, 0.0 }
 0x475   : > { %3895 = vxpose.xlu1.b32.cont [2/16] (narrow) %v3847_v38, 8  ;;  %v9881_v38 = vld [vmem:[#allocation64_spill] sm:$0xff] }
 0x476   : > { %v9882_v9 = vmax.f32 %v9881_v38, 0.0 }
 0x479   : > { %3896 = vxpose.xlu1.b32.cont [3/16] (narrow) %v3848_v2, 8 }
 0x47b   : > { %v4170_v58 = vpop.f32.mrb[20].mxu1 }
 0x47c   : > { %v3673_v0 = vpop.f32.mrb[21].mxu1  ;;  %v3749_v5 = vmul.f32 %v4170_v58, %v9078_v29 }
 0x47d   : > { %v3747_v16 = vmul.f32 %v9078_v29, %v3673_v0  ;;  %3897 = vxpose.xlu1.b32.cont [4/16] (narrow) %v3849_v62, 8  ;;  %v4171_v48 = vpop.f32.mrb[22].mxu1 }
 0x47e   : > { %v3676_v17 = vpop.f32.mrb[23].mxu1  ;;  %v3788_v27 = vadd.f32 %v9083_v1, %v3749_v5  ;;  %v3750_v41 = vmul.f32 %v4171_v48, %v9078_v29 }
 0x47f   : > { %v3786_v60 = vadd.f32 %v9083_v1, %v3747_v16  ;;  %v3748_v13 = vmul.f32 %v9078_v29, %v3676_v17 }
 0x480   : > { %v3820_v12 = vmax.f32 %v3788_v27, 0.0  ;;  %v3789_v7 = vadd.f32 %v9083_v1, %v3750_v41 }
 0x481   : > { %v3818_v28 = vmax.f32 %v3786_v60, 0.0  ;;  %v3787_v37 = vadd.f32 %v9083_v1, %v3748_v13  ;;  %v9883_v13 = vld [vmem:[#allocation67_spill] sm:$0xff] }
 0x482   : > { %v3821_v42 = vmax.f32 %v3789_v7, 0.0  ;;  %v3852_v54 = vadd.f32 %v3820_v12, %v9872_v56 }
 0x483   : > { %v3819_v8 = vmax.f32 %v3787_v37, 0.0  ;;  %v3850_v18 = vadd.f32 %v3818_v28, %v9868_v26  ;;  %v9884_v28 = vmax.f32 %v9883_v13, 0.0  ;;  %v9886_v26 = vmax.f32 %v9885_v20, 0.0 }
 0x484   : > { %v3853_v11 = vadd.f32 %v3821_v42, %v9874_v53 }
 0x485   : > { %3898 = vxpose.xlu1.b32.cont [5/16] (narrow) %v3850_v18, 8  ;;  %v3851_v4 = vadd.f32 %v3819_v8, %v9870_v59  ;;  %v9889_v59 = vld [vmem:[#allocation69_spill] sm:$0xff] }
 0x489   : > { %3899 = vxpose.xlu1.b32.cont [6/16] (narrow) %v3851_v4, 8  ;;  %v9890_v4 = vmax.f32 %v9889_v59, 0.0 }
 0x48d   : > { %3900 = vxpose.xlu1.b32.cont [7/16] (narrow) %v3852_v54, 8 }
 0x48f   : > { %v4174_v52 = vpop.f32.mrb[24].mxu1 }
 0x490   : > { %v3689_v24 = vpop.f32.mrb[25].mxu1  ;;  %v3753_v46 = vmul.f32 %v4174_v52, %v9078_v29 }
 0x491   : > { %v3751_v33 = vmul.f32 %v9078_v29, %v3689_v24  ;;  %3901 = vxpose.xlu1.b32.cont [8/16] (narrow) %v3853_v11, 8  ;;  %v4175_v19 = vpop.f32.mrb[26].mxu1 }
 0x492   : > { %v3692_v36 = vpop.f32.mrb[27].mxu1  ;;  %v3792_v51 = vadd.f32 %v9083_v1, %v3753_v46  ;;  %v3754_v39 = vmul.f32 %v4175_v19, %v9078_v29 }
 0x493   : > { %v3790_v6 = vadd.f32 %v9083_v1, %v3751_v33  ;;  %v3752_v32 = vmul.f32 %v9078_v29, %v3692_v36 }
 0x494   : > { %v3824_v31 = vmax.f32 %v3792_v51, 0.0  ;;  %v3793_v22 = vadd.f32 %v9083_v1, %v3754_v39 }
 0x495   : > { %v3822_v21 = vmax.f32 %v3790_v6, 0.0  ;;  %v3791_v47 = vadd.f32 %v9083_v1, %v3752_v32 }
 0x496   : > { %v3825_v49 = vmax.f32 %v3793_v22, 0.0  ;;  %v3856_v3 = vadd.f32 %v3824_v31, %v9880_v45 }
 0x497   : > { %v3823_v44 = vmax.f32 %v3791_v47, 0.0  ;;  %v3854_v30 = vadd.f32 %v3822_v21, %v9876_v25 }
 0x498   : > { %v3857_v15 = vadd.f32 %v3825_v49, %v9882_v9 }
 0x499   : > { %3902 = vxpose.xlu1.b32.cont [9/16] (narrow) %v3854_v30, 8  ;;  %v3855_v61 = vadd.f32 %v3823_v44, %v9878_v10 }
 0x49d   : > { %3903 = vxpose.xlu1.b32.cont [10/16] (narrow) %v3855_v61, 8 }
 0x4a1   : > { %3904 = vxpose.xlu1.b32.cont [11/16] (narrow) %v3856_v3, 8 }
 0x4a3   : > { %v4178_v57 = vpop.f32.mrb[28].mxu1 }
 0x4a4   : > { %v3705_v55 = vpop.f32.mrb[29].mxu1  ;;  %v3757_v43 = vmul.f32 %v4178_v57, %v9078_v29 }
 0x4a5   : > { %v3755_v2 = vmul.f32 %v9078_v29, %v3705_v55  ;;  %3905 = vxpose.xlu1.b32.cont [12/16] (narrow) %v3857_v15, 8  ;;  %v4179_v58 = vpop.f32.mrb[30].mxu1 }
 0x4a6   : > { %v3708_v14 = vpop.f32.mrb[31].mxu1  ;;  %v3796_v17 = vadd.f32 %v9083_v1, %v3757_v43  ;;  %v3758_v5 = vmul.f32 %v4179_v58, %v9078_v29 }
 0x4a7   : > { %v3794_v62 = vadd.f32 %v9083_v1, %v3755_v2  ;;  %v3756_v0 = vmul.f32 %v9078_v29, %v3708_v14  ;;  %v9887_v29 = vld [vmem:[#allocation66_spill] sm:$0xff] }
 0x4a8   : > { %v3828_v41 = vmax.f32 %v3796_v17, 0.0  ;;  %v3797_v8 = vadd.f32 %v9083_v1, %v3758_v5  ;;  %v9888_v7 = vmax.f32 %v9887_v29, 0.0 }
 0x4a9   : > { %v3826_v16 = vmax.f32 %v3794_v62, 0.0  ;;  %v3795_v48 = vadd.f32 %v9083_v1, %v3756_v0 }
 0x4aa   : > { %v3829_v12 = vmax.f32 %v3797_v8, 0.0  ;;  %v3860_v40 = vadd.f32 %v3828_v41, %v9888_v7 }
 0x4ab   : > { %v3827_v60 = vmax.f32 %v3795_v48, 0.0  ;;  %v3858_v37 = vadd.f32 %v3826_v16, %v9884_v28 }
 0x4ac   : > { %v3861_v42 = vadd.f32 %v3829_v12, %v9890_v4 }
 0x4ad   : > { %3906 = vxpose.xlu1.b32.cont [13/16] (narrow) %v3858_v37, 8  ;;  %v3878_v27 = vpop.trf.xlu0  ;;  %v3859_v18 = vadd.f32 %v3827_v60, %v9886_v26 }
 0x4ae   : > { %3926 = vst [vmem:[%s271_s13] sm:$0xff] %v3878_v27 }
 0x4b1   : > { %3907 = vxpose.xlu1.b32.cont [14/16] (narrow) %v3859_v18, 8 }
 0x4b5   : > { %3908 = vxpose.xlu1.b32.cont [15/16] (narrow) %v3860_v40, 8 }
 0x4b9   : > { %3909 = vxpose.xlu1.b32.end [16/16] (narrow) %v3861_v42, 8 }
 0x4fd   : > { %v3910_v1 = vpop.trf.xlu1 }
 0x4fe   : > { %3927 = vst [vmem:[%s271_s13 + $0x8] sm:$0xff] %v3910_v1 }
 0x4ff   : > { %5535 = shalt.err (!%p5532_p3)
}
 0x500   : > { %s5536_s23 = scalar_lea.hbm %s9222_s16, 256  ;;  %s5540_s9 = scalar_lea.hbm %s9271_s7, 512 }
 0x501   : > { %p5537_p4 = scmp.ne.s32.totalorder %s9222_s16, %s5536_s23  ;;  %p5541_p9 = scmp.lt.u32.totalorder %s9222_s16, %s9271_s7 }
 0x502   : > { %p5542_p10 = scmp.lt.u32.totalorder %s5540_s9, %s5536_s23  ;;  %p5544_p12 = scmp.lt.u32.totalorder %s5536_s23, %s9222_s16 }
 0x503   : > { %p5538_p7 = pnand %p5537_p4, %p5678_p5 }
 0x504   : > { %p5543_p11 = por %p5542_p10, %p5541_p9 }
 0x505   : > { %p5539_p8 = pneg %p5538_p7 }
 0x506   : > { %p5545_p13 = por %p5544_p12, %p5543_p11 }
 0x508   : > { %p5546_p0 = pnand %p5545_p13, %p5539_p8 }
 0x50a   : > { %5549 = shalt.err (!%p5546_p0)
}
 0x50b   : > { %4182 = dma.vmem_to_hbm [thread:$0]  (%p5678_p5), %s9217_s14, 256, %s9222_s16, %s3929_s18  }
 0x50c PF: > { %p4188_p1 = scmp.ge.s32.totalorder %s5584_s27, 2  ;;  %s3955_s29 = sand.u32 1, %s5572_s24  }
 0x50d   : > { %s3956_s15 = scalar_lea.sflag [#allocation3], %s3955_s29 }
 0x50e   : > { %p4185_p2 = pnand %p4188_p1, %p5682_p6 }
 0x510   : > { %5567 = dma.done.wait (!%p4185_p2), %s3956_s15, 256  }
 0x511   : > { %5569 = vsyncadd (!%p4185_p2), %s3956_s15, 4294967040  ;;  %p17_p3 = scmp.ge.s32.totalorder %s5665_s30, 4   ;;  %s9891_s24 = smov %s5576_s25 }
 0x512   : > { %s9892_s25 = smov %s5580_s26  ;;  %s9893_s26 = smov %s5676_s10 }
 0x513   : > { %s9894_s27 = smov %s5665_s30  ;;  %19 = sbr.rel (!%p17_p3) target bundleno = 3 (0x3), region = 83 }
 0x51a   :  { %3961 = vsyncpa [#allocation3], 1 }
 0x51b   :  { %3963 = vsyncpa [#allocation3 + $0x1], 1 }

</bundles_post_ra>
